<compile_context>
chip_gen: v6e
topology: v6e:2x2x1
jax: 0.10.0
libtpu: 0.0.40
codegen_flags: <defaults>
</compile_context>

<pallas_src>
import jax
import jax.numpy as jnp
from jax import lax
from jax.experimental import pallas as pl
from jax.experimental.pallas import tpu as pltpu

_LANE = 128
_SUBLANE = 8
_BN_EPS = 1e-5


def _round_up(n, m):
    return ((n + m - 1) // m) * m


# ----------------------------------------------------------------------------
# Fused Pallas kernel (all LSTM layers + MLP head)
# ----------------------------------------------------------------------------

def _make_fused_kernel(T, Bp, hps, num_layers):
    """Build the fused forward kernel.

    Kernel refs (in order):
      x_ref                      (T*Bp, Din_pad)      time-major input slab
      per layer l:  wih_l        (in_pad_l, 4*Hp_l)   input->gates (BN-folded, gate-padded)
                    whh_l        (Hp_l,     4*Hp_l)   hidden->gates (gate-padded)
                    b_l          (1,        4*Hp_l)   combined bias (BN shift folded)
      wd1 (Hp_last, D1p), bd1 (1, D1p), wd2 (D1p, D2p), bd2 (1, D2p),
      wd3 (D2p, D3p), bd3 (1, D3p)
      o_ref                      (Bp, D3p)
    PyTorch gate order: i, f, g, o.
    """

    def kernel(*refs):
        f32 = jnp.float32
        x_ref = refs[0]
        layer_refs = refs[1:1 + 3 * num_layers]
        (wd1_ref, bd1_ref, wd2_ref, bd2_ref,
         wd3_ref, bd3_ref) = refs[1 + 3 * num_layers:-1]
        o_ref = refs[-1]

        def lstm_scan(gx, whh, Hp):
            # gx: (T*Bp, 4*Hp) precomputed input projection + bias, time-major.
            # Per-step work is only h @ whh plus elementwise gate math (EUP/VPU).
            h = jnp.zeros((Bp, Hp), f32)
            c = jnp.zeros((Bp, Hp), f32)
            hs = []
            for t in range(T):  # static T -> fully unrolled, static aligned slices
                gates = gx[t * Bp:(t + 1) * Bp, :] + jnp.dot(
                    h, whh, preferred_element_type=f32)
                i_g = jax.nn.sigmoid(gates[:, 0 * Hp:1 * Hp])   # vreg-aligned slices
                f_g = jax.nn.sigmoid(gates[:, 1 * Hp:2 * Hp])
                g_g = jnp.tanh(gates[:, 2 * Hp:3 * Hp])
                o_g = jax.nn.sigmoid(gates[:, 3 * Hp:4 * Hp])
                c = f_g * c + i_g * g_g
                h = o_g * jnp.tanh(c)
                hs.append(h)
            return hs

        seq = x_ref[...]                                   # (T*Bp, Din_pad), time-major
        hs = None
        for l in range(num_layers):
            wih_ref, whh_ref, b_ref = layer_refs[3 * l:3 * l + 3]
            # Input projection hoisted out of the recurrence: one MXU op per layer.
            gx = jnp.dot(seq, wih_ref[...], preferred_element_type=f32) + b_ref[...]
            hs = lstm_scan(gx, whh_ref[...], hps[l])
            if l + 1 < num_layers:
                # Layer output sequence never leaves VMEM (previous-layer eval-BN is
                # already folded into the next layer's wih/b).
                seq = jnp.concatenate(hs, axis=0)          # (T*Bp, Hp_l)

        h_last = hs[-1]                                    # (Bp, Hp_last); last BN folded into dense1

        slope = 0.01  # PyTorch leaky_relu default negative_slope
        leaky = lambda v: jnp.where(v >= 0, v, slope * v)
        z = leaky(jnp.dot(h_last, wd1_ref[...], preferred_element_type=f32) + bd1_ref[...])
        # dropout_final: identity in eval mode
        z = leaky(jnp.dot(z, wd2_ref[...], preferred_element_type=f32) + bd2_ref[...])
        o_ref[...] = jnp.dot(z, wd3_ref[...], preferred_element_type=f32) + bd3_ref[...]

    return kernel


# ----------------------------------------------------------------------------
# Host-side prep: BN folding, transposes, lane/sublane padding
# ----------------------------------------------------------------------------

def _pad_rows(w, rows_to):
    pad = rows_to - w.shape[0]
    return jnp.pad(w, ((0, pad), (0, 0))) if pad else w


def _pad_cols(w, cols_to):
    pad = cols_to - w.shape[1]
    return jnp.pad(w, ((0, 0), (0, pad))) if pad else w


def _pad_gate_cols(w_t, H, Hp):
    """(K, 4H) -> (K, 4Hp): each gate block lands at lane offset g*Hp (vreg aligned)."""
    if H == Hp:
        return w_t
    K = w_t.shape[0]
    out = jnp.zeros((K, 4 * Hp), w_t.dtype)
    for g in range(4):
        out = out.at[:, g * Hp:g * Hp + H].set(w_t[:, g * H:(g + 1) * H])
    return out


def _prepare_params(params, input_size):
    """Fold eval-mode BatchNorm into downstream weights, transpose, and pad.

    BN(eval): y = x*s + t with s = gamma*rsqrt(var+eps), t = beta - mean*s.
      layer i>0:  gates_x = BN(h_{i-1}) @ Wih_i^T = h_{i-1} @ (Wih_i*s)^T + Wih_i@t
      dense1:     z = BN(h_last) @ W1^T + b1     = h_last  @ (W1*s)^T + (W1@t + b1)
    """
    layers = params["lstm_layers"]
    num_layers = len(layers)
    hs = [int(l["w_hh"].shape[1]) for l in layers]
    hps = [_round_up(h, _LANE) for h in hs]

    scales, shifts = [], []
    for l in layers:
        s = l["bn_gamma"] * lax.rsqrt(l["bn_var"] + _BN_EPS)
        t = l["bn_beta"] - l["bn_mean"] * s
        scales.append(s)
        shifts.append(t)

    prepped = []
    in_dim = input_size
    in_pad = _round_up(input_size, _LANE)   # raw feature dim lane-padded (tiny here)
    for i, l in enumerate(layers):
        H, Hp = hs[i], hps[i]
        w_ih = l["w_ih"]                              # (4H, in_dim)
        bias = l["b_ih"] + l["b_hh"]                  # (4H,)
        if i > 0:                                     # fold previous layer's eval-BN
            w_ih = w_ih * scales[i - 1][None, :]
            bias = bias + l["w_ih"] @ shifts[i - 1]
        wih_t = _pad_gate_cols(_pad_rows(w_ih.T, in_pad), H, Hp)
        whh_t = _pad_gate_cols(_pad_rows(l["w_hh"].T, Hp), H, Hp)
        b_row = _pad_gate_cols(bias[None, :], H, Hp)
        prepped += [wih_t, whh_t, b_row]
        in_dim, in_pad = H, Hp

    d1 = params["w1"].shape[0]
    d2 = params["w2"].shape[0]
    d3 = params["w3"].shape[0]
    d1p, d2p, d3p = (_round_up(d, _LANE) for d in (d1, d2, d3))

    # fold last layer's eval-BN into dense1; lane-pad the whole MLP head so every
    # matmul (and the final output store) is lane-dense / unmasked.
    w1 = params["w1"] * scales[-1][None, :]
    b1 = params["b1"] + params["w1"] @ shifts[-1]
    wd1 = _pad_cols(_pad_rows(w1.T, hps[-1]), d1p)
    wd2 = _pad_cols(_pad_rows(params["w2"].T, d1p), d2p)
    wd3 = _pad_cols(_pad_rows(params["w3"].T, d2p), d3p)
    bd1 = _pad_cols(b1[None, :], d1p)
    bd2 = _pad_cols(params["b2"][None, :], d2p)
    bd3 = _pad_cols(params["b3"][None, :], d3p)
    prepped += [wd1, bd1, wd2, bd2, wd3, bd3]
    return prepped, hps, num_layers, d3, d3p


def lstm_model_forward(x, params):
    """Full LSTMModel.forward (eval mode) as a single fused pallas_call."""
    B, T, Din = x.shape
    Bp = _round_up(B, _SUBLANE)
    Din_pad = _round_up(Din, _LANE)
    prepped, hps, num_layers, D3, D3p = _prepare_params(params, Din)

    # time-major, batch padded to 8 sublanes, features lane-padded, flattened to a 2-D
    # slab so the per-layer input projection is a single big MXU matmul.
    x_tm = jnp.swapaxes(x, 0, 1)                                      # (T, B, Din)
    x_tm = jnp.pad(x_tm, ((0, 0), (0, Bp - B), (0, Din_pad - Din)))   # (T, Bp, Din_pad)
    x_flat = x_tm.reshape(T * Bp, Din_pad).astype(jnp.float32)

    inputs = [x_flat] + [a.astype(jnp.float32) for a in prepped]
    # All operands are small; one full-extent block per operand, resident in VMEM.
    in_specs = [pl.BlockSpec(a.shape, lambda i: (0, 0)) for a in inputs]

    # TODO(synk): for large batches on v7x, add a parallel batch grid axis so both
    # TensorCores are used; at Bp=8 a single program is the right shape.
    kernel = _make_fused_kernel(T, Bp, hps, num_layers)
    out = pl.pallas_call(
        kernel,
        out_shape=jax.ShapeDtypeStruct((Bp, D3p), jnp.float32),
        grid=(1,),
        in_specs=in_specs,
        out_specs=pl.BlockSpec((Bp, D3p), lambda i: (0, 0)),
        compiler_params=pltpu.CompilerParams(
            dimension_semantics=("arbitrary",),
            vmem_limit_bytes=64 * 1024 * 1024),
    )(*inputs)
    return out[:B, :D3]


# ----------------------------------------------------------------------------
# Pure-JAX reference (independent of folding/padding) for correctness check
# ----------------------------------------------------------------------------

def _lstm_layer_ref(x, w_ih, w_hh, b_ih, b_hh):
    H = w_hh.shape[1]
    B = x.shape[0]

    def step(carry, x_t):
        h, c = carry
        gates = x_t @ w_ih.T + h @ w_hh.T + b_ih + b_hh
        i, f, g, o = jnp.split(gates, 4, axis=-1)
        i, f, o = jax.nn.sigmoid(i), jax.nn.sigmoid(f), jax.nn.sigmoid(o)
        g = jnp.tanh(g)
        c = f * c + i * g
        h = o * jnp.tanh(c)
        return (h, c), h

    init = (jnp.zeros((B, H)), jnp.zeros((B, H)))
    _, hs = lax.scan(step, init, jnp.swapaxes(x, 0, 1))
    return jnp.swapaxes(hs, 0, 1)


def lstm_model_forward_ref(x, params):
    leaky = lambda v: jnp.where(v >= 0, v, 0.01 * v)
    for layer in params["lstm_layers"]:
        x = _lstm_layer_ref(x, layer["w_ih"], layer["w_hh"], layer["b_ih"], layer["b_hh"])
        inv = lax.rsqrt(layer["bn_var"] + _BN_EPS)
        x = (x - layer["bn_mean"]) * inv * layer["bn_gamma"] + layer["bn_beta"]
    x = x[:, -1, :]
    x = leaky(x @ params["w1"].T + params["b1"])
    x = leaky(x @ params["w2"].T + params["b2"])
    return x @ params["w3"].T + params["b3"]


# ----------------------------------------------------------------------------
# Deterministic parameter construction
# ----------------------------------------------------------------------------

def init_params(key, input_size, lstm_units, dense_units, output_size):
    params = {"lstm_layers": []}
    in_size = input_size
    for units in lstm_units:
        key, k1, k2, k3, k4, k5, k6 = jax.random.split(key, 7)
        bound = 1.0 / jnp.sqrt(units)
        layer = {
            "w_ih": jax.random.uniform(k1, (4 * units, in_size), jnp.float32, -bound, bound),
            "w_hh": jax.random.uniform(k2, (4 * units, units), jnp.float32, -bound, bound),
            "b_ih": jax.random.uniform(k3, (4 * units,), jnp.float32, -bound, bound),
            "b_hh": jax.random.uniform(k4, (4 * units,), jnp.float32, -bound, bound),
            "bn_gamma": 1.0 + 0.1 * jax.random.normal(k5, (units,), jnp.float32),
            "bn_beta": 0.1 * jax.random.normal(k6, (units,), jnp.float32),
            "bn_mean": jnp.zeros((units,), jnp.float32),
            "bn_var": jnp.ones((units,), jnp.float32),
        }
        params["lstm_layers"].append(layer)
        in_size = units

    def linear(key, out_f, in_f):
        k1, k2 = jax.random.split(key)
        bound = 1.0 / jnp.sqrt(in_f)
        w = jax.random.uniform(k1, (out_f, in_f), jnp.float32, -bound, bound)
        b = jax.random.uniform(k2, (out_f,), jnp.float32, -bound, bound)
        return w, b

    key, k1, k2, k3 = jax.random.split(key, 4)
    params["w1"], params["b1"] = linear(k1, dense_units, lstm_units[-1])
    params["w2"], params["b2"] = linear(k2, 32, dense_units)
    params["w3"], params["b3"] = linear(k3, output_size, 32)
    return params


# ----------------------------------------------------------------------------
# Main
# ----------------------------------------------------------------------------

if __name__ == "__main__":
    # Small config consistent with the module: num_layers=2, lstm_units=hidden_size=32,
    # dense_units=64, output_shape=1; input is [batch, seq_len, input_size].
    batch, seq_len, input_size = 2, 8, 4
    lstm_units = [32, 32]
    dense_units = 64
    output_size = 1

    key = jax.random.PRNGKey(0)
    key, xkey = jax.random.split(key)
    x = jax.random.normal(xkey, (batch, seq_len, input_size), jnp.float32)
    params = init_params(key, input_size, lstm_units, dense_units, output_size)

    out = jax.jit(lstm_model_forward)(x, params)
    out = jax.block_until_ready(out)

    ref = lstm_model_forward_ref(x, params)
    assert out.shape == (batch, output_size), out.shape
    assert jnp.allclose(out, ref, atol=1e-4, rtol=1e-4), (out, ref)

    print("KERNEL_OK")
</pallas_src>

<mosaic_0001>
module attributes {stable_mosaic.version = 11 : i64} {
  func.func @kernel(%arg0: i32, %arg1: memref<64x128xf32, #tpu.memory_space<vmem>>, %arg2: memref<128x512xf32, #tpu.memory_space<vmem>>, %arg3: memref<128x512xf32, #tpu.memory_space<vmem>>, %arg4: memref<1x512xf32, #tpu.memory_space<vmem>>, %arg5: memref<128x512xf32, #tpu.memory_space<vmem>>, %arg6: memref<128x512xf32, #tpu.memory_space<vmem>>, %arg7: memref<1x512xf32, #tpu.memory_space<vmem>>, %arg8: memref<128x128xf32, #tpu.memory_space<vmem>>, %arg9: memref<1x128xf32, #tpu.memory_space<vmem>>, %arg10: memref<128x128xf32, #tpu.memory_space<vmem>>, %arg11: memref<1x128xf32, #tpu.memory_space<vmem>>, %arg12: memref<128x128xf32, #tpu.memory_space<vmem>>, %arg13: memref<1x128xf32, #tpu.memory_space<vmem>>, %arg14: memref<8x128xf32, #tpu.memory_space<vmem>>) attributes {dimension_semantics = [#tpu.dimension_semantics<arbitrary>], iteration_bounds = array<i64: 1>, scalar_prefetch = 0 : i64, scratch_operands = 0 : i64, tpu.core_type = #tpu.core_type<tc>, window_params = [{pipeline_mode = #tpu.pipeline_mode<synchronous>, transform_indices = @transform_0, window_bounds = array<i64: 64, 128>}, {pipeline_mode = #tpu.pipeline_mode<synchronous>, transform_indices = @transform_1, window_bounds = array<i64: 128, 512>}, {pipeline_mode = #tpu.pipeline_mode<synchronous>, transform_indices = @transform_2, window_bounds = array<i64: 128, 512>}, {pipeline_mode = #tpu.pipeline_mode<synchronous>, transform_indices = @transform_3, window_bounds = array<i64: 1, 512>}, {pipeline_mode = #tpu.pipeline_mode<synchronous>, transform_indices = @transform_4, window_bounds = array<i64: 128, 512>}, {pipeline_mode = #tpu.pipeline_mode<synchronous>, transform_indices = @transform_5, window_bounds = array<i64: 128, 512>}, {pipeline_mode = #tpu.pipeline_mode<synchronous>, transform_indices = @transform_6, window_bounds = array<i64: 1, 512>}, {pipeline_mode = #tpu.pipeline_mode<synchronous>, transform_indices = @transform_7, window_bounds = array<i64: 128, 128>}, {pipeline_mode = #tpu.pipeline_mode<synchronous>, transform_indices = @transform_8, window_bounds = array<i64: 1, 128>}, {pipeline_mode = #tpu.pipeline_mode<synchronous>, transform_indices = @transform_9, window_bounds = array<i64: 128, 128>}, {pipeline_mode = #tpu.pipeline_mode<synchronous>, transform_indices = @transform_10, window_bounds = array<i64: 1, 128>}, {pipeline_mode = #tpu.pipeline_mode<synchronous>, transform_indices = @transform_11, window_bounds = array<i64: 128, 128>}, {pipeline_mode = #tpu.pipeline_mode<synchronous>, transform_indices = @transform_12, window_bounds = array<i64: 1, 128>}, {pipeline_mode = #tpu.pipeline_mode<synchronous>, transform_indices = @transform_13, window_bounds = array<i64: 8, 128>}]} {
    %c0 = arith.constant 0 : index
    %c0_0 = arith.constant 0 : index
    %0 = vector.load %arg1[%c0, %c0_0] : memref<64x128xf32, #tpu.memory_space<vmem>>, vector<64x128xf32>
    %c0_1 = arith.constant 0 : index
    %c0_2 = arith.constant 0 : index
    %1 = vector.load %arg2[%c0_1, %c0_2] : memref<128x512xf32, #tpu.memory_space<vmem>>, vector<128x512xf32>
    %cst = arith.constant dense<0.000000e+00> : vector<64x512xf32>
    %2 = tpu.matmul %0, %1, %cst {dimension_numbers = #tpu.dot_dimension_numbers<[1], [0], [0], [1], [0, 0, 1, 1], [], []>} : vector<64x128xf32>, vector<128x512xf32>, vector<64x512xf32> -> vector<64x512xf32>
    %c0_3 = arith.constant 0 : index
    %c0_4 = arith.constant 0 : index
    %3 = vector.load %arg4[%c0_3, %c0_4] : memref<1x512xf32, #tpu.memory_space<vmem>>, vector<1x512xf32>
    %4 = vector.broadcast %3 : vector<1x512xf32> to vector<64x512xf32>
    %5 = arith.addf %2, %4 : vector<64x512xf32>
    %c0_5 = arith.constant 0 : index
    %c0_6 = arith.constant 0 : index
    %6 = vector.load %arg3[%c0_5, %c0_6] : memref<128x512xf32, #tpu.memory_space<vmem>>, vector<128x512xf32>
    %cst_7 = arith.constant 0.000000e+00 : f32
    %7 = vector.broadcast %cst_7 : f32 to vector<8x128xf32>
    %cst_8 = arith.constant 0.000000e+00 : f32
    %8 = vector.broadcast %cst_8 : f32 to vector<8x128xf32>
    %9 = vector.extract_strided_slice %5 {offsets = [0, 0], sizes = [8, 512], strides = [1, 1]} : vector<64x512xf32> to vector<8x512xf32>
    %cst_9 = arith.constant dense<0.000000e+00> : vector<8x512xf32>
    %10 = tpu.matmul %7, %6, %cst_9 {dimension_numbers = #tpu.dot_dimension_numbers<[1], [0], [0], [1], [0, 0, 1, 1], [], []>} : vector<8x128xf32>, vector<128x512xf32>, vector<8x512xf32> -> vector<8x512xf32>
    %11 = arith.addf %9, %10 : vector<8x512xf32>
    %12 = vector.extract_strided_slice %11 {offsets = [0, 0], sizes = [8, 128], strides = [1, 1]} : vector<8x512xf32> to vector<8x128xf32>
    %13 = arith.negf %12 : vector<8x128xf32>
    %14 = math.exp %13 : vector<8x128xf32>
    %cst_10 = arith.constant 1.000000e+00 : f32
    %15 = vector.broadcast %cst_10 : f32 to vector<8x128xf32>
    %16 = arith.addf %15, %14 : vector<8x128xf32>
    %17 = arith.divf %15, %16 : vector<8x128xf32>
    %18 = vector.extract_strided_slice %11 {offsets = [0, 128], sizes = [8, 128], strides = [1, 1]} : vector<8x512xf32> to vector<8x128xf32>
    %19 = arith.negf %18 : vector<8x128xf32>
    %20 = math.exp %19 : vector<8x128xf32>
    %cst_11 = arith.constant 1.000000e+00 : f32
    %21 = vector.broadcast %cst_11 : f32 to vector<8x128xf32>
    %22 = arith.addf %21, %20 : vector<8x128xf32>
    %23 = arith.divf %21, %22 : vector<8x128xf32>
    %24 = vector.extract_strided_slice %11 {offsets = [0, 256], sizes = [8, 128], strides = [1, 1]} : vector<8x512xf32> to vector<8x128xf32>
    %25 = math.tanh %24 : vector<8x128xf32>
    %26 = vector.extract_strided_slice %11 {offsets = [0, 384], sizes = [8, 128], strides = [1, 1]} : vector<8x512xf32> to vector<8x128xf32>
    %27 = arith.negf %26 : vector<8x128xf32>
    %28 = math.exp %27 : vector<8x128xf32>
    %cst_12 = arith.constant 1.000000e+00 : f32
    %29 = vector.broadcast %cst_12 : f32 to vector<8x128xf32>
    %30 = arith.addf %29, %28 : vector<8x128xf32>
    %31 = arith.divf %29, %30 : vector<8x128xf32>
    %32 = arith.mulf %23, %8 : vector<8x128xf32>
    %33 = arith.mulf %17, %25 : vector<8x128xf32>
    %34 = arith.addf %32, %33 : vector<8x128xf32>
    %35 = math.tanh %34 : vector<8x128xf32>
    %36 = arith.mulf %31, %35 : vector<8x128xf32>
    %37 = vector.extract_strided_slice %5 {offsets = [8, 0], sizes = [8, 512], strides = [1, 1]} : vector<64x512xf32> to vector<8x512xf32>
    %cst_13 = arith.constant dense<0.000000e+00> : vector<8x512xf32>
    %38 = tpu.matmul %36, %6, %cst_13 {dimension_numbers = #tpu.dot_dimension_numbers<[1], [0], [0], [1], [0, 0, 1, 1], [], []>} : vector<8x128xf32>, vector<128x512xf32>, vector<8x512xf32> -> vector<8x512xf32>
    %39 = arith.addf %37, %38 : vector<8x512xf32>
    %40 = vector.extract_strided_slice %39 {offsets = [0, 0], sizes = [8, 128], strides = [1, 1]} : vector<8x512xf32> to vector<8x128xf32>
    %41 = arith.negf %40 : vector<8x128xf32>
    %42 = math.exp %41 : vector<8x128xf32>
    %cst_14 = arith.constant 1.000000e+00 : f32
    %43 = vector.broadcast %cst_14 : f32 to vector<8x128xf32>
    %44 = arith.addf %43, %42 : vector<8x128xf32>
    %45 = arith.divf %43, %44 : vector<8x128xf32>
    %46 = vector.extract_strided_slice %39 {offsets = [0, 128], sizes = [8, 128], strides = [1, 1]} : vector<8x512xf32> to vector<8x128xf32>
    %47 = arith.negf %46 : vector<8x128xf32>
    %48 = math.exp %47 : vector<8x128xf32>
    %cst_15 = arith.constant 1.000000e+00 : f32
    %49 = vector.broadcast %cst_15 : f32 to vector<8x128xf32>
    %50 = arith.addf %49, %48 : vector<8x128xf32>
    %51 = arith.divf %49, %50 : vector<8x128xf32>
    %52 = vector.extract_strided_slice %39 {offsets = [0, 256], sizes = [8, 128], strides = [1, 1]} : vector<8x512xf32> to vector<8x128xf32>
    %53 = math.tanh %52 : vector<8x128xf32>
    %54 = vector.extract_strided_slice %39 {offsets = [0, 384], sizes = [8, 128], strides = [1, 1]} : vector<8x512xf32> to vector<8x128xf32>
    %55 = arith.negf %54 : vector<8x128xf32>
    %56 = math.exp %55 : vector<8x128xf32>
    %cst_16 = arith.constant 1.000000e+00 : f32
    %57 = vector.broadcast %cst_16 : f32 to vector<8x128xf32>
    %58 = arith.addf %57, %56 : vector<8x128xf32>
    %59 = arith.divf %57, %58 : vector<8x128xf32>
    %60 = arith.mulf %51, %34 : vector<8x128xf32>
    %61 = arith.mulf %45, %53 : vector<8x128xf32>
    %62 = arith.addf %60, %61 : vector<8x128xf32>
    %63 = math.tanh %62 : vector<8x128xf32>
    %64 = arith.mulf %59, %63 : vector<8x128xf32>
    %65 = vector.extract_strided_slice %5 {offsets = [16, 0], sizes = [8, 512], strides = [1, 1]} : vector<64x512xf32> to vector<8x512xf32>
    %cst_17 = arith.constant dense<0.000000e+00> : vector<8x512xf32>
    %66 = tpu.matmul %64, %6, %cst_17 {dimension_numbers = #tpu.dot_dimension_numbers<[1], [0], [0], [1], [0, 0, 1, 1], [], []>} : vector<8x128xf32>, vector<128x512xf32>, vector<8x512xf32> -> vector<8x512xf32>
    %67 = arith.addf %65, %66 : vector<8x512xf32>
    %68 = vector.extract_strided_slice %67 {offsets = [0, 0], sizes = [8, 128], strides = [1, 1]} : vector<8x512xf32> to vector<8x128xf32>
    %69 = arith.negf %68 : vector<8x128xf32>
    %70 = math.exp %69 : vector<8x128xf32>
    %cst_18 = arith.constant 1.000000e+00 : f32
    %71 = vector.broadcast %cst_18 : f32 to vector<8x128xf32>
    %72 = arith.addf %71, %70 : vector<8x128xf32>
    %73 = arith.divf %71, %72 : vector<8x128xf32>
    %74 = vector.extract_strided_slice %67 {offsets = [0, 128], sizes = [8, 128], strides = [1, 1]} : vector<8x512xf32> to vector<8x128xf32>
    %75 = arith.negf %74 : vector<8x128xf32>
    %76 = math.exp %75 : vector<8x128xf32>
    %cst_19 = arith.constant 1.000000e+00 : f32
    %77 = vector.broadcast %cst_19 : f32 to vector<8x128xf32>
    %78 = arith.addf %77, %76 : vector<8x128xf32>
    %79 = arith.divf %77, %78 : vector<8x128xf32>
    %80 = vector.extract_strided_slice %67 {offsets = [0, 256], sizes = [8, 128], strides = [1, 1]} : vector<8x512xf32> to vector<8x128xf32>
    %81 = math.tanh %80 : vector<8x128xf32>
    %82 = vector.extract_strided_slice %67 {offsets = [0, 384], sizes = [8, 128], strides = [1, 1]} : vector<8x512xf32> to vector<8x128xf32>
    %83 = arith.negf %82 : vector<8x128xf32>
    %84 = math.exp %83 : vector<8x128xf32>
    %cst_20 = arith.constant 1.000000e+00 : f32
    %85 = vector.broadcast %cst_20 : f32 to vector<8x128xf32>
    %86 = arith.addf %85, %84 : vector<8x128xf32>
    %87 = arith.divf %85, %86 : vector<8x128xf32>
    %88 = arith.mulf %79, %62 : vector<8x128xf32>
    %89 = arith.mulf %73, %81 : vector<8x128xf32>
    %90 = arith.addf %88, %89 : vector<8x128xf32>
    %91 = math.tanh %90 : vector<8x128xf32>
    %92 = arith.mulf %87, %91 : vector<8x128xf32>
    %93 = vector.extract_strided_slice %5 {offsets = [24, 0], sizes = [8, 512], strides = [1, 1]} : vector<64x512xf32> to vector<8x512xf32>
    %cst_21 = arith.constant dense<0.000000e+00> : vector<8x512xf32>
    %94 = tpu.matmul %92, %6, %cst_21 {dimension_numbers = #tpu.dot_dimension_numbers<[1], [0], [0], [1], [0, 0, 1, 1], [], []>} : vector<8x128xf32>, vector<128x512xf32>, vector<8x512xf32> -> vector<8x512xf32>
    %95 = arith.addf %93, %94 : vector<8x512xf32>
    %96 = vector.extract_strided_slice %95 {offsets = [0, 0], sizes = [8, 128], strides = [1, 1]} : vector<8x512xf32> to vector<8x128xf32>
    %97 = arith.negf %96 : vector<8x128xf32>
    %98 = math.exp %97 : vector<8x128xf32>
    %cst_22 = arith.constant 1.000000e+00 : f32
    %99 = vector.broadcast %cst_22 : f32 to vector<8x128xf32>
    %100 = arith.addf %99, %98 : vector<8x128xf32>
    %101 = arith.divf %99, %100 : vector<8x128xf32>
    %102 = vector.extract_strided_slice %95 {offsets = [0, 128], sizes = [8, 128], strides = [1, 1]} : vector<8x512xf32> to vector<8x128xf32>
    %103 = arith.negf %102 : vector<8x128xf32>
    %104 = math.exp %103 : vector<8x128xf32>
    %cst_23 = arith.constant 1.000000e+00 : f32
    %105 = vector.broadcast %cst_23 : f32 to vector<8x128xf32>
    %106 = arith.addf %105, %104 : vector<8x128xf32>
    %107 = arith.divf %105, %106 : vector<8x128xf32>
    %108 = vector.extract_strided_slice %95 {offsets = [0, 256], sizes = [8, 128], strides = [1, 1]} : vector<8x512xf32> to vector<8x128xf32>
    %109 = math.tanh %108 : vector<8x128xf32>
    %110 = vector.extract_strided_slice %95 {offsets = [0, 384], sizes = [8, 128], strides = [1, 1]} : vector<8x512xf32> to vector<8x128xf32>
    %111 = arith.negf %110 : vector<8x128xf32>
    %112 = math.exp %111 : vector<8x128xf32>
    %cst_24 = arith.constant 1.000000e+00 : f32
    %113 = vector.broadcast %cst_24 : f32 to vector<8x128xf32>
    %114 = arith.addf %113, %112 : vector<8x128xf32>
    %115 = arith.divf %113, %114 : vector<8x128xf32>
    %116 = arith.mulf %107, %90 : vector<8x128xf32>
    %117 = arith.mulf %101, %109 : vector<8x128xf32>
    %118 = arith.addf %116, %117 : vector<8x128xf32>
    %119 = math.tanh %118 : vector<8x128xf32>
    %120 = arith.mulf %115, %119 : vector<8x128xf32>
    %121 = vector.extract_strided_slice %5 {offsets = [32, 0], sizes = [8, 512], strides = [1, 1]} : vector<64x512xf32> to vector<8x512xf32>
    %cst_25 = arith.constant dense<0.000000e+00> : vector<8x512xf32>
    %122 = tpu.matmul %120, %6, %cst_25 {dimension_numbers = #tpu.dot_dimension_numbers<[1], [0], [0], [1], [0, 0, 1, 1], [], []>} : vector<8x128xf32>, vector<128x512xf32>, vector<8x512xf32> -> vector<8x512xf32>
    %123 = arith.addf %121, %122 : vector<8x512xf32>
    %124 = vector.extract_strided_slice %123 {offsets = [0, 0], sizes = [8, 128], strides = [1, 1]} : vector<8x512xf32> to vector<8x128xf32>
    %125 = arith.negf %124 : vector<8x128xf32>
    %126 = math.exp %125 : vector<8x128xf32>
    %cst_26 = arith.constant 1.000000e+00 : f32
    %127 = vector.broadcast %cst_26 : f32 to vector<8x128xf32>
    %128 = arith.addf %127, %126 : vector<8x128xf32>
    %129 = arith.divf %127, %128 : vector<8x128xf32>
    %130 = vector.extract_strided_slice %123 {offsets = [0, 128], sizes = [8, 128], strides = [1, 1]} : vector<8x512xf32> to vector<8x128xf32>
    %131 = arith.negf %130 : vector<8x128xf32>
    %132 = math.exp %131 : vector<8x128xf32>
    %cst_27 = arith.constant 1.000000e+00 : f32
    %133 = vector.broadcast %cst_27 : f32 to vector<8x128xf32>
    %134 = arith.addf %133, %132 : vector<8x128xf32>
    %135 = arith.divf %133, %134 : vector<8x128xf32>
    %136 = vector.extract_strided_slice %123 {offsets = [0, 256], sizes = [8, 128], strides = [1, 1]} : vector<8x512xf32> to vector<8x128xf32>
    %137 = math.tanh %136 : vector<8x128xf32>
    %138 = vector.extract_strided_slice %123 {offsets = [0, 384], sizes = [8, 128], strides = [1, 1]} : vector<8x512xf32> to vector<8x128xf32>
    %139 = arith.negf %138 : vector<8x128xf32>
    %140 = math.exp %139 : vector<8x128xf32>
    %cst_28 = arith.constant 1.000000e+00 : f32
    %141 = vector.broadcast %cst_28 : f32 to vector<8x128xf32>
    %142 = arith.addf %141, %140 : vector<8x128xf32>
    %143 = arith.divf %141, %142 : vector<8x128xf32>
    %144 = arith.mulf %135, %118 : vector<8x128xf32>
    %145 = arith.mulf %129, %137 : vector<8x128xf32>
    %146 = arith.addf %144, %145 : vector<8x128xf32>
    %147 = math.tanh %146 : vector<8x128xf32>
    %148 = arith.mulf %143, %147 : vector<8x128xf32>
    %149 = vector.extract_strided_slice %5 {offsets = [40, 0], sizes = [8, 512], strides = [1, 1]} : vector<64x512xf32> to vector<8x512xf32>
    %cst_29 = arith.constant dense<0.000000e+00> : vector<8x512xf32>
    %150 = tpu.matmul %148, %6, %cst_29 {dimension_numbers = #tpu.dot_dimension_numbers<[1], [0], [0], [1], [0, 0, 1, 1], [], []>} : vector<8x128xf32>, vector<128x512xf32>, vector<8x512xf32> -> vector<8x512xf32>
    %151 = arith.addf %149, %150 : vector<8x512xf32>
    %152 = vector.extract_strided_slice %151 {offsets = [0, 0], sizes = [8, 128], strides = [1, 1]} : vector<8x512xf32> to vector<8x128xf32>
    %153 = arith.negf %152 : vector<8x128xf32>
    %154 = math.exp %153 : vector<8x128xf32>
    %cst_30 = arith.constant 1.000000e+00 : f32
    %155 = vector.broadcast %cst_30 : f32 to vector<8x128xf32>
    %156 = arith.addf %155, %154 : vector<8x128xf32>
    %157 = arith.divf %155, %156 : vector<8x128xf32>
    %158 = vector.extract_strided_slice %151 {offsets = [0, 128], sizes = [8, 128], strides = [1, 1]} : vector<8x512xf32> to vector<8x128xf32>
    %159 = arith.negf %158 : vector<8x128xf32>
    %160 = math.exp %159 : vector<8x128xf32>
    %cst_31 = arith.constant 1.000000e+00 : f32
    %161 = vector.broadcast %cst_31 : f32 to vector<8x128xf32>
    %162 = arith.addf %161, %160 : vector<8x128xf32>
    %163 = arith.divf %161, %162 : vector<8x128xf32>
    %164 = vector.extract_strided_slice %151 {offsets = [0, 256], sizes = [8, 128], strides = [1, 1]} : vector<8x512xf32> to vector<8x128xf32>
    %165 = math.tanh %164 : vector<8x128xf32>
    %166 = vector.extract_strided_slice %151 {offsets = [0, 384], sizes = [8, 128], strides = [1, 1]} : vector<8x512xf32> to vector<8x128xf32>
    %167 = arith.negf %166 : vector<8x128xf32>
    %168 = math.exp %167 : vector<8x128xf32>
    %cst_32 = arith.constant 1.000000e+00 : f32
    %169 = vector.broadcast %cst_32 : f32 to vector<8x128xf32>
    %170 = arith.addf %169, %168 : vector<8x128xf32>
    %171 = arith.divf %169, %170 : vector<8x128xf32>
    %172 = arith.mulf %163, %146 : vector<8x128xf32>
    %173 = arith.mulf %157, %165 : vector<8x128xf32>
    %174 = arith.addf %172, %173 : vector<8x128xf32>
    %175 = math.tanh %174 : vector<8x128xf32>
    %176 = arith.mulf %171, %175 : vector<8x128xf32>
    %177 = vector.extract_strided_slice %5 {offsets = [48, 0], sizes = [8, 512], strides = [1, 1]} : vector<64x512xf32> to vector<8x512xf32>
    %cst_33 = arith.constant dense<0.000000e+00> : vector<8x512xf32>
    %178 = tpu.matmul %176, %6, %cst_33 {dimension_numbers = #tpu.dot_dimension_numbers<[1], [0], [0], [1], [0, 0, 1, 1], [], []>} : vector<8x128xf32>, vector<128x512xf32>, vector<8x512xf32> -> vector<8x512xf32>
    %179 = arith.addf %177, %178 : vector<8x512xf32>
    %180 = vector.extract_strided_slice %179 {offsets = [0, 0], sizes = [8, 128], strides = [1, 1]} : vector<8x512xf32> to vector<8x128xf32>
    %181 = arith.negf %180 : vector<8x128xf32>
    %182 = math.exp %181 : vector<8x128xf32>
    %cst_34 = arith.constant 1.000000e+00 : f32
    %183 = vector.broadcast %cst_34 : f32 to vector<8x128xf32>
    %184 = arith.addf %183, %182 : vector<8x128xf32>
    %185 = arith.divf %183, %184 : vector<8x128xf32>
    %186 = vector.extract_strided_slice %179 {offsets = [0, 128], sizes = [8, 128], strides = [1, 1]} : vector<8x512xf32> to vector<8x128xf32>
    %187 = arith.negf %186 : vector<8x128xf32>
    %188 = math.exp %187 : vector<8x128xf32>
    %cst_35 = arith.constant 1.000000e+00 : f32
    %189 = vector.broadcast %cst_35 : f32 to vector<8x128xf32>
    %190 = arith.addf %189, %188 : vector<8x128xf32>
    %191 = arith.divf %189, %190 : vector<8x128xf32>
    %192 = vector.extract_strided_slice %179 {offsets = [0, 256], sizes = [8, 128], strides = [1, 1]} : vector<8x512xf32> to vector<8x128xf32>
    %193 = math.tanh %192 : vector<8x128xf32>
    %194 = vector.extract_strided_slice %179 {offsets = [0, 384], sizes = [8, 128], strides = [1, 1]} : vector<8x512xf32> to vector<8x128xf32>
    %195 = arith.negf %194 : vector<8x128xf32>
    %196 = math.exp %195 : vector<8x128xf32>
    %cst_36 = arith.constant 1.000000e+00 : f32
    %197 = vector.broadcast %cst_36 : f32 to vector<8x128xf32>
    %198 = arith.addf %197, %196 : vector<8x128xf32>
    %199 = arith.divf %197, %198 : vector<8x128xf32>
    %200 = arith.mulf %191, %174 : vector<8x128xf32>
    %201 = arith.mulf %185, %193 : vector<8x128xf32>
    %202 = arith.addf %200, %201 : vector<8x128xf32>
    %203 = math.tanh %202 : vector<8x128xf32>
    %204 = arith.mulf %199, %203 : vector<8x128xf32>
    %205 = vector.extract_strided_slice %5 {offsets = [56, 0], sizes = [8, 512], strides = [1, 1]} : vector<64x512xf32> to vector<8x512xf32>
    %cst_37 = arith.constant dense<0.000000e+00> : vector<8x512xf32>
    %206 = tpu.matmul %204, %6, %cst_37 {dimension_numbers = #tpu.dot_dimension_numbers<[1], [0], [0], [1], [0, 0, 1, 1], [], []>} : vector<8x128xf32>, vector<128x512xf32>, vector<8x512xf32> -> vector<8x512xf32>
    %207 = arith.addf %205, %206 : vector<8x512xf32>
    %208 = vector.extract_strided_slice %207 {offsets = [0, 0], sizes = [8, 128], strides = [1, 1]} : vector<8x512xf32> to vector<8x128xf32>
    %209 = arith.negf %208 : vector<8x128xf32>
    %210 = math.exp %209 : vector<8x128xf32>
    %cst_38 = arith.constant 1.000000e+00 : f32
    %211 = vector.broadcast %cst_38 : f32 to vector<8x128xf32>
    %212 = arith.addf %211, %210 : vector<8x128xf32>
    %213 = arith.divf %211, %212 : vector<8x128xf32>
    %214 = vector.extract_strided_slice %207 {offsets = [0, 128], sizes = [8, 128], strides = [1, 1]} : vector<8x512xf32> to vector<8x128xf32>
    %215 = arith.negf %214 : vector<8x128xf32>
    %216 = math.exp %215 : vector<8x128xf32>
    %cst_39 = arith.constant 1.000000e+00 : f32
    %217 = vector.broadcast %cst_39 : f32 to vector<8x128xf32>
    %218 = arith.addf %217, %216 : vector<8x128xf32>
    %219 = arith.divf %217, %218 : vector<8x128xf32>
    %220 = vector.extract_strided_slice %207 {offsets = [0, 256], sizes = [8, 128], strides = [1, 1]} : vector<8x512xf32> to vector<8x128xf32>
    %221 = math.tanh %220 : vector<8x128xf32>
    %222 = vector.extract_strided_slice %207 {offsets = [0, 384], sizes = [8, 128], strides = [1, 1]} : vector<8x512xf32> to vector<8x128xf32>
    %223 = arith.negf %222 : vector<8x128xf32>
    %224 = math.exp %223 : vector<8x128xf32>
    %cst_40 = arith.constant 1.000000e+00 : f32
    %225 = vector.broadcast %cst_40 : f32 to vector<8x128xf32>
    %226 = arith.addf %225, %224 : vector<8x128xf32>
    %227 = arith.divf %225, %226 : vector<8x128xf32>
    %228 = arith.mulf %219, %202 : vector<8x128xf32>
    %229 = arith.mulf %213, %221 : vector<8x128xf32>
    %230 = arith.addf %228, %229 : vector<8x128xf32>
    %231 = math.tanh %230 : vector<8x128xf32>
    %232 = arith.mulf %227, %231 : vector<8x128xf32>
    %233 = tpu.concatenate %36, %64, %92, %120, %148, %176, %204, %232 in 0 : vector<8x128xf32>, vector<8x128xf32>, vector<8x128xf32>, vector<8x128xf32>, vector<8x128xf32>, vector<8x128xf32>, vector<8x128xf32>, vector<8x128xf32> -> vector<64x128xf32>
    %c0_41 = arith.constant 0 : index
    %c0_42 = arith.constant 0 : index
    %234 = vector.load %arg5[%c0_41, %c0_42] : memref<128x512xf32, #tpu.memory_space<vmem>>, vector<128x512xf32>
    %cst_43 = arith.constant dense<0.000000e+00> : vector<64x512xf32>
    %235 = tpu.matmul %233, %234, %cst_43 {dimension_numbers = #tpu.dot_dimension_numbers<[1], [0], [0], [1], [0, 0, 1, 1], [], []>} : vector<64x128xf32>, vector<128x512xf32>, vector<64x512xf32> -> vector<64x512xf32>
    %c0_44 = arith.constant 0 : index
    %c0_45 = arith.constant 0 : index
    %236 = vector.load %arg7[%c0_44, %c0_45] : memref<1x512xf32, #tpu.memory_space<vmem>>, vector<1x512xf32>
    %237 = vector.broadcast %236 : vector<1x512xf32> to vector<64x512xf32>
    %238 = arith.addf %235, %237 : vector<64x512xf32>
    %c0_46 = arith.constant 0 : index
    %c0_47 = arith.constant 0 : index
    %239 = vector.load %arg6[%c0_46, %c0_47] : memref<128x512xf32, #tpu.memory_space<vmem>>, vector<128x512xf32>
    %cst_48 = arith.constant 0.000000e+00 : f32
    %240 = vector.broadcast %cst_48 : f32 to vector<8x128xf32>
    %cst_49 = arith.constant 0.000000e+00 : f32
    %241 = vector.broadcast %cst_49 : f32 to vector<8x128xf32>
    %242 = vector.extract_strided_slice %238 {offsets = [0, 0], sizes = [8, 512], strides = [1, 1]} : vector<64x512xf32> to vector<8x512xf32>
    %cst_50 = arith.constant dense<0.000000e+00> : vector<8x512xf32>
    %243 = tpu.matmul %240, %239, %cst_50 {dimension_numbers = #tpu.dot_dimension_numbers<[1], [0], [0], [1], [0, 0, 1, 1], [], []>} : vector<8x128xf32>, vector<128x512xf32>, vector<8x512xf32> -> vector<8x512xf32>
    %244 = arith.addf %242, %243 : vector<8x512xf32>
    %245 = vector.extract_strided_slice %244 {offsets = [0, 0], sizes = [8, 128], strides = [1, 1]} : vector<8x512xf32> to vector<8x128xf32>
    %246 = arith.negf %245 : vector<8x128xf32>
    %247 = math.exp %246 : vector<8x128xf32>
    %cst_51 = arith.constant 1.000000e+00 : f32
    %248 = vector.broadcast %cst_51 : f32 to vector<8x128xf32>
    %249 = arith.addf %248, %247 : vector<8x128xf32>
    %250 = arith.divf %248, %249 : vector<8x128xf32>
    %251 = vector.extract_strided_slice %244 {offsets = [0, 128], sizes = [8, 128], strides = [1, 1]} : vector<8x512xf32> to vector<8x128xf32>
    %252 = arith.negf %251 : vector<8x128xf32>
    %253 = math.exp %252 : vector<8x128xf32>
    %cst_52 = arith.constant 1.000000e+00 : f32
    %254 = vector.broadcast %cst_52 : f32 to vector<8x128xf32>
    %255 = arith.addf %254, %253 : vector<8x128xf32>
    %256 = arith.divf %254, %255 : vector<8x128xf32>
    %257 = vector.extract_strided_slice %244 {offsets = [0, 256], sizes = [8, 128], strides = [1, 1]} : vector<8x512xf32> to vector<8x128xf32>
    %258 = math.tanh %257 : vector<8x128xf32>
    %259 = vector.extract_strided_slice %244 {offsets = [0, 384], sizes = [8, 128], strides = [1, 1]} : vector<8x512xf32> to vector<8x128xf32>
    %260 = arith.negf %259 : vector<8x128xf32>
    %261 = math.exp %260 : vector<8x128xf32>
    %cst_53 = arith.constant 1.000000e+00 : f32
    %262 = vector.broadcast %cst_53 : f32 to vector<8x128xf32>
    %263 = arith.addf %262, %261 : vector<8x128xf32>
    %264 = arith.divf %262, %263 : vector<8x128xf32>
    %265 = arith.mulf %256, %241 : vector<8x128xf32>
    %266 = arith.mulf %250, %258 : vector<8x128xf32>
    %267 = arith.addf %265, %266 : vector<8x128xf32>
    %268 = math.tanh %267 : vector<8x128xf32>
    %269 = arith.mulf %264, %268 : vector<8x128xf32>
    %270 = vector.extract_strided_slice %238 {offsets = [8, 0], sizes = [8, 512], strides = [1, 1]} : vector<64x512xf32> to vector<8x512xf32>
    %cst_54 = arith.constant dense<0.000000e+00> : vector<8x512xf32>
    %271 = tpu.matmul %269, %239, %cst_54 {dimension_numbers = #tpu.dot_dimension_numbers<[1], [0], [0], [1], [0, 0, 1, 1], [], []>} : vector<8x128xf32>, vector<128x512xf32>, vector<8x512xf32> -> vector<8x512xf32>
    %272 = arith.addf %270, %271 : vector<8x512xf32>
    %273 = vector.extract_strided_slice %272 {offsets = [0, 0], sizes = [8, 128], strides = [1, 1]} : vector<8x512xf32> to vector<8x128xf32>
    %274 = arith.negf %273 : vector<8x128xf32>
    %275 = math.exp %274 : vector<8x128xf32>
    %cst_55 = arith.constant 1.000000e+00 : f32
    %276 = vector.broadcast %cst_55 : f32 to vector<8x128xf32>
    %277 = arith.addf %276, %275 : vector<8x128xf32>
    %278 = arith.divf %276, %277 : vector<8x128xf32>
    %279 = vector.extract_strided_slice %272 {offsets = [0, 128], sizes = [8, 128], strides = [1, 1]} : vector<8x512xf32> to vector<8x128xf32>
    %280 = arith.negf %279 : vector<8x128xf32>
    %281 = math.exp %280 : vector<8x128xf32>
    %cst_56 = arith.constant 1.000000e+00 : f32
    %282 = vector.broadcast %cst_56 : f32 to vector<8x128xf32>
    %283 = arith.addf %282, %281 : vector<8x128xf32>
    %284 = arith.divf %282, %283 : vector<8x128xf32>
    %285 = vector.extract_strided_slice %272 {offsets = [0, 256], sizes = [8, 128], strides = [1, 1]} : vector<8x512xf32> to vector<8x128xf32>
    %286 = math.tanh %285 : vector<8x128xf32>
    %287 = vector.extract_strided_slice %272 {offsets = [0, 384], sizes = [8, 128], strides = [1, 1]} : vector<8x512xf32> to vector<8x128xf32>
    %288 = arith.negf %287 : vector<8x128xf32>
    %289 = math.exp %288 : vector<8x128xf32>
    %cst_57 = arith.constant 1.000000e+00 : f32
    %290 = vector.broadcast %cst_57 : f32 to vector<8x128xf32>
    %291 = arith.addf %290, %289 : vector<8x128xf32>
    %292 = arith.divf %290, %291 : vector<8x128xf32>
    %293 = arith.mulf %284, %267 : vector<8x128xf32>
    %294 = arith.mulf %278, %286 : vector<8x128xf32>
    %295 = arith.addf %293, %294 : vector<8x128xf32>
    %296 = math.tanh %295 : vector<8x128xf32>
    %297 = arith.mulf %292, %296 : vector<8x128xf32>
    %298 = vector.extract_strided_slice %238 {offsets = [16, 0], sizes = [8, 512], strides = [1, 1]} : vector<64x512xf32> to vector<8x512xf32>
    %cst_58 = arith.constant dense<0.000000e+00> : vector<8x512xf32>
    %299 = tpu.matmul %297, %239, %cst_58 {dimension_numbers = #tpu.dot_dimension_numbers<[1], [0], [0], [1], [0, 0, 1, 1], [], []>} : vector<8x128xf32>, vector<128x512xf32>, vector<8x512xf32> -> vector<8x512xf32>
    %300 = arith.addf %298, %299 : vector<8x512xf32>
    %301 = vector.extract_strided_slice %300 {offsets = [0, 0], sizes = [8, 128], strides = [1, 1]} : vector<8x512xf32> to vector<8x128xf32>
    %302 = arith.negf %301 : vector<8x128xf32>
    %303 = math.exp %302 : vector<8x128xf32>
    %cst_59 = arith.constant 1.000000e+00 : f32
    %304 = vector.broadcast %cst_59 : f32 to vector<8x128xf32>
    %305 = arith.addf %304, %303 : vector<8x128xf32>
    %306 = arith.divf %304, %305 : vector<8x128xf32>
    %307 = vector.extract_strided_slice %300 {offsets = [0, 128], sizes = [8, 128], strides = [1, 1]} : vector<8x512xf32> to vector<8x128xf32>
    %308 = arith.negf %307 : vector<8x128xf32>
    %309 = math.exp %308 : vector<8x128xf32>
    %cst_60 = arith.constant 1.000000e+00 : f32
    %310 = vector.broadcast %cst_60 : f32 to vector<8x128xf32>
    %311 = arith.addf %310, %309 : vector<8x128xf32>
    %312 = arith.divf %310, %311 : vector<8x128xf32>
    %313 = vector.extract_strided_slice %300 {offsets = [0, 256], sizes = [8, 128], strides = [1, 1]} : vector<8x512xf32> to vector<8x128xf32>
    %314 = math.tanh %313 : vector<8x128xf32>
    %315 = vector.extract_strided_slice %300 {offsets = [0, 384], sizes = [8, 128], strides = [1, 1]} : vector<8x512xf32> to vector<8x128xf32>
    %316 = arith.negf %315 : vector<8x128xf32>
    %317 = math.exp %316 : vector<8x128xf32>
    %cst_61 = arith.constant 1.000000e+00 : f32
    %318 = vector.broadcast %cst_61 : f32 to vector<8x128xf32>
    %319 = arith.addf %318, %317 : vector<8x128xf32>
    %320 = arith.divf %318, %319 : vector<8x128xf32>
    %321 = arith.mulf %312, %295 : vector<8x128xf32>
    %322 = arith.mulf %306, %314 : vector<8x128xf32>
    %323 = arith.addf %321, %322 : vector<8x128xf32>
    %324 = math.tanh %323 : vector<8x128xf32>
    %325 = arith.mulf %320, %324 : vector<8x128xf32>
    %326 = vector.extract_strided_slice %238 {offsets = [24, 0], sizes = [8, 512], strides = [1, 1]} : vector<64x512xf32> to vector<8x512xf32>
    %cst_62 = arith.constant dense<0.000000e+00> : vector<8x512xf32>
    %327 = tpu.matmul %325, %239, %cst_62 {dimension_numbers = #tpu.dot_dimension_numbers<[1], [0], [0], [1], [0, 0, 1, 1], [], []>} : vector<8x128xf32>, vector<128x512xf32>, vector<8x512xf32> -> vector<8x512xf32>
    %328 = arith.addf %326, %327 : vector<8x512xf32>
    %329 = vector.extract_strided_slice %328 {offsets = [0, 0], sizes = [8, 128], strides = [1, 1]} : vector<8x512xf32> to vector<8x128xf32>
    %330 = arith.negf %329 : vector<8x128xf32>
    %331 = math.exp %330 : vector<8x128xf32>
    %cst_63 = arith.constant 1.000000e+00 : f32
    %332 = vector.broadcast %cst_63 : f32 to vector<8x128xf32>
    %333 = arith.addf %332, %331 : vector<8x128xf32>
    %334 = arith.divf %332, %333 : vector<8x128xf32>
    %335 = vector.extract_strided_slice %328 {offsets = [0, 128], sizes = [8, 128], strides = [1, 1]} : vector<8x512xf32> to vector<8x128xf32>
    %336 = arith.negf %335 : vector<8x128xf32>
    %337 = math.exp %336 : vector<8x128xf32>
    %cst_64 = arith.constant 1.000000e+00 : f32
    %338 = vector.broadcast %cst_64 : f32 to vector<8x128xf32>
    %339 = arith.addf %338, %337 : vector<8x128xf32>
    %340 = arith.divf %338, %339 : vector<8x128xf32>
    %341 = vector.extract_strided_slice %328 {offsets = [0, 256], sizes = [8, 128], strides = [1, 1]} : vector<8x512xf32> to vector<8x128xf32>
    %342 = math.tanh %341 : vector<8x128xf32>
    %343 = vector.extract_strided_slice %328 {offsets = [0, 384], sizes = [8, 128], strides = [1, 1]} : vector<8x512xf32> to vector<8x128xf32>
    %344 = arith.negf %343 : vector<8x128xf32>
    %345 = math.exp %344 : vector<8x128xf32>
    %cst_65 = arith.constant 1.000000e+00 : f32
    %346 = vector.broadcast %cst_65 : f32 to vector<8x128xf32>
    %347 = arith.addf %346, %345 : vector<8x128xf32>
    %348 = arith.divf %346, %347 : vector<8x128xf32>
    %349 = arith.mulf %340, %323 : vector<8x128xf32>
    %350 = arith.mulf %334, %342 : vector<8x128xf32>
    %351 = arith.addf %349, %350 : vector<8x128xf32>
    %352 = math.tanh %351 : vector<8x128xf32>
    %353 = arith.mulf %348, %352 : vector<8x128xf32>
    %354 = vector.extract_strided_slice %238 {offsets = [32, 0], sizes = [8, 512], strides = [1, 1]} : vector<64x512xf32> to vector<8x512xf32>
    %cst_66 = arith.constant dense<0.000000e+00> : vector<8x512xf32>
    %355 = tpu.matmul %353, %239, %cst_66 {dimension_numbers = #tpu.dot_dimension_numbers<[1], [0], [0], [1], [0, 0, 1, 1], [], []>} : vector<8x128xf32>, vector<128x512xf32>, vector<8x512xf32> -> vector<8x512xf32>
    %356 = arith.addf %354, %355 : vector<8x512xf32>
    %357 = vector.extract_strided_slice %356 {offsets = [0, 0], sizes = [8, 128], strides = [1, 1]} : vector<8x512xf32> to vector<8x128xf32>
    %358 = arith.negf %357 : vector<8x128xf32>
    %359 = math.exp %358 : vector<8x128xf32>
    %cst_67 = arith.constant 1.000000e+00 : f32
    %360 = vector.broadcast %cst_67 : f32 to vector<8x128xf32>
    %361 = arith.addf %360, %359 : vector<8x128xf32>
    %362 = arith.divf %360, %361 : vector<8x128xf32>
    %363 = vector.extract_strided_slice %356 {offsets = [0, 128], sizes = [8, 128], strides = [1, 1]} : vector<8x512xf32> to vector<8x128xf32>
    %364 = arith.negf %363 : vector<8x128xf32>
    %365 = math.exp %364 : vector<8x128xf32>
    %cst_68 = arith.constant 1.000000e+00 : f32
    %366 = vector.broadcast %cst_68 : f32 to vector<8x128xf32>
    %367 = arith.addf %366, %365 : vector<8x128xf32>
    %368 = arith.divf %366, %367 : vector<8x128xf32>
    %369 = vector.extract_strided_slice %356 {offsets = [0, 256], sizes = [8, 128], strides = [1, 1]} : vector<8x512xf32> to vector<8x128xf32>
    %370 = math.tanh %369 : vector<8x128xf32>
    %371 = vector.extract_strided_slice %356 {offsets = [0, 384], sizes = [8, 128], strides = [1, 1]} : vector<8x512xf32> to vector<8x128xf32>
    %372 = arith.negf %371 : vector<8x128xf32>
    %373 = math.exp %372 : vector<8x128xf32>
    %cst_69 = arith.constant 1.000000e+00 : f32
    %374 = vector.broadcast %cst_69 : f32 to vector<8x128xf32>
    %375 = arith.addf %374, %373 : vector<8x128xf32>
    %376 = arith.divf %374, %375 : vector<8x128xf32>
    %377 = arith.mulf %368, %351 : vector<8x128xf32>
    %378 = arith.mulf %362, %370 : vector<8x128xf32>
    %379 = arith.addf %377, %378 : vector<8x128xf32>
    %380 = math.tanh %379 : vector<8x128xf32>
    %381 = arith.mulf %376, %380 : vector<8x128xf32>
    %382 = vector.extract_strided_slice %238 {offsets = [40, 0], sizes = [8, 512], strides = [1, 1]} : vector<64x512xf32> to vector<8x512xf32>
    %cst_70 = arith.constant dense<0.000000e+00> : vector<8x512xf32>
    %383 = tpu.matmul %381, %239, %cst_70 {dimension_numbers = #tpu.dot_dimension_numbers<[1], [0], [0], [1], [0, 0, 1, 1], [], []>} : vector<8x128xf32>, vector<128x512xf32>, vector<8x512xf32> -> vector<8x512xf32>
    %384 = arith.addf %382, %383 : vector<8x512xf32>
    %385 = vector.extract_strided_slice %384 {offsets = [0, 0], sizes = [8, 128], strides = [1, 1]} : vector<8x512xf32> to vector<8x128xf32>
    %386 = arith.negf %385 : vector<8x128xf32>
    %387 = math.exp %386 : vector<8x128xf32>
    %cst_71 = arith.constant 1.000000e+00 : f32
    %388 = vector.broadcast %cst_71 : f32 to vector<8x128xf32>
    %389 = arith.addf %388, %387 : vector<8x128xf32>
    %390 = arith.divf %388, %389 : vector<8x128xf32>
    %391 = vector.extract_strided_slice %384 {offsets = [0, 128], sizes = [8, 128], strides = [1, 1]} : vector<8x512xf32> to vector<8x128xf32>
    %392 = arith.negf %391 : vector<8x128xf32>
    %393 = math.exp %392 : vector<8x128xf32>
    %cst_72 = arith.constant 1.000000e+00 : f32
    %394 = vector.broadcast %cst_72 : f32 to vector<8x128xf32>
    %395 = arith.addf %394, %393 : vector<8x128xf32>
    %396 = arith.divf %394, %395 : vector<8x128xf32>
    %397 = vector.extract_strided_slice %384 {offsets = [0, 256], sizes = [8, 128], strides = [1, 1]} : vector<8x512xf32> to vector<8x128xf32>
    %398 = math.tanh %397 : vector<8x128xf32>
    %399 = vector.extract_strided_slice %384 {offsets = [0, 384], sizes = [8, 128], strides = [1, 1]} : vector<8x512xf32> to vector<8x128xf32>
    %400 = arith.negf %399 : vector<8x128xf32>
    %401 = math.exp %400 : vector<8x128xf32>
    %cst_73 = arith.constant 1.000000e+00 : f32
    %402 = vector.broadcast %cst_73 : f32 to vector<8x128xf32>
    %403 = arith.addf %402, %401 : vector<8x128xf32>
    %404 = arith.divf %402, %403 : vector<8x128xf32>
    %405 = arith.mulf %396, %379 : vector<8x128xf32>
    %406 = arith.mulf %390, %398 : vector<8x128xf32>
    %407 = arith.addf %405, %406 : vector<8x128xf32>
    %408 = math.tanh %407 : vector<8x128xf32>
    %409 = arith.mulf %404, %408 : vector<8x128xf32>
    %410 = vector.extract_strided_slice %238 {offsets = [48, 0], sizes = [8, 512], strides = [1, 1]} : vector<64x512xf32> to vector<8x512xf32>
    %cst_74 = arith.constant dense<0.000000e+00> : vector<8x512xf32>
    %411 = tpu.matmul %409, %239, %cst_74 {dimension_numbers = #tpu.dot_dimension_numbers<[1], [0], [0], [1], [0, 0, 1, 1], [], []>} : vector<8x128xf32>, vector<128x512xf32>, vector<8x512xf32> -> vector<8x512xf32>
    %412 = arith.addf %410, %411 : vector<8x512xf32>
    %413 = vector.extract_strided_slice %412 {offsets = [0, 0], sizes = [8, 128], strides = [1, 1]} : vector<8x512xf32> to vector<8x128xf32>
    %414 = arith.negf %413 : vector<8x128xf32>
    %415 = math.exp %414 : vector<8x128xf32>
    %cst_75 = arith.constant 1.000000e+00 : f32
    %416 = vector.broadcast %cst_75 : f32 to vector<8x128xf32>
    %417 = arith.addf %416, %415 : vector<8x128xf32>
    %418 = arith.divf %416, %417 : vector<8x128xf32>
    %419 = vector.extract_strided_slice %412 {offsets = [0, 128], sizes = [8, 128], strides = [1, 1]} : vector<8x512xf32> to vector<8x128xf32>
    %420 = arith.negf %419 : vector<8x128xf32>
    %421 = math.exp %420 : vector<8x128xf32>
    %cst_76 = arith.constant 1.000000e+00 : f32
    %422 = vector.broadcast %cst_76 : f32 to vector<8x128xf32>
    %423 = arith.addf %422, %421 : vector<8x128xf32>
    %424 = arith.divf %422, %423 : vector<8x128xf32>
    %425 = vector.extract_strided_slice %412 {offsets = [0, 256], sizes = [8, 128], strides = [1, 1]} : vector<8x512xf32> to vector<8x128xf32>
    %426 = math.tanh %425 : vector<8x128xf32>
    %427 = vector.extract_strided_slice %412 {offsets = [0, 384], sizes = [8, 128], strides = [1, 1]} : vector<8x512xf32> to vector<8x128xf32>
    %428 = arith.negf %427 : vector<8x128xf32>
    %429 = math.exp %428 : vector<8x128xf32>
    %cst_77 = arith.constant 1.000000e+00 : f32
    %430 = vector.broadcast %cst_77 : f32 to vector<8x128xf32>
    %431 = arith.addf %430, %429 : vector<8x128xf32>
    %432 = arith.divf %430, %431 : vector<8x128xf32>
    %433 = arith.mulf %424, %407 : vector<8x128xf32>
    %434 = arith.mulf %418, %426 : vector<8x128xf32>
    %435 = arith.addf %433, %434 : vector<8x128xf32>
    %436 = math.tanh %435 : vector<8x128xf32>
    %437 = arith.mulf %432, %436 : vector<8x128xf32>
    %438 = vector.extract_strided_slice %238 {offsets = [56, 0], sizes = [8, 512], strides = [1, 1]} : vector<64x512xf32> to vector<8x512xf32>
    %cst_78 = arith.constant dense<0.000000e+00> : vector<8x512xf32>
    %439 = tpu.matmul %437, %239, %cst_78 {dimension_numbers = #tpu.dot_dimension_numbers<[1], [0], [0], [1], [0, 0, 1, 1], [], []>} : vector<8x128xf32>, vector<128x512xf32>, vector<8x512xf32> -> vector<8x512xf32>
    %440 = arith.addf %438, %439 : vector<8x512xf32>
    %441 = vector.extract_strided_slice %440 {offsets = [0, 0], sizes = [8, 128], strides = [1, 1]} : vector<8x512xf32> to vector<8x128xf32>
    %442 = arith.negf %441 : vector<8x128xf32>
    %443 = math.exp %442 : vector<8x128xf32>
    %cst_79 = arith.constant 1.000000e+00 : f32
    %444 = vector.broadcast %cst_79 : f32 to vector<8x128xf32>
    %445 = arith.addf %444, %443 : vector<8x128xf32>
    %446 = arith.divf %444, %445 : vector<8x128xf32>
    %447 = vector.extract_strided_slice %440 {offsets = [0, 128], sizes = [8, 128], strides = [1, 1]} : vector<8x512xf32> to vector<8x128xf32>
    %448 = arith.negf %447 : vector<8x128xf32>
    %449 = math.exp %448 : vector<8x128xf32>
    %cst_80 = arith.constant 1.000000e+00 : f32
    %450 = vector.broadcast %cst_80 : f32 to vector<8x128xf32>
    %451 = arith.addf %450, %449 : vector<8x128xf32>
    %452 = arith.divf %450, %451 : vector<8x128xf32>
    %453 = vector.extract_strided_slice %440 {offsets = [0, 256], sizes = [8, 128], strides = [1, 1]} : vector<8x512xf32> to vector<8x128xf32>
    %454 = math.tanh %453 : vector<8x128xf32>
    %455 = vector.extract_strided_slice %440 {offsets = [0, 384], sizes = [8, 128], strides = [1, 1]} : vector<8x512xf32> to vector<8x128xf32>
    %456 = arith.negf %455 : vector<8x128xf32>
    %457 = math.exp %456 : vector<8x128xf32>
    %cst_81 = arith.constant 1.000000e+00 : f32
    %458 = vector.broadcast %cst_81 : f32 to vector<8x128xf32>
    %459 = arith.addf %458, %457 : vector<8x128xf32>
    %460 = arith.divf %458, %459 : vector<8x128xf32>
    %461 = arith.mulf %452, %435 : vector<8x128xf32>
    %462 = arith.mulf %446, %454 : vector<8x128xf32>
    %463 = arith.addf %461, %462 : vector<8x128xf32>
    %464 = math.tanh %463 : vector<8x128xf32>
    %465 = arith.mulf %460, %464 : vector<8x128xf32>
    %c0_82 = arith.constant 0 : index
    %c0_83 = arith.constant 0 : index
    %466 = vector.load %arg8[%c0_82, %c0_83] : memref<128x128xf32, #tpu.memory_space<vmem>>, vector<128x128xf32>
    %cst_84 = arith.constant dense<0.000000e+00> : vector<8x128xf32>
    %467 = tpu.matmul %465, %466, %cst_84 {dimension_numbers = #tpu.dot_dimension_numbers<[1], [0], [0], [1], [0, 0, 1, 1], [], []>} : vector<8x128xf32>, vector<128x128xf32>, vector<8x128xf32> -> vector<8x128xf32>
    %c0_85 = arith.constant 0 : index
    %c0_86 = arith.constant 0 : index
    %468 = vector.load %arg9[%c0_85, %c0_86] : memref<1x128xf32, #tpu.memory_space<vmem>>, vector<1x128xf32>
    %469 = vector.broadcast %468 : vector<1x128xf32> to vector<8x128xf32>
    %470 = arith.addf %467, %469 : vector<8x128xf32>
    %cst_87 = arith.constant 0.000000e+00 : f32
    %471 = vector.broadcast %cst_87 : f32 to vector<8x128xf32>
    %472 = arith.cmpf oge, %470, %471 : vector<8x128xf32>
    %cst_88 = arith.constant 0.00999999977 : f32
    %473 = vector.broadcast %cst_88 : f32 to vector<8x128xf32>
    %474 = arith.mulf %473, %470 : vector<8x128xf32>
    %475 = arith.select %472, %470, %474 : vector<8x128xi1>, vector<8x128xf32>
    %c0_89 = arith.constant 0 : index
    %c0_90 = arith.constant 0 : index
    %476 = vector.load %arg10[%c0_89, %c0_90] : memref<128x128xf32, #tpu.memory_space<vmem>>, vector<128x128xf32>
    %cst_91 = arith.constant dense<0.000000e+00> : vector<8x128xf32>
    %477 = tpu.matmul %475, %476, %cst_91 {dimension_numbers = #tpu.dot_dimension_numbers<[1], [0], [0], [1], [0, 0, 1, 1], [], []>} : vector<8x128xf32>, vector<128x128xf32>, vector<8x128xf32> -> vector<8x128xf32>
    %c0_92 = arith.constant 0 : index
    %c0_93 = arith.constant 0 : index
    %478 = vector.load %arg11[%c0_92, %c0_93] : memref<1x128xf32, #tpu.memory_space<vmem>>, vector<1x128xf32>
    %479 = vector.broadcast %478 : vector<1x128xf32> to vector<8x128xf32>
    %480 = arith.addf %477, %479 : vector<8x128xf32>
    %cst_94 = arith.constant 0.000000e+00 : f32
    %481 = vector.broadcast %cst_94 : f32 to vector<8x128xf32>
    %482 = arith.cmpf oge, %480, %481 : vector<8x128xf32>
    %cst_95 = arith.constant 0.00999999977 : f32
    %483 = vector.broadcast %cst_95 : f32 to vector<8x128xf32>
    %484 = arith.mulf %483, %480 : vector<8x128xf32>
    %485 = arith.select %482, %480, %484 : vector<8x128xi1>, vector<8x128xf32>
    %c0_96 = arith.constant 0 : index
    %c0_97 = arith.constant 0 : index
    %486 = vector.load %arg12[%c0_96, %c0_97] : memref<128x128xf32, #tpu.memory_space<vmem>>, vector<128x128xf32>
    %cst_98 = arith.constant dense<0.000000e+00> : vector<8x128xf32>
    %487 = tpu.matmul %485, %486, %cst_98 {dimension_numbers = #tpu.dot_dimension_numbers<[1], [0], [0], [1], [0, 0, 1, 1], [], []>} : vector<8x128xf32>, vector<128x128xf32>, vector<8x128xf32> -> vector<8x128xf32>
    %c0_99 = arith.constant 0 : index
    %c0_100 = arith.constant 0 : index
    %488 = vector.load %arg13[%c0_99, %c0_100] : memref<1x128xf32, #tpu.memory_space<vmem>>, vector<1x128xf32>
    %489 = vector.broadcast %488 : vector<1x128xf32> to vector<8x128xf32>
    %490 = arith.addf %487, %489 : vector<8x128xf32>
    %c0_101 = arith.constant 0 : index
    %c0_102 = arith.constant 0 : index
    %491 = vector.load %arg14[%c0_101, %c0_102] : memref<8x128xf32, #tpu.memory_space<vmem>>, vector<8x128xf32>
    tpu.vector_store %arg14[%c0_101, %c0_102], %490 {strides = array<i32>} : memref<8x128xf32, #tpu.memory_space<vmem>>, vector<8x128xf32>,
    return
  }
  func.func @transform_0(%arg0: i32) -> (i32, i32) {
    %c0_i32 = arith.constant 0 : i32
    %c0_i32_0 = arith.constant 0 : i32
    %c0_i32_1 = arith.constant 0 : i32
    return %c0_i32, %c0_i32_0 : i32, i32
  }
  func.func @transform_1(%arg0: i32) -> (i32, i32) {
    %c0_i32 = arith.constant 0 : i32
    %c0_i32_0 = arith.constant 0 : i32
    %c0_i32_1 = arith.constant 0 : i32
    return %c0_i32, %c0_i32_0 : i32, i32
  }
  func.func @transform_2(%arg0: i32) -> (i32, i32) {
    %c0_i32 = arith.constant 0 : i32
    %c0_i32_0 = arith.constant 0 : i32
    %c0_i32_1 = arith.constant 0 : i32
    return %c0_i32, %c0_i32_0 : i32, i32
  }
  func.func @transform_3(%arg0: i32) -> (i32, i32) {
    %c0_i32 = arith.constant 0 : i32
    %c0_i32_0 = arith.constant 0 : i32
    %c0_i32_1 = arith.constant 0 : i32
    return %c0_i32, %c0_i32_0 : i32, i32
  }
  func.func @transform_4(%arg0: i32) -> (i32, i32) {
    %c0_i32 = arith.constant 0 : i32
    %c0_i32_0 = arith.constant 0 : i32
    %c0_i32_1 = arith.constant 0 : i32
    return %c0_i32, %c0_i32_0 : i32, i32
  }
  func.func @transform_5(%arg0: i32) -> (i32, i32) {
    %c0_i32 = arith.constant 0 : i32
    %c0_i32_0 = arith.constant 0 : i32
    %c0_i32_1 = arith.constant 0 : i32
    return %c0_i32, %c0_i32_0 : i32, i32
  }
  func.func @transform_6(%arg0: i32) -> (i32, i32) {
    %c0_i32 = arith.constant 0 : i32
    %c0_i32_0 = arith.constant 0 : i32
    %c0_i32_1 = arith.constant 0 : i32
    return %c0_i32, %c0_i32_0 : i32, i32
  }
  func.func @transform_7(%arg0: i32) -> (i32, i32) {
    %c0_i32 = arith.constant 0 : i32
    %c0_i32_0 = arith.constant 0 : i32
    %c0_i32_1 = arith.constant 0 : i32
    return %c0_i32, %c0_i32_0 : i32, i32
  }
  func.func @transform_8(%arg0: i32) -> (i32, i32) {
    %c0_i32 = arith.constant 0 : i32
    %c0_i32_0 = arith.constant 0 : i32
    %c0_i32_1 = arith.constant 0 : i32
    return %c0_i32, %c0_i32_0 : i32, i32
  }
  func.func @transform_9(%arg0: i32) -> (i32, i32) {
    %c0_i32 = arith.constant 0 : i32
    %c0_i32_0 = arith.constant 0 : i32
    %c0_i32_1 = arith.constant 0 : i32
    return %c0_i32, %c0_i32_0 : i32, i32
  }
  func.func @transform_10(%arg0: i32) -> (i32, i32) {
    %c0_i32 = arith.constant 0 : i32
    %c0_i32_0 = arith.constant 0 : i32
    %c0_i32_1 = arith.constant 0 : i32
    return %c0_i32, %c0_i32_0 : i32, i32
  }
  func.func @transform_11(%arg0: i32) -> (i32, i32) {
    %c0_i32 = arith.constant 0 : i32
    %c0_i32_0 = arith.constant 0 : i32
    %c0_i32_1 = arith.constant 0 : i32
    return %c0_i32, %c0_i32_0 : i32, i32
  }
  func.func @transform_12(%arg0: i32) -> (i32, i32) {
    %c0_i32 = arith.constant 0 : i32
    %c0_i32_0 = arith.constant 0 : i32
    %c0_i32_1 = arith.constant 0 : i32
    return %c0_i32, %c0_i32_0 : i32, i32
  }
  func.func @transform_13(%arg0: i32) -> (i32, i32) {
    %c0_i32 = arith.constant 0 : i32
    %c0_i32_0 = arith.constant 0 : i32
    %c0_i32_1 = arith.constant 0 : i32
    return %c0_i32, %c0_i32_0 : i32, i32
  }
}

</mosaic_0001>

<bundles_post_ra>
// kernel: lstm_model_forward.1
= control target key start
LH: loop header
LB: loop body
LE: loop exit
PB: predicated region body
PF: predicated region fallthrough
CT: control target
= control target key end

     0   :  { %v7849_v3 = vmov 0.0   ;;  %vm4408_vm0 = vmmov 0   ;;  %s7835_s1 = inlined_call_operand.vmem [shape: f32[128,512], index: 1, kind: input, shape index: {}]   ;;  %s7836_s0 = inlined_call_operand.vmem [shape: f32[64,128], index: 0, kind: input, shape index: {}]   ;;  %s7837_s2 = inlined_call_operand.vmem [shape: f32[128,512], index: 2, kind: input, shape index: {}]   ;;  %s7838_s3 = inlined_call_operand.vmem [shape: f32[1,512], index: 3, kind: input, shape index: {}]   ;;  %s7839_s4 = inlined_call_operand.vmem [shape: f32[128,512], index: 4, kind: input, shape index: {}]   ;;  %s7840_s5 = inlined_call_operand.vmem [shape: f32[128,512], index: 5, kind: input, shape index: {}]   ;;  %s7841_s6 = inlined_call_operand.vmem [shape: f32[1,512], index: 6, kind: input, shape index: {}]   ;;  %s7842_s7 = inlined_call_operand.vmem [shape: f32[128,128], index: 7, kind: input, shape index: {}]   ;;  %s7843_s9 = inlined_call_operand.vmem [shape: f32[128,128], index: 9, kind: input, shape index: {}]   ;;  %s7844_s11 = inlined_call_operand.vmem [shape: f32[128,128], index: 11, kind: input, shape index: {}]   ;;  %s7845_s8 = inlined_call_operand.vmem [shape: f32[1,128], index: 8, kind: input, shape index: {}]   ;;  %s7846_s10 = inlined_call_operand.vmem [shape: f32[1,128], index: 10, kind: input, shape index: {}]   ;;  %s7847_s12 = inlined_call_operand.vmem [shape: f32[1,128], index: 12, kind: input, shape index: {}]   ;;  %s7848_s13 = inlined_call_operand.vmem [shape: f32[8,128], index: 13, kind: output, shape index: {}]  }
   0x1   :  { %v113_v0 = vld [vmem:[%s7835_s1 + $0x1e8] sm:$0xff]  ;;  %v115_v1 = vld [vmem:[%s7835_s1 + $0x1f8] sm:$0xff]  ;;  %v112_v2 = vld [vmem:[%s7835_s1 + $0x1e0] sm:$0xff]  ;;  %202 = vmatprep.mubr.f32.mxu0 %v7849_v3  ;;  %315 = vmatprep.mubr.f32.mxu1 %v7849_v3 }
   0x2   :  { %138 = vmatprep.subr.mxu0 %v113_v0  ;;  %251 = vmatprep.subr.mxu1 %v115_v1  ;;  %v114_v4 = vld [vmem:[%s7835_s1 + $0x1f0] sm:$0xff]  ;;  %v109_v5 = vld [vmem:[%s7835_s1 + $0x1c8] sm:$0xff]  ;;  %v111_v6 = vld [vmem:[%s7835_s1 + $0x1d8] sm:$0xff] }
   0x3   :  { %139 = vmatpush1.msra.mxu0 %v112_v2  ;;  %252 = vmatpush1.msra.mxu1 %v114_v4  ;;  %v108_v7 = vld [vmem:[%s7835_s1 + $0x1c0] sm:$0xff]  ;;  %v110_v8 = vld [vmem:[%s7835_s1 + $0x1d0] sm:$0xff]  ;;  %v105_v9 = vld [vmem:[%s7835_s1 + $0x1a8] sm:$0xff] }
   0x4   :  { %140 = vmatprep.subr.mxu0 %v109_v5  ;;  %253 = vmatprep.subr.mxu1 %v111_v6  ;;  %v107_v10 = vld [vmem:[%s7835_s1 + $0x1b8] sm:$0xff]  ;;  %v104_v11 = vld [vmem:[%s7835_s1 + $0x1a0] sm:$0xff]  ;;  %v106_v12 = vld [vmem:[%s7835_s1 + $0x1b0] sm:$0xff] }
   0x5   :  { %141 = vmatpush1.msra.mxu0 %v108_v7  ;;  %254 = vmatpush1.msra.mxu1 %v110_v8  ;;  %v101_v13 = vld [vmem:[%s7835_s1 + $0x188] sm:$0xff]  ;;  %v103_v14 = vld [vmem:[%s7835_s1 + $0x198] sm:$0xff]  ;;  %v100_v15 = vld [vmem:[%s7835_s1 + $0x180] sm:$0xff] }
   0x6   :  { %142 = vmatprep.subr.mxu0 %v105_v9  ;;  %255 = vmatprep.subr.mxu1 %v107_v10  ;;  %v102_v16 = vld [vmem:[%s7835_s1 + $0x190] sm:$0xff]  ;;  %v97_v17 = vld [vmem:[%s7835_s1 + $0x168] sm:$0xff]  ;;  %v99_v18 = vld [vmem:[%s7835_s1 + $0x178] sm:$0xff] }
   0x7   :  { %143 = vmatpush1.msra.mxu0 %v104_v11  ;;  %256 = vmatpush1.msra.mxu1 %v106_v12  ;;  %v96_v19 = vld [vmem:[%s7835_s1 + $0x160] sm:$0xff]  ;;  %v98_v20 = vld [vmem:[%s7835_s1 + $0x170] sm:$0xff]  ;;  %v93_v21 = vld [vmem:[%s7835_s1 + $0x148] sm:$0xff] }
   0x8   :  { %144 = vmatprep.subr.mxu0 %v101_v13  ;;  %257 = vmatprep.subr.mxu1 %v103_v14  ;;  %v95_v22 = vld [vmem:[%s7835_s1 + $0x158] sm:$0xff]  ;;  %v92_v23 = vld [vmem:[%s7835_s1 + $0x140] sm:$0xff]  ;;  %v94_v24 = vld [vmem:[%s7835_s1 + $0x150] sm:$0xff] }
   0x9   :  { %145 = vmatpush1.msra.mxu0 %v100_v15  ;;  %258 = vmatpush1.msra.mxu1 %v102_v16  ;;  %v89_v25 = vld [vmem:[%s7835_s1 + $0x128] sm:$0xff]  ;;  %v91_v26 = vld [vmem:[%s7835_s1 + $0x138] sm:$0xff]  ;;  %v88_v27 = vld [vmem:[%s7835_s1 + $0x120] sm:$0xff] }
   0xa   :  { %146 = vmatprep.subr.mxu0 %v97_v17  ;;  %259 = vmatprep.subr.mxu1 %v99_v18  ;;  %v90_v28 = vld [vmem:[%s7835_s1 + $0x130] sm:$0xff]  ;;  %v85_v29 = vld [vmem:[%s7835_s1 + $0x108] sm:$0xff]  ;;  %v87_v30 = vld [vmem:[%s7835_s1 + $0x118] sm:$0xff] }
   0xb   :  { %147 = vmatpush1.msra.mxu0 %v96_v19  ;;  %260 = vmatpush1.msra.mxu1 %v98_v20  ;;  %v84_v31 = vld [vmem:[%s7835_s1 + $0x100] sm:$0xff]  ;;  %v86_v32 = vld [vmem:[%s7835_s1 + $0x110] sm:$0xff]  ;;  %v81_v33 = vld [vmem:[%s7835_s1 + $0xe8] sm:$0xff] }
   0xc   :  { %148 = vmatprep.subr.mxu0 %v93_v21  ;;  %261 = vmatprep.subr.mxu1 %v95_v22  ;;  %v83_v34 = vld [vmem:[%s7835_s1 + $0xf8] sm:$0xff]  ;;  %v80_v35 = vld [vmem:[%s7835_s1 + $0xe0] sm:$0xff]  ;;  %v82_v36 = vld [vmem:[%s7835_s1 + $0xf0] sm:$0xff] }
   0xd   :  { %149 = vmatpush1.msra.mxu0 %v92_v23  ;;  %262 = vmatpush1.msra.mxu1 %v94_v24  ;;  %v77_v37 = vld [vmem:[%s7835_s1 + $0xc8] sm:$0xff]  ;;  %v79_v38 = vld [vmem:[%s7835_s1 + $0xd8] sm:$0xff]  ;;  %v76_v39 = vld [vmem:[%s7835_s1 + $0xc0] sm:$0xff] }
   0xe   :  { %150 = vmatprep.subr.mxu0 %v89_v25  ;;  %263 = vmatprep.subr.mxu1 %v91_v26  ;;  %v78_v40 = vld [vmem:[%s7835_s1 + $0xd0] sm:$0xff]  ;;  %v73_v41 = vld [vmem:[%s7835_s1 + $0xa8] sm:$0xff]  ;;  %v75_v42 = vld [vmem:[%s7835_s1 + $0xb8] sm:$0xff] }
   0xf   :  { %151 = vmatpush1.msra.mxu0 %v88_v27  ;;  %264 = vmatpush1.msra.mxu1 %v90_v28  ;;  %v72_v43 = vld [vmem:[%s7835_s1 + $0xa0] sm:$0xff]  ;;  %v74_v44 = vld [vmem:[%s7835_s1 + $0xb0] sm:$0xff]  ;;  %v69_v45 = vld [vmem:[%s7835_s1 + $0x88] sm:$0xff] }
  0x10   :  { %152 = vmatprep.subr.mxu0 %v85_v29  ;;  %265 = vmatprep.subr.mxu1 %v87_v30  ;;  %v71_v46 = vld [vmem:[%s7835_s1 + $0x98] sm:$0xff]  ;;  %v68_v47 = vld [vmem:[%s7835_s1 + $0x80] sm:$0xff]  ;;  %v70_v48 = vld [vmem:[%s7835_s1 + $0x90] sm:$0xff] }
  0x11   :  { %153 = vmatpush1.msra.mxu0 %v84_v31  ;;  %266 = vmatpush1.msra.mxu1 %v86_v32  ;;  %v65_v49 = vld [vmem:[%s7835_s1 + $0x68] sm:$0xff]  ;;  %v67_v50 = vld [vmem:[%s7835_s1 + $0x78] sm:$0xff]  ;;  %v64_v51 = vld [vmem:[%s7835_s1 + $0x60] sm:$0xff] }
  0x12   :  { %154 = vmatprep.subr.mxu0 %v81_v33  ;;  %267 = vmatprep.subr.mxu1 %v83_v34  ;;  %v66_v52 = vld [vmem:[%s7835_s1 + $0x70] sm:$0xff]  ;;  %v61_v53 = vld [vmem:[%s7835_s1 + $0x48] sm:$0xff]  ;;  %v63_v54 = vld [vmem:[%s7835_s1 + $0x58] sm:$0xff] }
  0x13   :  { %155 = vmatpush1.msra.mxu0 %v80_v35  ;;  %268 = vmatpush1.msra.mxu1 %v82_v36  ;;  %v60_v55 = vld [vmem:[%s7835_s1 + $0x40] sm:$0xff]  ;;  %v62_v56 = vld [vmem:[%s7835_s1 + $0x50] sm:$0xff]  ;;  %v57_v57 = vld [vmem:[%s7835_s1 + $0x28] sm:$0xff] }
  0x14   :  { %156 = vmatprep.subr.mxu0 %v77_v37  ;;  %269 = vmatprep.subr.mxu1 %v79_v38  ;;  %v59_v58 = vld [vmem:[%s7835_s1 + $0x38] sm:$0xff]  ;;  %v56_v59 = vld [vmem:[%s7835_s1 + $0x20] sm:$0xff]  ;;  %v58_v60 = vld [vmem:[%s7835_s1 + $0x30] sm:$0xff] }
  0x15   :  { %157 = vmatpush1.msra.mxu0 %v76_v39  ;;  %270 = vmatpush1.msra.mxu1 %v78_v40  ;;  %v53_v61 = vld [vmem:[%s7835_s1 + $0x8] sm:$0xff]  ;;  %v55_v62 = vld [vmem:[%s7835_s1 + $0x18] sm:$0xff]  ;;  %v52_v63 = vld [vmem:[%s7835_s1] sm:$0xff] }
  0x16   :  { %158 = vmatprep.subr.mxu0 %v73_v41  ;;  %271 = vmatprep.subr.mxu1 %v75_v42  ;;  %v54_v0 = vld [vmem:[%s7835_s1 + $0x10] sm:$0xff]  ;;  %v44_v1 = vld [vmem:[%s7836_s0] sm:$0xff]  ;;  %v4679_v2 = vld [vmem:[%s7837_s2 + $0x1e8] sm:$0xff] }
  0x17   :  { %159 = vmatpush1.msra.mxu0 %v72_v43  ;;  %272 = vmatpush1.msra.mxu1 %v74_v44  ;;  %8055 = vst [vmem:[#allocation2_spill] sm:$0xff] %v4679_v2  ;;  %v4684_v4 = vld [vmem:[%s7837_s2 + $0x1f8] sm:$0xff]  ;;  %v4689_v5 = vld [vmem:[%s7837_s2 + $0x1e0] sm:$0xff]  ;;  %v4694_v6 = vld [vmem:[%s7837_s2 + $0x1f0] sm:$0xff] }
  0x18   :  { %160 = vmatprep.subr.mxu0 %v69_v45  ;;  %273 = vmatprep.subr.mxu1 %v71_v46  ;;  %8056 = vst [vmem:[#allocation3_spill] sm:$0xff] %v4684_v4  ;;  %v4699_v7 = vld [vmem:[%s7837_s2 + $0x1c8] sm:$0xff]  ;;  %v4704_v8 = vld [vmem:[%s7837_s2 + $0x1d8] sm:$0xff]  ;;  %v4713_v9 = vld [vmem:[%s7837_s2 + $0x1c0] sm:$0xff] }
  0x19   :  { %161 = vmatpush1.msra.mxu0 %v68_v47  ;;  %274 = vmatpush1.msra.mxu1 %v70_v48  ;;  %v4718_v10 = vld [vmem:[%s7837_s2 + $0x1d0] sm:$0xff]  ;;  %v45_v11 = vld [vmem:[%s7836_s0 + $0x8] sm:$0xff]  ;;  %v4735_v13 = vld [vmem:[%s7837_s2 + $0x1b8] sm:$0xff] }
  0x1a   :  { %162 = vmatprep.subr.mxu0 %v65_v49  ;;  %275 = vmatprep.subr.mxu1 %v67_v50  ;;  %v4730_v12 = vld [vmem:[%s7837_s2 + $0x1a8] sm:$0xff]  ;;  %v4742_v14 = vld [vmem:[%s7837_s2 + $0x1a0] sm:$0xff]  ;;  %v4747_v15 = vld [vmem:[%s7837_s2 + $0x1b0] sm:$0xff] }
  0x1b   :  { %163 = vmatpush1.msra.mxu0 %v64_v51  ;;  %276 = vmatpush1.msra.mxu1 %v66_v52  ;;  %v4752_v16 = vld [vmem:[%s7837_s2 + $0x188] sm:$0xff]  ;;  %v4757_v17 = vld [vmem:[%s7837_s2 + $0x198] sm:$0xff]  ;;  %v4766_v18 = vld [vmem:[%s7837_s2 + $0x180] sm:$0xff] }
  0x1c   :  { %164 = vmatprep.subr.mxu0 %v61_v53  ;;  %277 = vmatprep.subr.mxu1 %v63_v54  ;;  %v4771_v19 = vld [vmem:[%s7837_s2 + $0x190] sm:$0xff]  ;;  %v4783_v21 = vld [vmem:[%s7837_s2 + $0x168] sm:$0xff]  ;;  %v4788_v22 = vld [vmem:[%s7837_s2 + $0x178] sm:$0xff] }
  0x1d   :  { %165 = vmatpush1.msra.mxu0 %v60_v55  ;;  %278 = vmatpush1.msra.mxu1 %v62_v56  ;;  %v46_v20 = vld [vmem:[%s7836_s0 + $0x10] sm:$0xff]  ;;  %v4795_v23 = vld [vmem:[%s7837_s2 + $0x160] sm:$0xff]  ;;  %v4805_v25 = vld [vmem:[%s7837_s2 + $0x148] sm:$0xff] }
  0x1e   :  { %166 = vmatprep.subr.mxu0 %v57_v57  ;;  %279 = vmatprep.subr.mxu1 %v59_v58  ;;  %v4800_v24 = vld [vmem:[%s7837_s2 + $0x170] sm:$0xff]  ;;  %v4810_v26 = vld [vmem:[%s7837_s2 + $0x158] sm:$0xff]  ;;  %v4819_v27 = vld [vmem:[%s7837_s2 + $0x140] sm:$0xff] }
  0x1f   :  { %167 = vmatpush1.msra.mxu0 %v56_v59  ;;  %280 = vmatpush1.msra.mxu1 %v58_v60  ;;  %v4824_v28 = vld [vmem:[%s7837_s2 + $0x150] sm:$0xff]  ;;  %v47_v29 = vld [vmem:[%s7836_s0 + $0x18] sm:$0xff]  ;;  %v4836_v30 = vld [vmem:[%s7837_s2 + $0x128] sm:$0xff] }
  0x20   :  { %168 = vmatprep.subr.mxu0 %v53_v61  ;;  %281 = vmatprep.subr.mxu1 %v55_v62  ;;  %v4841_v31 = vld [vmem:[%s7837_s2 + $0x138] sm:$0xff]  ;;  %v4848_v32 = vld [vmem:[%s7837_s2 + $0x120] sm:$0xff]  ;;  %v4853_v33 = vld [vmem:[%s7837_s2 + $0x130] sm:$0xff] }
  0x21   :  { %169 = vmatpush1.msra.mxu0 %v52_v63  ;;  %282 = vmatpush1.msra.mxu1 %v54_v0  ;;  %v4858_v34 = vld [vmem:[%s7837_s2 + $0x108] sm:$0xff]  ;;  %v4863_v35 = vld [vmem:[%s7837_s2 + $0x118] sm:$0xff]  ;;  %v4872_v36 = vld [vmem:[%s7837_s2 + $0x100] sm:$0xff] }
  0x22   :  { %203 = vmatmul.mubr.f32.vlgmr.msra.gmra.mxu0 %v44_v1  ;;  %316 = vmatmul.mubr.f32.vlgmr.msra.gmra.mxu1 %v44_v1  ;;  %v4877_v37 = vld [vmem:[%s7837_s2 + $0x110] sm:$0xff]  ;;  %v48_v38 = vld [vmem:[%s7836_s0 + $0x20] sm:$0xff]  ;;  %v4889_v39 = vld [vmem:[%s7837_s2 + $0xe8] sm:$0xff] }
  0x23   :  { %428 = vmatprep.subr.mxu0 %v4679_v2  ;;  %499 = vmatprep.subr.mxu1 %v4684_v4  ;;  %v4894_v40 = vld [vmem:[%s7837_s2 + $0xf8] sm:$0xff]  ;;  %v4901_v41 = vld [vmem:[%s7837_s2 + $0xe0] sm:$0xff]  ;;  %v4906_v42 = vld [vmem:[%s7837_s2 + $0xf0] sm:$0xff] }
  0x24   :  { %429 = vmatpush1.msra.mxu0 %v4689_v5  ;;  %500 = vmatpush1.msra.mxu1 %v4694_v6  ;;  %v4911_v43 = vld [vmem:[%s7837_s2 + $0xc8] sm:$0xff]  ;;  %v4916_v44 = vld [vmem:[%s7837_s2 + $0xd8] sm:$0xff]  ;;  %v4925_v45 = vld [vmem:[%s7837_s2 + $0xc0] sm:$0xff] }
  0x25   :  { %430 = vmatprep.subr.mxu0 %v4699_v7  ;;  %501 = vmatprep.subr.mxu1 %v4704_v8  ;;  %v4930_v46 = vld [vmem:[%s7837_s2 + $0xd0] sm:$0xff]  ;;  %v49_v47 = vld [vmem:[%s7836_s0 + $0x28] sm:$0xff]  ;;  %v4947_v49 = vld [vmem:[%s7837_s2 + $0xb8] sm:$0xff] }
  0x26   :  { %208 = vmatprep.mubr.f32.mxu0 %v7849_v3  ;;  %321 = vmatprep.mubr.f32.mxu1 %v7849_v3  ;;  %v4942_v48 = vld [vmem:[%s7837_s2 + $0xa8] sm:$0xff]  ;;  %v4954_v50 = vld [vmem:[%s7837_s2 + $0xa0] sm:$0xff]  ;;  %v4959_v51 = vld [vmem:[%s7837_s2 + $0xb0] sm:$0xff] }
  0x27   :  { %431 = vmatpush1.msra.mxu0 %v4713_v9  ;;  %502 = vmatpush1.msra.mxu1 %v4718_v10  ;;  %8057 = vst [vmem:[#allocation4_spill] sm:$0xff] %v4959_v51  ;;  %v4964_v52 = vld [vmem:[%s7837_s2 + $0x88] sm:$0xff]  ;;  %v4969_v53 = vld [vmem:[%s7837_s2 + $0x98] sm:$0xff]  ;;  %v4978_v54 = vld [vmem:[%s7837_s2 + $0x80] sm:$0xff] }
  0x28   :  { %209 = vmatmul.mubr.f32.gmra.mxu0 %v45_v11  ;;  %322 = vmatmul.mubr.f32.gmra.mxu1 %v45_v11  ;;  %8058 = vst [vmem:[#allocation5_spill] sm:$0xff] %v4964_v52  ;;  %8059 = vst [vmem:[#allocation6_spill] sm:$0xff] %v4969_v53  ;;  %v4983_v55 = vld [vmem:[%s7837_s2 + $0x90] sm:$0xff]  ;;  %v4995_v57 = vld [vmem:[%s7837_s2 + $0x68] sm:$0xff] }
  0x29   :  { %432 = vmatprep.subr.mxu0 %v4730_v12  ;;  %503 = vmatprep.subr.mxu1 %v4735_v13  ;;  %8060 = vst [vmem:[#allocation7_spill] sm:$0xff] %v4978_v54  ;;  %8061 = vst [vmem:[#allocation8_spill] sm:$0xff] %v4983_v55  ;;  %v50_v56 = vld [vmem:[%s7836_s0 + $0x30] sm:$0xff]  ;;  %v5000_v58 = vld [vmem:[%s7837_s2 + $0x78] sm:$0xff] }
  0x2a   :  { %433 = vmatpush1.msra.mxu0 %v4742_v14  ;;  %504 = vmatpush1.msra.mxu1 %v4747_v15  ;;  %8062 = vst [vmem:[#allocation9_spill] sm:$0xff] %v4995_v57  ;;  %8063 = vst [vmem:[#allocation10_spill] sm:$0xff] %v5000_v58  ;;  %v5007_v59 = vld [vmem:[%s7837_s2 + $0x60] sm:$0xff]  ;;  %v5012_v60 = vld [vmem:[%s7837_s2 + $0x70] sm:$0xff] }
  0x2b   :  { %434 = vmatprep.subr.mxu0 %v4752_v16  ;;  %505 = vmatprep.subr.mxu1 %v4757_v17  ;;  %8064 = vst [vmem:[#allocation11_spill] sm:$0xff] %v5007_v59  ;;  %8065 = vst [vmem:[#allocation12_spill] sm:$0xff] %v5012_v60  ;;  %v5017_v61 = vld [vmem:[%s7837_s2 + $0x48] sm:$0xff]  ;;  %v5022_v62 = vld [vmem:[%s7837_s2 + $0x58] sm:$0xff] }
  0x2c   :  { %214 = vmatprep.mubr.f32.mxu0 %v7849_v3  ;;  %327 = vmatprep.mubr.f32.mxu1 %v7849_v3  ;;  %8066 = vst [vmem:[#allocation13_spill] sm:$0xff] %v5017_v61  ;;  %8067 = vst [vmem:[#allocation14_spill] sm:$0xff] %v5022_v62  ;;  %v5031_v63 = vld [vmem:[%s7837_s2 + $0x40] sm:$0xff]  ;;  %v5036_v0 = vld [vmem:[%s7837_s2 + $0x50] sm:$0xff] }
  0x2d   :  { %435 = vmatpush1.msra.mxu0 %v4766_v18  ;;  %506 = vmatpush1.msra.mxu1 %v4771_v19  ;;  %8068 = vst [vmem:[#allocation15_spill] sm:$0xff] %v5031_v63  ;;  %8069 = vst [vmem:[#allocation16_spill] sm:$0xff] %v5036_v0  ;;  %v51_v1 = vld [vmem:[%s7836_s0 + $0x38] sm:$0xff]  ;;  %v5048_v11 = vld [vmem:[%s7837_s2 + $0x28] sm:$0xff] }
  0x2e   :  { %215 = vmatmul.mubr.f32.gmra.mxu0 %v46_v20  ;;  %328 = vmatmul.mubr.f32.gmra.mxu1 %v46_v20  ;;  %8070 = vst [vmem:[#allocation17_spill] sm:$0xff] %v5048_v11  ;;  %v5053_v20 = vld [vmem:[%s7837_s2 + $0x38] sm:$0xff] }
  0x2f   :  { %436 = vmatprep.subr.mxu0 %v4783_v21  ;;  %507 = vmatprep.subr.mxu1 %v4788_v22  ;;  %8071 = vst [vmem:[#allocation18_spill] sm:$0xff] %v5053_v20 }
  0x30   :  { %437 = vmatpush1.msra.mxu0 %v4795_v23  ;;  %508 = vmatpush1.msra.mxu1 %v4800_v24 }
  0x31   :  { %438 = vmatprep.subr.mxu0 %v4805_v25  ;;  %509 = vmatprep.subr.mxu1 %v4810_v26 }
  0x32   :  { %220 = vmatprep.mubr.f32.mxu0 %v7849_v3  ;;  %333 = vmatprep.mubr.f32.mxu1 %v7849_v3 }
  0x33   :  { %439 = vmatpush1.msra.mxu0 %v4819_v27  ;;  %510 = vmatpush1.msra.mxu1 %v4824_v28 }
  0x34   :  { %221 = vmatmul.mubr.f32.gmra.mxu0 %v47_v29  ;;  %334 = vmatmul.mubr.f32.gmra.mxu1 %v47_v29  ;;  %v5060_v29 = vld [vmem:[%s7837_s2 + $0x20] sm:$0xff] }
  0x35   :  { %440 = vmatprep.subr.mxu0 %v4836_v30  ;;  %511 = vmatprep.subr.mxu1 %v4841_v31  ;;  %8072 = vst [vmem:[#allocation19_spill] sm:$0xff] %v5060_v29 }
  0x36   :  { %441 = vmatpush1.msra.mxu0 %v4848_v32  ;;  %512 = vmatpush1.msra.mxu1 %v4853_v33 }
  0x37   :  { %442 = vmatprep.subr.mxu0 %v4858_v34  ;;  %513 = vmatprep.subr.mxu1 %v4863_v35 }
  0x38   :  { %226 = vmatprep.mubr.f32.mxu0 %v7849_v3  ;;  %339 = vmatprep.mubr.f32.mxu1 %v7849_v3 }
  0x39   :  { %443 = vmatpush1.msra.mxu0 %v4872_v36  ;;  %514 = vmatpush1.msra.mxu1 %v4877_v37 }
  0x3a   :  { %227 = vmatmul.mubr.f32.gmra.mxu0 %v48_v38  ;;  %340 = vmatmul.mubr.f32.gmra.mxu1 %v48_v38  ;;  %v5065_v38 = vld [vmem:[%s7837_s2 + $0x30] sm:$0xff] }
  0x3b   :  { %444 = vmatprep.subr.mxu0 %v4889_v39  ;;  %515 = vmatprep.subr.mxu1 %v4894_v40  ;;  %8073 = vst [vmem:[#allocation20_spill] sm:$0xff] %v5065_v38 }
  0x3c   :  { %445 = vmatpush1.msra.mxu0 %v4901_v41  ;;  %516 = vmatpush1.msra.mxu1 %v4906_v42 }
  0x3d   :  { %446 = vmatprep.subr.mxu0 %v4911_v43  ;;  %517 = vmatprep.subr.mxu1 %v4916_v44 }
  0x3e   :  { %232 = vmatprep.mubr.f32.mxu0 %v7849_v3  ;;  %345 = vmatprep.mubr.f32.mxu1 %v7849_v3 }
  0x3f   :  { %447 = vmatpush1.msra.mxu0 %v4925_v45  ;;  %518 = vmatpush1.msra.mxu1 %v4930_v46 }
  0x40   :  { %233 = vmatmul.mubr.f32.gmra.mxu0 %v49_v47  ;;  %346 = vmatmul.mubr.f32.gmra.mxu1 %v49_v47  ;;  %v5070_v47 = vld [vmem:[%s7837_s2 + $0x8] sm:$0xff] }
  0x41   :  { %448 = vmatprep.subr.mxu0 %v4942_v48  ;;  %519 = vmatprep.subr.mxu1 %v4947_v49  ;;  %8074 = vst [vmem:[#allocation21_spill] sm:$0xff] %v5070_v47 }
  0x42   :  { %449 = vmatpush1.msra.mxu0 %v4954_v50  ;;  %520 = vmatpush1.msra.mxu1 %v4959_v51 }
  0x43   :  { %450 = vmatprep.subr.mxu0 %v4964_v52  ;;  %521 = vmatprep.subr.mxu1 %v4969_v53 }
  0x44   :  { %238 = vmatprep.mubr.f32.mxu0 %v7849_v3  ;;  %351 = vmatprep.mubr.f32.mxu1 %v7849_v3 }
  0x45   :  { %451 = vmatpush1.msra.mxu0 %v4978_v54  ;;  %522 = vmatpush1.msra.mxu1 %v4983_v55 }
  0x46   :  { %239 = vmatmul.mubr.f32.gmra.mxu0 %v50_v56  ;;  %352 = vmatmul.mubr.f32.gmra.mxu1 %v50_v56  ;;  %v5075_v56 = vld [vmem:[%s7837_s2 + $0x18] sm:$0xff] }
  0x47   :  { %452 = vmatprep.subr.mxu0 %v4995_v57  ;;  %523 = vmatprep.subr.mxu1 %v5000_v58  ;;  %8075 = vst [vmem:[#allocation22_spill] sm:$0xff] %v5075_v56 }
  0x48   :  { %453 = vmatpush1.msra.mxu0 %v5007_v59  ;;  %524 = vmatpush1.msra.mxu1 %v5012_v60 }
  0x49   :  { %454 = vmatprep.subr.mxu0 %v5017_v61  ;;  %525 = vmatprep.subr.mxu1 %v5022_v62 }
  0x4a   :  { %244 = vmatprep.mubr.f32.mxu0 %v7849_v3  ;;  %357 = vmatprep.mubr.f32.mxu1 %v7849_v3  ;;  %v5082_v3 = vld [vmem:[%s7837_s2] sm:$0xff] }
  0x4b   :  { %455 = vmatpush1.msra.mxu0 %v5031_v63  ;;  %526 = vmatpush1.msra.mxu1 %v5036_v0  ;;  %8076 = vst [vmem:[#allocation23_spill] sm:$0xff] %v5082_v3 }
  0x4c   :  { %245 = vmatmul.mubr.f32.gmra.mxu0 %v51_v1  ;;  %358 = vmatmul.mubr.f32.gmra.mxu1 %v51_v1  ;;  %v5089_v1 = vld [vmem:[%s7837_s2 + $0x10] sm:$0xff] }
  0x4d   :  { %456 = vmatprep.subr.mxu0 %v5048_v11  ;;  %527 = vmatprep.subr.mxu1 %v5053_v20  ;;  %8077 = vst [vmem:[#allocation24_spill] sm:$0xff] %v5089_v1  ;;  %v8078_v20 = vmov 0.0  }
  0x4e   :  { %457 = vmatpush1.msra.mxu0 %v5060_v29  ;;  %528 = vmatpush1.msra.mxu1 %v5065_v38 }
  0x4f   :  { %458 = vmatprep.subr.mxu0 %v5070_v47  ;;  %529 = vmatprep.subr.mxu1 %v5075_v56 }
  0x50   :  { %459 = vmatpush1.msra.mxu0 %v5082_v3  ;;  %492 = vmatprep.mubr.f32.mxu0 %v8078_v20 }
  0x51   :  { %530 = vmatpush1.msra.mxu1 %v5089_v1  ;;  %563 = vmatprep.mubr.f32.mxu1 %v8078_v20 }
  0x52   :  { %493 = vmatmul.mubr.f32.vlgmr.msra.gmra.mxu0 %v8078_v20  ;;  %564 = vmatmul.mubr.f32.vlgmr.msra.gmra.mxu1 %v8078_v20 }
  0x53   :  { %598 = vmatprep.subr.mxu0 %v4679_v2  ;;  %669 = vmatprep.subr.mxu1 %v4684_v4 }
  0x54   :  { %599 = vmatpush1.msra.mxu0 %v4689_v5  ;;  %670 = vmatpush1.msra.mxu1 %v4694_v6 }
  0x55   :  { %600 = vmatprep.subr.mxu0 %v4699_v7  ;;  %671 = vmatprep.subr.mxu1 %v4704_v8 }
  0x56   :  { %601 = vmatpush1.msra.mxu0 %v4713_v9  ;;  %672 = vmatpush1.msra.mxu1 %v4718_v10 }
  0x57   :  { %602 = vmatprep.subr.mxu0 %v4730_v12  ;;  %673 = vmatprep.subr.mxu1 %v4735_v13 }
  0x58   :  { %603 = vmatpush1.msra.mxu0 %v4742_v14  ;;  %674 = vmatpush1.msra.mxu1 %v4747_v15 }
  0x59   :  { %604 = vmatprep.subr.mxu0 %v4752_v16  ;;  %675 = vmatprep.subr.mxu1 %v4757_v17 }
  0x5a   :  { %605 = vmatpush1.msra.mxu0 %v4766_v18  ;;  %676 = vmatpush1.msra.mxu1 %v4771_v19 }
  0x5b   :  { %606 = vmatprep.subr.mxu0 %v4783_v21  ;;  %677 = vmatprep.subr.mxu1 %v4788_v22 }
  0x5c   :  { %607 = vmatpush1.msra.mxu0 %v4795_v23  ;;  %678 = vmatpush1.msra.mxu1 %v4800_v24 }
  0x5d   :  { %608 = vmatprep.subr.mxu0 %v4805_v25  ;;  %679 = vmatprep.subr.mxu1 %v4810_v26 }
  0x5e   :  { %609 = vmatpush1.msra.mxu0 %v4819_v27  ;;  %680 = vmatpush1.msra.mxu1 %v4824_v28 }
  0x5f   :  { %610 = vmatprep.subr.mxu0 %v4836_v30  ;;  %681 = vmatprep.subr.mxu1 %v4841_v31 }
  0x60   :  { %611 = vmatpush1.msra.mxu0 %v4848_v32  ;;  %682 = vmatpush1.msra.mxu1 %v4853_v33 }
  0x61   :  { %612 = vmatprep.subr.mxu0 %v4858_v34  ;;  %683 = vmatprep.subr.mxu1 %v4863_v35 }
  0x62   :  { %613 = vmatpush1.msra.mxu0 %v4872_v36  ;;  %684 = vmatpush1.msra.mxu1 %v4877_v37 }
  0x63   :  { %614 = vmatprep.subr.mxu0 %v4889_v39  ;;  %685 = vmatprep.subr.mxu1 %v4894_v40 }
  0x64   :  { %615 = vmatpush1.msra.mxu0 %v4901_v41  ;;  %686 = vmatpush1.msra.mxu1 %v4906_v42 }
  0x65   :  { %616 = vmatprep.subr.mxu0 %v4911_v43  ;;  %687 = vmatprep.subr.mxu1 %v4916_v44 }
  0x66   :  { %617 = vmatpush1.msra.mxu0 %v4925_v45  ;;  %688 = vmatpush1.msra.mxu1 %v4930_v46 }
  0x67   :  { %618 = vmatprep.subr.mxu0 %v4942_v48  ;;  %689 = vmatprep.subr.mxu1 %v4947_v49 }
  0x68   :  { %619 = vmatpush1.msra.mxu0 %v4954_v50  ;;  %690 = vmatpush1.msra.mxu1 %v4959_v51 }
  0x69   :  { %620 = vmatprep.subr.mxu0 %v4964_v52  ;;  %691 = vmatprep.subr.mxu1 %v4969_v53 }
  0x6a   :  { %621 = vmatpush1.msra.mxu0 %v4978_v54  ;;  %692 = vmatpush1.msra.mxu1 %v4983_v55  ;;  %v8079_v54 = vld [vmem:[#allocation18_spill] sm:$0xff] }
  0x6b   :  { %622 = vmatprep.subr.mxu0 %v4995_v57  ;;  %693 = vmatprep.subr.mxu1 %v5000_v58 }
  0x6c   :  { %623 = vmatpush1.msra.mxu0 %v5007_v59  ;;  %694 = vmatpush1.msra.mxu1 %v5012_v60 }
  0x6d   :  { %624 = vmatprep.subr.mxu0 %v5017_v61  ;;  %695 = vmatprep.subr.mxu1 %v5022_v62 }
  0x6e   :  { %625 = vmatpush1.msra.mxu0 %v5031_v63  ;;  %696 = vmatpush1.msra.mxu1 %v5036_v0 }
  0x6f   :  { %626 = vmatprep.subr.mxu0 %v5048_v11  ;;  %697 = vmatprep.subr.mxu1 %v8079_v54  ;;  %v118_v54 = vlaneseq }
  0x70   :  { %627 = vmatpush1.msra.mxu0 %v5060_v29  ;;  %698 = vmatpush1.msra.mxu1 %v5065_v38 }
  0x71   :  { %628 = vmatprep.subr.mxu0 %v5070_v47  ;;  %699 = vmatprep.subr.mxu1 %v5075_v56  ;;  %v5167_v29 = vshrl.u32 %v118_v54, 7 }
  0x72   :  { %629 = vmatpush1.msra.mxu0 %v5082_v3  ;;  %662 = vmatprep.mubr.f32.mxu0 %v8078_v20 }
  0x73   :  { %700 = vmatpush1.msra.mxu1 %v5089_v1  ;;  %733 = vmatprep.mubr.f32.mxu1 %v8078_v20  ;;  %8080 = vst [vmem:[#allocation25_spill] sm:$0xff] %v5167_v29  ;;  %v7888_v56 = vsub.s32 0, %v5167_v29  ;;  %v7891_v3 = vsub.s32 2, %v5167_v29  ;;  %v116_v1 = vld [vmem:[%s7838_s3] sm:$0xf]  ;;  %v7899_v54 = vsub.s32 3, %v5167_v29 }
  0x74   :  { %768 = vmatprep.subr.mxu0 %v4679_v2  ;;  %839 = vmatprep.subr.mxu1 %v4684_v4  ;;  %v7898_v4 = vsub.s32 1, %v5167_v29 }
  0x75   :  { %v121_v11 = vrot.slane %v116_v1, %v7888_v56  ;;  %v5188_v0 = vrot.slane %v116_v1, %v7891_v3  ;;  %v5194_v60 = vrot.slane %v116_v1, %v7899_v54 }
  0x76   :  { %v125_v61 = vrot.slane %v116_v1, %v7898_v4 }
  0xe2   :  { %v5169_v38 = vpop.f32.mrf.mxu0  ;;  %v5171_v47 = vpop.f32.mrf.mxu1 }
  0xe4   :  { %v5178_v20 = vpop.f32.mrf.mxu0  ;;  %v5180_v2 = vpop.f32.mrf.mxu1 }
  0xe8   :  { %v210_v63 = vpop.f32.mrf.mxu0  ;;  %v323_v62 = vpop.f32.mrf.mxu1 }
  0xe9   :  { %v5196_v59 = vadd.f32 %v210_v63, %v121_v11  ;;  %v5199_v58 = vadd.f32 %v323_v62, %v5188_v0 }
  0xea   :  { %v212_v57 = vpop.f32.mrf.mxu0  ;;  %v325_v56 = vpop.f32.mrf.mxu1 }
  0xeb   :  { %8081 = vst [vmem:[#allocation26_spill] sm:$0xff] %v5199_v58  ;;  %v5201_v55 = vadd.f32 %v212_v57, %v125_v61  ;;  %v5204_v3 = vadd.f32 %v325_v56, %v5194_v60 }
  0xed   :  { %8082 = vst [vmem:[#allocation27_spill] sm:$0xff] %v5201_v55  ;;  %8083 = vst [vmem:[#allocation28_spill] sm:$0xff] %v5204_v3 }
  0xee   :  { %v216_v53 = vpop.f32.mrf.mxu0  ;;  %v329_v52 = vpop.f32.mrf.mxu1 }
  0xef   :  { %v5206_v51 = vadd.f32 %v216_v53, %v121_v11  ;;  %v5209_v4 = vadd.f32 %v329_v52, %v5188_v0 }
  0xf0   :  { %v218_v1 = vpop.f32.mrf.mxu0  ;;  %v331_v63 = vpop.f32.mrf.mxu1 }
  0xf1   :  { %8084 = vst [vmem:[#allocation29_spill] sm:$0xff] %v5206_v51  ;;  %8085 = vst [vmem:[#allocation30_spill] sm:$0xff] %v5209_v4  ;;  %v5211_v54 = vadd.f32 %v218_v1, %v125_v61  ;;  %v5214_v62 = vadd.f32 %v331_v63, %v5194_v60 }
  0xf3   :  { %8086 = vst [vmem:[#allocation31_spill] sm:$0xff] %v5211_v54  ;;  %8087 = vst [vmem:[#allocation32_spill] sm:$0xff] %v5214_v62 }
  0xf4   :  { %v222_v29 = vpop.f32.mrf.mxu0  ;;  %v335_v57 = vpop.f32.mrf.mxu1 }
  0xf5   :  { %v5216_v58 = vadd.f32 %v222_v29, %v121_v11  ;;  %v5219_v56 = vadd.f32 %v335_v57, %v5188_v0 }
  0xf6   :  { %v224_v3 = vpop.f32.mrf.mxu0  ;;  %v337_v53 = vpop.f32.mrf.mxu1 }
  0xf7   :  { %8088 = vst [vmem:[#allocation33_spill] sm:$0xff] %v5216_v58  ;;  %8089 = vst [vmem:[#allocation34_spill] sm:$0xff] %v5219_v56  ;;  %v5221_v51 = vadd.f32 %v224_v3, %v125_v61  ;;  %v5224_v52 = vadd.f32 %v337_v53, %v5194_v60 }
  0xf9   :  { %8090 = vst [vmem:[#allocation35_spill] sm:$0xff] %v5221_v51  ;;  %8091 = vst [vmem:[#allocation36_spill] sm:$0xff] %v5224_v52 }
  0xfa   :  { %v228_v4 = vpop.f32.mrf.mxu0  ;;  %v341_v1 = vpop.f32.mrf.mxu1 }
  0xfb   :  { %v5226_v54 = vadd.f32 %v228_v4, %v121_v11  ;;  %v5229_v63 = vadd.f32 %v341_v1, %v5188_v0 }
  0xfc   :  { %v230_v62 = vpop.f32.mrf.mxu0  ;;  %v343_v29 = vpop.f32.mrf.mxu1 }
  0xfd   :  { %8092 = vst [vmem:[#allocation37_spill] sm:$0xff] %v5226_v54  ;;  %8093 = vst [vmem:[#allocation38_spill] sm:$0xff] %v5229_v63  ;;  %v5231_v58 = vadd.f32 %v230_v62, %v125_v61  ;;  %v5234_v57 = vadd.f32 %v343_v29, %v5194_v60 }
  0xff   :  { %8094 = vst [vmem:[#allocation39_spill] sm:$0xff] %v5231_v58  ;;  %8095 = vst [vmem:[#allocation40_spill] sm:$0xff] %v5234_v57 }
 0x100   :  { %v234_v56 = vpop.f32.mrf.mxu0  ;;  %v347_v3 = vpop.f32.mrf.mxu1 }
 0x101   :  { %v5236_v51 = vadd.f32 %v234_v56, %v121_v11  ;;  %v5239_v53 = vadd.f32 %v347_v3, %v5188_v0 }
 0x102   :  { %v236_v52 = vpop.f32.mrf.mxu0  ;;  %v349_v4 = vpop.f32.mrf.mxu1 }
 0x103   :  { %8096 = vst [vmem:[#allocation41_spill] sm:$0xff] %v5236_v51  ;;  %8097 = vst [vmem:[#allocation42_spill] sm:$0xff] %v5239_v53  ;;  %v5241_v54 = vadd.f32 %v236_v52, %v125_v61  ;;  %v5244_v1 = vadd.f32 %v349_v4, %v5194_v60 }
 0x105   :  { %8098 = vst [vmem:[#allocation43_spill] sm:$0xff] %v5241_v54  ;;  %8099 = vst [vmem:[#allocation44_spill] sm:$0xff] %v5244_v1 }
 0x106   :  { %v240_v63 = vpop.f32.mrf.mxu0  ;;  %v353_v62 = vpop.f32.mrf.mxu1 }
 0x107   :  { %v5246_v58 = vadd.f32 %v240_v63, %v121_v11  ;;  %v5249_v29 = vadd.f32 %v353_v62, %v5188_v0 }
 0x108   :  { %v242_v57 = vpop.f32.mrf.mxu0  ;;  %v355_v56 = vpop.f32.mrf.mxu1 }
 0x109   :  { %8100 = vst [vmem:[#allocation45_spill] sm:$0xff] %v5246_v58  ;;  %8101 = vst [vmem:[#allocation46_spill] sm:$0xff] %v5249_v29  ;;  %v5251_v51 = vadd.f32 %v242_v57, %v125_v61  ;;  %v5254_v3 = vadd.f32 %v355_v56, %v5194_v60  ;;  %v205_v57 = vadd.f32 %v5169_v38, %v121_v11 }
 0x10a   :  { %v207_v56 = vadd.f32 %v5178_v20, %v125_v61 }
 0x10b   :  { %8102 = vst [vmem:[#allocation47_spill] sm:$0xff] %v5251_v51  ;;  %8103 = vst [vmem:[#allocation48_spill] sm:$0xff] %v5254_v3 }
 0x10c   :  { %v246_v53 = vpop.f32.mrf.mxu0  ;;  %v359_v52 = vpop.f32.mrf.mxu1 }
 0x10d   :  { %v5256_v54 = vadd.f32 %v246_v53, %v121_v11  ;;  %v5259_v4 = vadd.f32 %v359_v52, %v5188_v0 }
 0x10e   :  { %v248_v1 = vpop.f32.mrf.mxu0  ;;  %v361_v63 = vpop.f32.mrf.mxu1 }
 0x10f   :  { %8104 = vst [vmem:[#allocation49_spill] sm:$0xff] %v5256_v54  ;;  %8105 = vst [vmem:[#allocation50_spill] sm:$0xff] %v5259_v4  ;;  %v5261_v58 = vadd.f32 %v248_v1, %v125_v61  ;;  %v5264_v62 = vadd.f32 %v361_v63, %v5194_v60  ;;  %v320_v1 = vadd.f32 %v5180_v2, %v5194_v60 }
 0x110   :  { %v318_v63 = vadd.f32 %v5171_v47, %v5188_v0 }
 0x111   :  { %8106 = vst [vmem:[#allocation51_spill] sm:$0xff] %v5261_v58  ;;  %8107 = vst [vmem:[#allocation52_spill] sm:$0xff] %v5264_v62 }
 0x112   :  { %v494_v29 = vpop.f32.mrf.mxu0  ;;  %v565_v54 = vpop.f32.mrf.mxu1 }
 0x113   :  { %v570_v3 = vadd.f32 %v494_v29, %v205_v57  ;;  %v572_v62 = vadd.f32 %v565_v54, %v318_v63  ;;  %v8109_v54 = vld [vmem:[#allocation4_spill] sm:$0xff]  ;;  %v8114_v63 = vld [vmem:[#allocation9_spill] sm:$0xff] }
 0x114   :  { %v496_v51 = vpop.f32.mrf.mxu0  ;;  %v567_v4 = vpop.f32.mrf.mxu1 }
 0x115   :  { %v3814_v55 = vmul.f32 -1.442695, %v570_v3  ;;  %v571_v53 = vadd.f32 %v496_v51, %v207_v56  ;;  %v573_v58 = vadd.f32 %v567_v4, %v320_v1  ;;  %v8113_v1 = vld [vmem:[#allocation8_spill] sm:$0xff] }
 0x117   :  { %4023 = vpow2.f32 %v3814_v55  ;;  %v3815_v52 = vmul.f32 -1.442695, %v571_v53  ;;  %v3816_v11 = vmul.f32 -1.442695, %v573_v58  ;;  %v8111_v53 = vld [vmem:[#allocation6_spill] sm:$0xff] }
 0x119   :  { %4025 = vpow2.f32 %v3815_v52  ;;  %v8112_v52 = vld [vmem:[#allocation7_spill] sm:$0xff] }
 0x11a   :  { %4027 = vpow2.f32 %v3816_v11  ;;  %v8115_v11 = vld [vmem:[#allocation10_spill] sm:$0xff] }
 0x124   :  { %v4024_v38 = vpop.eup %4023 }
 0x125   :  { %v577_v61 = vadd.f32 1.0, %v4024_v38  ;;  %v8116_v38 = vld [vmem:[#allocation11_spill] sm:$0xff] }
 0x126   :  { %v4026_v20 = vpop.eup %4025 }
 0x127   :  { %4029 = vrcp.f32 %v577_v61  ;;  %v583_v51 = vadd.f32 1.0, %v4026_v20  ;;  %v4028_v55 = vpop.eup %4027  ;;  %v8117_v61 = vld [vmem:[#allocation12_spill] sm:$0xff]  ;;  %v8118_v20 = vld [vmem:[#allocation13_spill] sm:$0xff] }
 0x128   :  { %4031 = vtanh.f32 %v572_v62  ;;  %v590_v56 = vadd.f32 1.0, %v4028_v55  ;;  %v8110_v62 = vld [vmem:[#allocation5_spill] sm:$0xff]  ;;  %v8120_v55 = vld [vmem:[#allocation15_spill] sm:$0xff] }
 0x129   :  { %4033 = vrcp.f32 %v583_v51  ;;  %v8119_v51 = vld [vmem:[#allocation14_spill] sm:$0xff] }
 0x12a   :  { %4035 = vrcp.f32 %v590_v56  ;;  %v8124_v56 = vld [vmem:[#allocation19_spill] sm:$0xff] }
 0x134   :  { %v4030_v29 = vpop.eup %4029 }
 0x135   :  { %v4032_v3 = vpop.eup %4031 }
 0x136   :  { %v4034_v57 = vpop.eup %4033  ;;  %v594_v60 = vmul.f32 %v4032_v3, %v4030_v29  ;;  %v8121_v29 = vld [vmem:[#allocation16_spill] sm:$0xff]  ;;  %v8122_v3 = vld [vmem:[#allocation17_spill] sm:$0xff] }
 0x137   :  { %v593_v2 = vmul.f32 0.0, %v4034_v57  ;;  %v4036_v58 = vpop.eup %4035  ;;  %v8123_v57 = vld [vmem:[#allocation18_spill] sm:$0xff] }
 0x139   :  { %v5272_v4 = vadd.f32 %v594_v60, %v593_v2  ;;  %v8125_v2 = vld [vmem:[#allocation20_spill] sm:$0xff]  ;;  %v8126_v60 = vld [vmem:[#allocation21_spill] sm:$0xff] }
 0x13b   :  { %4037 = vtanh.f32 %v5272_v4 }
 0x148   :  { %v4038_v0 = vpop.eup %4037 }
 0x149   :  { %v5275_v47 = vmul.f32 %v4038_v0, %v4036_v58  ;;  %v8127_v58 = vld [vmem:[#allocation22_spill] sm:$0xff]  ;;  %v8128_v0 = vld [vmem:[#allocation23_spill] sm:$0xff] }
 0x14b   :  { %8108 = vst [vmem:[#allocation53_spill] sm:$0xff] %v5275_v47  ;;  %663 = vmatmul.mubr.f32.vlgmr.msra.gmra.mxu0 %v5275_v47  ;;  %734 = vmatmul.mubr.f32.vlgmr.msra.gmra.mxu1 %v5275_v47  ;;  %v8129_v47 = vmov 0.0  }
 0x14c   :  { %769 = vmatpush1.msra.mxu0 %v4689_v5  ;;  %840 = vmatpush1.msra.mxu1 %v4694_v6 }
 0x14d   :  { %770 = vmatprep.subr.mxu0 %v4699_v7  ;;  %841 = vmatprep.subr.mxu1 %v4704_v8 }
 0x14e   :  { %771 = vmatpush1.msra.mxu0 %v4713_v9  ;;  %842 = vmatpush1.msra.mxu1 %v4718_v10 }
 0x14f   :  { %772 = vmatprep.subr.mxu0 %v4730_v12  ;;  %843 = vmatprep.subr.mxu1 %v4735_v13 }
 0x150   :  { %773 = vmatpush1.msra.mxu0 %v4742_v14  ;;  %844 = vmatpush1.msra.mxu1 %v4747_v15 }
 0x151   :  { %774 = vmatprep.subr.mxu0 %v4752_v16  ;;  %845 = vmatprep.subr.mxu1 %v4757_v17 }
 0x152   :  { %775 = vmatpush1.msra.mxu0 %v4766_v18  ;;  %846 = vmatpush1.msra.mxu1 %v4771_v19 }
 0x153   :  { %776 = vmatprep.subr.mxu0 %v4783_v21  ;;  %847 = vmatprep.subr.mxu1 %v4788_v22 }
 0x154   :  { %777 = vmatpush1.msra.mxu0 %v4795_v23  ;;  %848 = vmatpush1.msra.mxu1 %v4800_v24 }
 0x155   :  { %778 = vmatprep.subr.mxu0 %v4805_v25  ;;  %849 = vmatprep.subr.mxu1 %v4810_v26 }
 0x156   :  { %779 = vmatpush1.msra.mxu0 %v4819_v27  ;;  %850 = vmatpush1.msra.mxu1 %v4824_v28 }
 0x157   :  { %780 = vmatprep.subr.mxu0 %v4836_v30  ;;  %851 = vmatprep.subr.mxu1 %v4841_v31 }
 0x158   :  { %781 = vmatpush1.msra.mxu0 %v4848_v32  ;;  %852 = vmatpush1.msra.mxu1 %v4853_v33 }
 0x159   :  { %782 = vmatprep.subr.mxu0 %v4858_v34  ;;  %853 = vmatprep.subr.mxu1 %v4863_v35 }
 0x15a   :  { %783 = vmatpush1.msra.mxu0 %v4872_v36  ;;  %854 = vmatpush1.msra.mxu1 %v4877_v37 }
 0x15b   :  { %784 = vmatprep.subr.mxu0 %v4889_v39  ;;  %855 = vmatprep.subr.mxu1 %v4894_v40 }
 0x15c   :  { %785 = vmatpush1.msra.mxu0 %v4901_v41  ;;  %856 = vmatpush1.msra.mxu1 %v4906_v42 }
 0x15d   :  { %786 = vmatprep.subr.mxu0 %v4911_v43  ;;  %857 = vmatprep.subr.mxu1 %v4916_v44 }
 0x15e   :  { %787 = vmatpush1.msra.mxu0 %v4925_v45  ;;  %858 = vmatpush1.msra.mxu1 %v4930_v46 }
 0x15f   :  { %788 = vmatprep.subr.mxu0 %v4942_v48  ;;  %859 = vmatprep.subr.mxu1 %v4947_v49 }
 0x160   :  { %789 = vmatpush1.msra.mxu0 %v4954_v50  ;;  %860 = vmatpush1.msra.mxu1 %v8109_v54 }
 0x161   :  { %790 = vmatprep.subr.mxu0 %v8110_v62  ;;  %861 = vmatprep.subr.mxu1 %v8111_v53 }
 0x162   :  { %791 = vmatpush1.msra.mxu0 %v8112_v52  ;;  %862 = vmatpush1.msra.mxu1 %v8113_v1 }
 0x163   :  { %792 = vmatprep.subr.mxu0 %v8114_v63  ;;  %863 = vmatprep.subr.mxu1 %v8115_v11  ;;  %v8135_v11 = vld [vmem:[#allocation26_spill] sm:$0xff] }
 0x164   :  { %793 = vmatpush1.msra.mxu0 %v8116_v38  ;;  %864 = vmatpush1.msra.mxu1 %v8117_v61  ;;  %v8134_v38 = vld [vmem:[#allocation28_spill] sm:$0xff] }
 0x165   :  { %794 = vmatprep.subr.mxu0 %v8118_v20  ;;  %865 = vmatprep.subr.mxu1 %v8119_v51  ;;  %v8130_v51 = vld [vmem:[#allocation24_spill] sm:$0xff] }
 0x166   :  { %795 = vmatpush1.msra.mxu0 %v8120_v55  ;;  %866 = vmatpush1.msra.mxu1 %v8121_v29  ;;  %v8131_v29 = vld [vmem:[#allocation2_spill] sm:$0xff] }
 0x167   :  { %796 = vmatprep.subr.mxu0 %v8122_v3  ;;  %867 = vmatprep.subr.mxu1 %v8123_v57  ;;  %v8132_v3 = vld [vmem:[#allocation3_spill] sm:$0xff] }
 0x168   :  { %797 = vmatpush1.msra.mxu0 %v8124_v56  ;;  %868 = vmatpush1.msra.mxu1 %v8125_v2 }
 0x169   :  { %798 = vmatprep.subr.mxu0 %v8126_v60  ;;  %869 = vmatprep.subr.mxu1 %v8127_v58  ;;  %v8133_v60 = vld [vmem:[#allocation27_spill] sm:$0xff] }
 0x16a   :  { %799 = vmatpush1.msra.mxu0 %v8128_v0  ;;  %832 = vmatprep.mubr.f32.mxu0 %v8129_v47 }
 0x16b   :  { %870 = vmatpush1.msra.mxu1 %v8130_v51  ;;  %903 = vmatprep.mubr.f32.mxu1 %v8129_v47 }
 0x16c   :  { %938 = vmatprep.subr.mxu0 %v8131_v29  ;;  %1009 = vmatprep.subr.mxu1 %v8132_v3 }
 0x20b   :  { %v664_v57 = vpop.f32.mrf.mxu0  ;;  %v735_v58 = vpop.f32.mrf.mxu1 }
 0x20c   :  { %v740_v56 = vadd.f32 %v664_v57, %v5196_v59  ;;  %v742_v47 = vadd.f32 %v735_v58, %v8135_v11  ;;  %v8159_v58 = vld [vmem:[#allocation32_spill] sm:$0xff] }
 0x20d   :  { %v666_v2 = vpop.f32.mrf.mxu0  ;;  %v737_v61 = vpop.f32.mrf.mxu1 }
 0x20e   :  { %v3817_v55 = vmul.f32 -1.442695, %v740_v56  ;;  %v741_v20 = vadd.f32 %v666_v2, %v8133_v60  ;;  %v743_v51 = vadd.f32 %v737_v61, %v8134_v38 }
 0x210   :  { %4039 = vpow2.f32 %v3817_v55  ;;  %v3818_v0 = vmul.f32 -1.442695, %v741_v20  ;;  %v3819_v63 = vmul.f32 -1.442695, %v743_v51 }
 0x212   :  { %4041 = vpow2.f32 %v3818_v0 }
 0x213   :  { %4043 = vtanh.f32 %v742_v47 }
 0x214   :  { %4045 = vpow2.f32 %v3819_v63 }
 0x21d   :  { %v4040_v29 = vpop.eup %4039 }
 0x21e   :  { %v747_v1 = vadd.f32 1.0, %v4040_v29 }
 0x21f   :  { %v4042_v3 = vpop.eup %4041 }
 0x220   :  { %4047 = vrcp.f32 %v747_v1  ;;  %v753_v59 = vadd.f32 1.0, %v4042_v3  ;;  %v4044_v57 = vpop.eup %4043  ;;  %v8160_v3 = vld [vmem:[#allocation30_spill] sm:$0xff] }
 0x221   :  { %v4046_v56 = vpop.eup %4045 }
 0x222   :  { %4049 = vrcp.f32 %v753_v59  ;;  %v760_v60 = vadd.f32 1.0, %v4046_v56 }
 0x224   :  { %4051 = vrcp.f32 %v760_v60 }
 0x22d   :  { %v4048_v55 = vpop.eup %4047 }
 0x22e   :  { %v764_v2 = vmul.f32 %v4048_v55, %v4044_v57 }
 0x22f   :  { %v4050_v20 = vpop.eup %4049 }
 0x230   :  { %v763_v0 = vmul.f32 %v4050_v20, %v5272_v4 }
 0x231   :  { %v4052_v11 = vpop.eup %4051 }
 0x232   :  { %v5350_v38 = vadd.f32 %v764_v2, %v763_v0 }
 0x234   :  { %4053 = vtanh.f32 %v5350_v38 }
 0x241   :  { %v4054_v47 = vpop.eup %4053 }
 0x242   :  { %v5353_v61 = vmul.f32 %v4054_v47, %v4052_v11 }
 0x244   :  { %8136 = vst [vmem:[#allocation4_spill] sm:$0xff] %v5353_v61  ;;  %833 = vmatmul.mubr.f32.vlgmr.msra.gmra.mxu0 %v5353_v61  ;;  %904 = vmatmul.mubr.f32.vlgmr.msra.gmra.mxu1 %v5353_v61  ;;  %v5586_v61 = vld [vmem:[%s7837_s2 + $0x138] sm:$0xff] }
 0x245   :  { %939 = vmatpush1.msra.mxu0 %v4689_v5  ;;  %1010 = vmatpush1.msra.mxu1 %v4694_v6  ;;  %v8137_v5 = vld [vmem:[#allocation8_spill] sm:$0xff]  ;;  %v8138_v6 = vld [vmem:[#allocation9_spill] sm:$0xff] }
 0x246   :  { %940 = vmatprep.subr.mxu0 %v4699_v7  ;;  %1011 = vmatprep.subr.mxu1 %v4704_v8  ;;  %v8139_v7 = vld [vmem:[#allocation10_spill] sm:$0xff]  ;;  %v8140_v8 = vld [vmem:[#allocation11_spill] sm:$0xff] }
 0x247   :  { %941 = vmatpush1.msra.mxu0 %v4713_v9  ;;  %1012 = vmatpush1.msra.mxu1 %v4718_v10  ;;  %v8141_v9 = vld [vmem:[#allocation12_spill] sm:$0xff]  ;;  %v8142_v10 = vld [vmem:[#allocation13_spill] sm:$0xff] }
 0x248   :  { %942 = vmatprep.subr.mxu0 %v4730_v12  ;;  %1013 = vmatprep.subr.mxu1 %v4735_v13  ;;  %v8143_v12 = vld [vmem:[#allocation14_spill] sm:$0xff]  ;;  %v8144_v13 = vld [vmem:[#allocation15_spill] sm:$0xff] }
 0x249   :  { %943 = vmatpush1.msra.mxu0 %v4742_v14  ;;  %1014 = vmatpush1.msra.mxu1 %v4747_v15  ;;  %v8145_v14 = vld [vmem:[#allocation16_spill] sm:$0xff]  ;;  %v8146_v15 = vld [vmem:[#allocation17_spill] sm:$0xff] }
 0x24a   :  { %944 = vmatprep.subr.mxu0 %v4752_v16  ;;  %1015 = vmatprep.subr.mxu1 %v4757_v17  ;;  %v8147_v16 = vld [vmem:[#allocation18_spill] sm:$0xff]  ;;  %v8148_v17 = vld [vmem:[#allocation19_spill] sm:$0xff] }
 0x24b   :  { %945 = vmatpush1.msra.mxu0 %v4766_v18  ;;  %1016 = vmatpush1.msra.mxu1 %v4771_v19  ;;  %v8149_v18 = vld [vmem:[#allocation20_spill] sm:$0xff]  ;;  %v8150_v19 = vld [vmem:[#allocation21_spill] sm:$0xff] }
 0x24c   :  { %946 = vmatprep.subr.mxu0 %v4783_v21  ;;  %1017 = vmatprep.subr.mxu1 %v4788_v22  ;;  %v8151_v21 = vld [vmem:[#allocation22_spill] sm:$0xff]  ;;  %v8152_v22 = vld [vmem:[#allocation23_spill] sm:$0xff] }
 0x24d   :  { %947 = vmatpush1.msra.mxu0 %v4795_v23  ;;  %1018 = vmatpush1.msra.mxu1 %v4800_v24  ;;  %v8153_v23 = vmov 0.0   ;;  %v8154_v24 = vld [vmem:[#allocation24_spill] sm:$0xff] }
 0x24e   :  { %948 = vmatprep.subr.mxu0 %v4805_v25  ;;  %1019 = vmatprep.subr.mxu1 %v4810_v26  ;;  %v5424_v25 = vld [vmem:[%s7837_s2 + $0x1e8] sm:$0xff]  ;;  %v5430_v26 = vld [vmem:[%s7837_s2 + $0x1f8] sm:$0xff] }
 0x24f   :  { %949 = vmatpush1.msra.mxu0 %v4819_v27  ;;  %1020 = vmatpush1.msra.mxu1 %v4824_v28  ;;  %8155 = vst [vmem:[#allocation5_spill] sm:$0xff] %v5424_v25  ;;  %8156 = vst [vmem:[#allocation6_spill] sm:$0xff] %v5430_v26  ;;  %v8157_v28 = vld [vmem:[#allocation29_spill] sm:$0xff] }
 0x250   :  { %950 = vmatprep.subr.mxu0 %v4836_v30  ;;  %1021 = vmatprep.subr.mxu1 %v4841_v31 }
 0x251   :  { %951 = vmatpush1.msra.mxu0 %v4848_v32  ;;  %1022 = vmatpush1.msra.mxu1 %v4853_v33  ;;  %v8158_v33 = vld [vmem:[#allocation31_spill] sm:$0xff] }
 0x252   :  { %952 = vmatprep.subr.mxu0 %v4858_v34  ;;  %1023 = vmatprep.subr.mxu1 %v4863_v35 }
 0x253   :  { %953 = vmatpush1.msra.mxu0 %v4872_v36  ;;  %1024 = vmatpush1.msra.mxu1 %v4877_v37 }
 0x254   :  { %954 = vmatprep.subr.mxu0 %v4889_v39  ;;  %1025 = vmatprep.subr.mxu1 %v4894_v40 }
 0x255   :  { %955 = vmatpush1.msra.mxu0 %v4901_v41  ;;  %1026 = vmatpush1.msra.mxu1 %v4906_v42 }
 0x256   :  { %956 = vmatprep.subr.mxu0 %v4911_v43  ;;  %1027 = vmatprep.subr.mxu1 %v4916_v44 }
 0x257   :  { %957 = vmatpush1.msra.mxu0 %v4925_v45  ;;  %1028 = vmatpush1.msra.mxu1 %v4930_v46 }
 0x258   :  { %958 = vmatprep.subr.mxu0 %v4942_v48  ;;  %1029 = vmatprep.subr.mxu1 %v4947_v49 }
 0x259   :  { %959 = vmatpush1.msra.mxu0 %v4954_v50  ;;  %1030 = vmatpush1.msra.mxu1 %v8109_v54 }
 0x25a   :  { %960 = vmatprep.subr.mxu0 %v8110_v62  ;;  %1031 = vmatprep.subr.mxu1 %v8111_v53 }
 0x25b   :  { %961 = vmatpush1.msra.mxu0 %v8112_v52  ;;  %1032 = vmatpush1.msra.mxu1 %v8137_v5 }
 0x25c   :  { %962 = vmatprep.subr.mxu0 %v8138_v6  ;;  %1033 = vmatprep.subr.mxu1 %v8139_v7 }
 0x25d   :  { %963 = vmatpush1.msra.mxu0 %v8140_v8  ;;  %1034 = vmatpush1.msra.mxu1 %v8141_v9 }
 0x25e   :  { %964 = vmatprep.subr.mxu0 %v8142_v10  ;;  %1035 = vmatprep.subr.mxu1 %v8143_v12 }
 0x25f   :  { %965 = vmatpush1.msra.mxu0 %v8144_v13  ;;  %1036 = vmatpush1.msra.mxu1 %v8145_v14 }
 0x260   :  { %966 = vmatprep.subr.mxu0 %v8146_v15  ;;  %1037 = vmatprep.subr.mxu1 %v8147_v16 }
 0x261   :  { %967 = vmatpush1.msra.mxu0 %v8148_v17  ;;  %1038 = vmatpush1.msra.mxu1 %v8149_v18 }
 0x262   :  { %968 = vmatprep.subr.mxu0 %v8150_v19  ;;  %1039 = vmatprep.subr.mxu1 %v8151_v21 }
 0x263   :  { %969 = vmatpush1.msra.mxu0 %v8152_v22  ;;  %1002 = vmatprep.mubr.f32.mxu0 %v8153_v23 }
 0x264   :  { %1040 = vmatpush1.msra.mxu1 %v8154_v24  ;;  %1073 = vmatprep.mubr.f32.mxu1 %v8153_v23 }
 0x265   :  { %1108 = vmatprep.subr.mxu0 %v5424_v25  ;;  %1179 = vmatprep.subr.mxu1 %v5430_v26 }
 0x304   :  { %v834_v27 = vpop.f32.mrf.mxu0  ;;  %v905_v1 = vpop.f32.mrf.mxu1 }
 0x305   :  { %v910_v30 = vadd.f32 %v834_v27, %v8157_v28  ;;  %v912_v59 = vadd.f32 %v905_v1, %v8160_v3  ;;  %v5448_v1 = vld [vmem:[%s7837_s2 + $0x1e0] sm:$0xff]  ;;  %v5484_v3 = vld [vmem:[%s7837_s2 + $0x1a8] sm:$0xff] }
 0x306   :  { %v836_v31 = vpop.f32.mrf.mxu0  ;;  %v907_v51 = vpop.f32.mrf.mxu1 }
 0x307   :  { %v3820_v32 = vmul.f32 -1.442695, %v910_v30  ;;  %v911_v4 = vadd.f32 %v836_v31, %v8158_v33  ;;  %v913_v29 = vadd.f32 %v907_v51, %v8159_v58  ;;  %v5466_v51 = vld [vmem:[%s7837_s2 + $0x1d8] sm:$0xff]  ;;  %v5472_v58 = vld [vmem:[%s7837_s2 + $0x1c0] sm:$0xff] }
 0x309   :  { %4055 = vpow2.f32 %v3820_v32  ;;  %v3821_v63 = vmul.f32 -1.442695, %v911_v4  ;;  %v3822_v57 = vmul.f32 -1.442695, %v913_v29  ;;  %v5478_v29 = vld [vmem:[%s7837_s2 + $0x1d0] sm:$0xff] }
 0x30b   :  { %4057 = vpow2.f32 %v3821_v63  ;;  %v5460_v63 = vld [vmem:[%s7837_s2 + $0x1c8] sm:$0xff] }
 0x30c   :  { %4059 = vtanh.f32 %v912_v59  ;;  %v5490_v59 = vld [vmem:[%s7837_s2 + $0x1b8] sm:$0xff] }
 0x30d   :  { %4061 = vpow2.f32 %v3822_v57  ;;  %v5496_v57 = vld [vmem:[%s7837_s2 + $0x1a0] sm:$0xff] }
 0x316   :  { %v4056_v56 = vpop.eup %4055 }
 0x317   :  { %v917_v55 = vadd.f32 1.0, %v4056_v56  ;;  %v5502_v56 = vld [vmem:[%s7837_s2 + $0x1b0] sm:$0xff] }
 0x318   :  { %v4058_v2 = vpop.eup %4057 }
 0x319   :  { %4063 = vrcp.f32 %v917_v55  ;;  %v923_v20 = vadd.f32 1.0, %v4058_v2  ;;  %v4060_v60 = vpop.eup %4059  ;;  %v5508_v55 = vld [vmem:[%s7837_s2 + $0x188] sm:$0xff]  ;;  %v5514_v2 = vld [vmem:[%s7837_s2 + $0x198] sm:$0xff] }
 0x31a   :  { %v4062_v0 = vpop.eup %4061 }
 0x31b   :  { %4065 = vrcp.f32 %v923_v20  ;;  %v930_v28 = vadd.f32 1.0, %v4062_v0  ;;  %v5520_v20 = vld [vmem:[%s7837_s2 + $0x180] sm:$0xff]  ;;  %v5532_v0 = vld [vmem:[%s7837_s2 + $0x168] sm:$0xff] }
 0x31d   :  { %4067 = vrcp.f32 %v930_v28  ;;  %v5556_v28 = vld [vmem:[%s7837_s2 + $0x148] sm:$0xff] }
 0x326   :  { %v4064_v11 = vpop.eup %4063 }
 0x327   :  { %v934_v47 = vmul.f32 %v4064_v11, %v4060_v60  ;;  %v5526_v60 = vld [vmem:[%s7837_s2 + $0x190] sm:$0xff]  ;;  %v5538_v11 = vld [vmem:[%s7837_s2 + $0x178] sm:$0xff] }
 0x328   :  { %v4066_v27 = vpop.eup %4065 }
 0x329   :  { %v933_v30 = vmul.f32 %v4066_v27, %v5350_v38  ;;  %v5454_v38 = vld [vmem:[%s7837_s2 + $0x1f0] sm:$0xff] }
 0x32a   :  { %v4068_v32 = vpop.eup %4067  ;;  %v5550_v27 = vld [vmem:[%s7837_s2 + $0x170] sm:$0xff] }
 0x32b   :  { %v5438_v31 = vadd.f32 %v934_v47, %v933_v30  ;;  %v5544_v47 = vld [vmem:[%s7837_s2 + $0x160] sm:$0xff]  ;;  %v5562_v30 = vld [vmem:[%s7837_s2 + $0x158] sm:$0xff] }
 0x32d   :  { %4069 = vtanh.f32 %v5438_v31 }
 0x33a   :  { %v4070_v33 = vpop.eup %4069 }
 0x33b   :  { %v5441_v4 = vmul.f32 %v4070_v33, %v4068_v32  ;;  %v5568_v32 = vld [vmem:[%s7837_s2 + $0x140] sm:$0xff]  ;;  %v5574_v33 = vld [vmem:[%s7837_s2 + $0x150] sm:$0xff] }
 0x33c   :  { %8162 = vst [vmem:[#allocation2_spill] sm:$0xff] %v5568_v32  ;;  %8163 = vst [vmem:[#allocation3_spill] sm:$0xff] %v5574_v33 }
 0x33d   :  { %8161 = vst [vmem:[#allocation7_spill] sm:$0xff] %v5441_v4  ;;  %1003 = vmatmul.mubr.f32.vlgmr.msra.gmra.mxu0 %v5441_v4  ;;  %1074 = vmatmul.mubr.f32.vlgmr.msra.gmra.mxu1 %v5441_v4  ;;  %v5580_v4 = vld [vmem:[%s7837_s2 + $0x128] sm:$0xff] }
 0x33e   :  { %1109 = vmatpush1.msra.mxu0 %v5448_v1  ;;  %1180 = vmatpush1.msra.mxu1 %v5454_v38 }
 0x33f   :  { %1110 = vmatprep.subr.mxu0 %v5460_v63  ;;  %1181 = vmatprep.subr.mxu1 %v5466_v51 }
 0x340   :  { %1111 = vmatpush1.msra.mxu0 %v5472_v58  ;;  %1182 = vmatpush1.msra.mxu1 %v5478_v29 }
 0x341   :  { %1112 = vmatprep.subr.mxu0 %v5484_v3  ;;  %1183 = vmatprep.subr.mxu1 %v5490_v59 }
 0x342   :  { %1113 = vmatpush1.msra.mxu0 %v5496_v57  ;;  %1184 = vmatpush1.msra.mxu1 %v5502_v56 }
 0x343   :  { %1114 = vmatprep.subr.mxu0 %v5508_v55  ;;  %1185 = vmatprep.subr.mxu1 %v5514_v2 }
 0x344   :  { %1115 = vmatpush1.msra.mxu0 %v5520_v20  ;;  %1186 = vmatpush1.msra.mxu1 %v5526_v60 }
 0x345   :  { %1116 = vmatprep.subr.mxu0 %v5532_v0  ;;  %1187 = vmatprep.subr.mxu1 %v5538_v11 }
 0x346   :  { %1117 = vmatpush1.msra.mxu0 %v5544_v47  ;;  %1188 = vmatpush1.msra.mxu1 %v5550_v27 }
 0x347   :  { %1118 = vmatprep.subr.mxu0 %v5556_v28  ;;  %1189 = vmatprep.subr.mxu1 %v5562_v30 }
 0x348   :  { %1119 = vmatpush1.msra.mxu0 %v5568_v32  ;;  %1190 = vmatpush1.msra.mxu1 %v5574_v33  ;;  %v5592_v32 = vld [vmem:[%s7837_s2 + $0x120] sm:$0xff]  ;;  %v5598_v33 = vld [vmem:[%s7837_s2 + $0x130] sm:$0xff] }
 0x349   :  { %1120 = vmatprep.subr.mxu0 %v5580_v4  ;;  %1191 = vmatprep.subr.mxu1 %v5586_v61 }
 0x34a   :  { %1121 = vmatpush1.msra.mxu0 %v5592_v32  ;;  %1192 = vmatpush1.msra.mxu1 %v5598_v33 }
 0x34b   :  { %1122 = vmatprep.subr.mxu0 %v4858_v34  ;;  %1193 = vmatprep.subr.mxu1 %v4863_v35  ;;  %v8164_v35 = vld [vmem:[#allocation33_spill] sm:$0xff] }
 0x34c   :  { %1123 = vmatpush1.msra.mxu0 %v4872_v36  ;;  %1194 = vmatpush1.msra.mxu1 %v4877_v37 }
 0x34d   :  { %1124 = vmatprep.subr.mxu0 %v4889_v39  ;;  %1195 = vmatprep.subr.mxu1 %v4894_v40  ;;  %v8165_v40 = vld [vmem:[#allocation35_spill] sm:$0xff] }
 0x34e   :  { %1125 = vmatpush1.msra.mxu0 %v4901_v41  ;;  %1196 = vmatpush1.msra.mxu1 %v4906_v42 }
 0x34f   :  { %1126 = vmatprep.subr.mxu0 %v4911_v43  ;;  %1197 = vmatprep.subr.mxu1 %v4916_v44 }
 0x350   :  { %1127 = vmatpush1.msra.mxu0 %v4925_v45  ;;  %1198 = vmatpush1.msra.mxu1 %v4930_v46  ;;  %v8166_v45 = vld [vmem:[#allocation36_spill] sm:$0xff] }
 0x351   :  { %1128 = vmatprep.subr.mxu0 %v4942_v48  ;;  %1199 = vmatprep.subr.mxu1 %v4947_v49  ;;  %v8167_v48 = vld [vmem:[#allocation34_spill] sm:$0xff] }
 0x352   :  { %1129 = vmatpush1.msra.mxu0 %v4954_v50  ;;  %1200 = vmatpush1.msra.mxu1 %v8109_v54 }
 0x353   :  { %1130 = vmatprep.subr.mxu0 %v8110_v62  ;;  %1201 = vmatprep.subr.mxu1 %v8111_v53 }
 0x354   :  { %1131 = vmatpush1.msra.mxu0 %v8112_v52  ;;  %1202 = vmatpush1.msra.mxu1 %v8137_v5 }
 0x355   :  { %1132 = vmatprep.subr.mxu0 %v8138_v6  ;;  %1203 = vmatprep.subr.mxu1 %v8139_v7 }
 0x356   :  { %1133 = vmatpush1.msra.mxu0 %v8140_v8  ;;  %1204 = vmatpush1.msra.mxu1 %v8141_v9 }
 0x357   :  { %1134 = vmatprep.subr.mxu0 %v8142_v10  ;;  %1205 = vmatprep.subr.mxu1 %v8143_v12 }
 0x358   :  { %1135 = vmatpush1.msra.mxu0 %v8144_v13  ;;  %1206 = vmatpush1.msra.mxu1 %v8145_v14 }
 0x359   :  { %1136 = vmatprep.subr.mxu0 %v8146_v15  ;;  %1207 = vmatprep.subr.mxu1 %v8147_v16 }
 0x35a   :  { %1137 = vmatpush1.msra.mxu0 %v8148_v17  ;;  %1208 = vmatpush1.msra.mxu1 %v8149_v18  ;;  %v8169_v17 = vld [vmem:[#allocation2_spill] sm:$0xff]  ;;  %v8170_v18 = vld [vmem:[#allocation3_spill] sm:$0xff] }
 0x35b   :  { %1138 = vmatprep.subr.mxu0 %v8150_v19  ;;  %1209 = vmatprep.subr.mxu1 %v8151_v21  ;;  %v5682_v19 = vld [vmem:[%s7837_s2 + $0x108] sm:$0xff]  ;;  %v5688_v21 = vld [vmem:[%s7837_s2 + $0x118] sm:$0xff] }
 0x35c   :  { %1139 = vmatpush1.msra.mxu0 %v8152_v22  ;;  %1172 = vmatprep.mubr.f32.mxu0 %v8153_v23  ;;  %v5694_v22 = vld [vmem:[%s7837_s2 + $0x100] sm:$0xff] }
 0x35d   :  { %1210 = vmatpush1.msra.mxu1 %v8154_v24  ;;  %1243 = vmatprep.mubr.f32.mxu1 %v8153_v23  ;;  %v5700_v24 = vld [vmem:[%s7837_s2 + $0x110] sm:$0xff] }
 0x35e   :  { %1278 = vmatprep.subr.mxu0 %v5424_v25  ;;  %1349 = vmatprep.subr.mxu1 %v5430_v26 }
 0x3fd   :  { %v1004_v34 = vpop.f32.mrf.mxu0  ;;  %v1075_v42 = vpop.f32.mrf.mxu1 }
 0x3fe   :  { %v1080_v36 = vadd.f32 %v1004_v34, %v8164_v35  ;;  %v1082_v49 = vadd.f32 %v1075_v42, %v8167_v48  ;;  %v5712_v34 = vld [vmem:[%s7837_s2 + $0xf8] sm:$0xff]  ;;  %v5718_v35 = vld [vmem:[%s7837_s2 + $0xe0] sm:$0xff]  ;;  %v5754_v42 = vld [vmem:[%s7837_s2 + $0xa8] sm:$0xff] }
 0x3ff   :  { %v1006_v37 = vpop.f32.mrf.mxu0  ;;  %v1077_v44 = vpop.f32.mrf.mxu1  ;;  %v5784_v48 = vld [vmem:[%s7837_s2 + $0x98] sm:$0xff] }
 0x400   :  { %v3823_v39 = vmul.f32 -1.442695, %v1080_v36  ;;  %v1081_v41 = vadd.f32 %v1006_v37, %v8165_v40  ;;  %v1083_v46 = vadd.f32 %v1077_v44, %v8166_v45  ;;  %v5724_v36 = vld [vmem:[%s7837_s2 + $0xf0] sm:$0xff]  ;;  %v5730_v37 = vld [vmem:[%s7837_s2 + $0xc8] sm:$0xff]  ;;  %v5742_v40 = vld [vmem:[%s7837_s2 + $0xc0] sm:$0xff] }
 0x401   :  { %v5766_v44 = vld [vmem:[%s7837_s2 + $0xa0] sm:$0xff]  ;;  %v5772_v45 = vld [vmem:[%s7837_s2 + $0xb0] sm:$0xff] }
 0x402   :  { %4071 = vpow2.f32 %v3823_v39  ;;  %v3824_v43 = vmul.f32 -1.442695, %v1081_v41  ;;  %v3825_v50 = vmul.f32 -1.442695, %v1083_v46  ;;  %v5736_v39 = vld [vmem:[%s7837_s2 + $0xd8] sm:$0xff]  ;;  %v5748_v41 = vld [vmem:[%s7837_s2 + $0xd0] sm:$0xff] }
 0x403   :  { %v5778_v46 = vld [vmem:[%s7837_s2 + $0x88] sm:$0xff] }
 0x404   :  { %4073 = vpow2.f32 %v3824_v43  ;;  %v5760_v43 = vld [vmem:[%s7837_s2 + $0xb8] sm:$0xff] }
 0x405   :  { %4075 = vtanh.f32 %v1082_v49  ;;  %v5790_v49 = vld [vmem:[%s7837_s2 + $0x80] sm:$0xff] }
 0x406   :  { %4077 = vpow2.f32 %v3825_v50  ;;  %v5796_v50 = vld [vmem:[%s7837_s2 + $0x90] sm:$0xff] }
 0x407   :  { %8171 = vst [vmem:[#allocation28_spill] sm:$0xff] %v5796_v50 }
 0x40f   :  { %v4072_v54 = vpop.eup %4071 }
 0x410   :  { %v1087_v62 = vadd.f32 1.0, %v4072_v54  ;;  %v5802_v54 = vld [vmem:[%s7837_s2 + $0x68] sm:$0xff] }
 0x411   :  { %v4074_v53 = vpop.eup %4073  ;;  %8172 = vst [vmem:[#allocation26_spill] sm:$0xff] %v5802_v54 }
 0x412   :  { %4079 = vrcp.f32 %v1087_v62  ;;  %v1093_v52 = vadd.f32 1.0, %v4074_v53  ;;  %v4076_v5 = vpop.eup %4075  ;;  %v5808_v62 = vld [vmem:[%s7837_s2 + $0x78] sm:$0xff]  ;;  %v5814_v53 = vld [vmem:[%s7837_s2 + $0x60] sm:$0xff] }
 0x413   :  { %v4078_v6 = vpop.eup %4077  ;;  %8173 = vst [vmem:[#allocation8_spill] sm:$0xff] %v5808_v62  ;;  %8174 = vst [vmem:[#allocation9_spill] sm:$0xff] %v5814_v53 }
 0x414   :  { %4081 = vrcp.f32 %v1093_v52  ;;  %v1100_v10 = vadd.f32 1.0, %v4078_v6  ;;  %v5820_v52 = vld [vmem:[%s7837_s2 + $0x70] sm:$0xff]  ;;  %v5832_v6 = vld [vmem:[%s7837_s2 + $0x58] sm:$0xff] }
 0x415   :  { %8175 = vst [vmem:[#allocation10_spill] sm:$0xff] %v5820_v52  ;;  %8177 = vst [vmem:[#allocation12_spill] sm:$0xff] %v5832_v6 }
 0x416   :  { %4083 = vrcp.f32 %v1100_v10  ;;  %v5856_v10 = vld [vmem:[%s7837_s2 + $0x38] sm:$0xff] }
 0x417   :  { %8181 = vst [vmem:[#allocation16_spill] sm:$0xff] %v5856_v10 }
 0x41f   :  { %v4080_v7 = vpop.eup %4079 }
 0x420   :  { %v1104_v8 = vmul.f32 %v4080_v7, %v4076_v5  ;;  %v5826_v5 = vld [vmem:[%s7837_s2 + $0x48] sm:$0xff]  ;;  %v5838_v7 = vld [vmem:[%s7837_s2 + $0x40] sm:$0xff] }
 0x421   :  { %v4082_v9 = vpop.eup %4081  ;;  %8176 = vst [vmem:[#allocation11_spill] sm:$0xff] %v5826_v5  ;;  %8178 = vst [vmem:[#allocation13_spill] sm:$0xff] %v5838_v7 }
 0x422   :  { %v1103_v12 = vmul.f32 %v4082_v9, %v5438_v31  ;;  %v5706_v31 = vld [vmem:[%s7837_s2 + $0xe8] sm:$0xff] }
 0x423   :  { %v4084_v14 = vpop.eup %4083  ;;  %v5850_v9 = vld [vmem:[%s7837_s2 + $0x28] sm:$0xff] }
 0x424   :  { %v5646_v13 = vadd.f32 %v1104_v8, %v1103_v12  ;;  %v5844_v8 = vld [vmem:[%s7837_s2 + $0x50] sm:$0xff]  ;;  %8180 = vst [vmem:[#allocation15_spill] sm:$0xff] %v5850_v9  ;;  %v5862_v12 = vld [vmem:[%s7837_s2 + $0x20] sm:$0xff] }
 0x425   :  { %8179 = vst [vmem:[#allocation14_spill] sm:$0xff] %v5844_v8  ;;  %8182 = vst [vmem:[#allocation17_spill] sm:$0xff] %v5862_v12 }
 0x426   :  { %4085 = vtanh.f32 %v5646_v13 }
 0x433   :  { %v4086_v15 = vpop.eup %4085 }
 0x434   :  { %v5649_v16 = vmul.f32 %v4086_v15, %v4084_v14  ;;  %v5868_v14 = vld [vmem:[%s7837_s2 + $0x30] sm:$0xff]  ;;  %v5874_v15 = vld [vmem:[%s7837_s2 + $0x8] sm:$0xff] }
 0x435   :  { %8183 = vst [vmem:[#allocation18_spill] sm:$0xff] %v5868_v14  ;;  %8184 = vst [vmem:[#allocation19_spill] sm:$0xff] %v5874_v15 }
 0x436   :  { %8168 = vst [vmem:[#allocation27_spill] sm:$0xff] %v5649_v16  ;;  %1173 = vmatmul.mubr.f32.vlgmr.msra.gmra.mxu0 %v5649_v16  ;;  %1244 = vmatmul.mubr.f32.vlgmr.msra.gmra.mxu1 %v5649_v16  ;;  %v5880_v16 = vld [vmem:[%s7837_s2 + $0x18] sm:$0xff] }
 0x437   :  { %1279 = vmatpush1.msra.mxu0 %v5448_v1  ;;  %1350 = vmatpush1.msra.mxu1 %v5454_v38  ;;  %8185 = vst [vmem:[#allocation20_spill] sm:$0xff] %v5880_v16 }
 0x438   :  { %1280 = vmatprep.subr.mxu0 %v5460_v63  ;;  %1351 = vmatprep.subr.mxu1 %v5466_v51 }
 0x439   :  { %1281 = vmatpush1.msra.mxu0 %v5472_v58  ;;  %1352 = vmatpush1.msra.mxu1 %v5478_v29 }
 0x43a   :  { %1282 = vmatprep.subr.mxu0 %v5484_v3  ;;  %1353 = vmatprep.subr.mxu1 %v5490_v59 }
 0x43b   :  { %1283 = vmatpush1.msra.mxu0 %v5496_v57  ;;  %1354 = vmatpush1.msra.mxu1 %v5502_v56 }
 0x43c   :  { %1284 = vmatprep.subr.mxu0 %v5508_v55  ;;  %1355 = vmatprep.subr.mxu1 %v5514_v2 }
 0x43d   :  { %1285 = vmatpush1.msra.mxu0 %v5520_v20  ;;  %1356 = vmatpush1.msra.mxu1 %v5526_v60 }
 0x43e   :  { %1286 = vmatprep.subr.mxu0 %v5532_v0  ;;  %1357 = vmatprep.subr.mxu1 %v5538_v11 }
 0x43f   :  { %1287 = vmatpush1.msra.mxu0 %v5544_v47  ;;  %1358 = vmatpush1.msra.mxu1 %v5550_v27 }
 0x440   :  { %1288 = vmatprep.subr.mxu0 %v5556_v28  ;;  %1359 = vmatprep.subr.mxu1 %v5562_v30 }
 0x441   :  { %1289 = vmatpush1.msra.mxu0 %v8169_v17  ;;  %1360 = vmatpush1.msra.mxu1 %v8170_v18 }
 0x442   :  { %1290 = vmatprep.subr.mxu0 %v5580_v4  ;;  %1361 = vmatprep.subr.mxu1 %v5586_v61 }
 0x443   :  { %1291 = vmatpush1.msra.mxu0 %v5592_v32  ;;  %1362 = vmatpush1.msra.mxu1 %v5598_v33 }
 0x444   :  { %1292 = vmatprep.subr.mxu0 %v5682_v19  ;;  %1363 = vmatprep.subr.mxu1 %v5688_v21 }
 0x445   :  { %1293 = vmatpush1.msra.mxu0 %v5694_v22  ;;  %1364 = vmatpush1.msra.mxu1 %v5700_v24 }
 0x446   :  { %1294 = vmatprep.subr.mxu0 %v5706_v31  ;;  %1365 = vmatprep.subr.mxu1 %v5712_v34 }
 0x447   :  { %1295 = vmatpush1.msra.mxu0 %v5718_v35  ;;  %1366 = vmatpush1.msra.mxu1 %v5724_v36 }
 0x448   :  { %1296 = vmatprep.subr.mxu0 %v5730_v37  ;;  %1367 = vmatprep.subr.mxu1 %v5736_v39 }
 0x449   :  { %1297 = vmatpush1.msra.mxu0 %v5742_v40  ;;  %1368 = vmatpush1.msra.mxu1 %v5748_v41 }
 0x44a   :  { %1298 = vmatprep.subr.mxu0 %v5754_v42  ;;  %1369 = vmatprep.subr.mxu1 %v5760_v43 }
 0x44b   :  { %1299 = vmatpush1.msra.mxu0 %v5766_v44  ;;  %1370 = vmatpush1.msra.mxu1 %v5772_v45 }
 0x44c   :  { %1300 = vmatprep.subr.mxu0 %v5778_v46  ;;  %1371 = vmatprep.subr.mxu1 %v5784_v48 }
 0x44d   :  { %1301 = vmatpush1.msra.mxu0 %v5790_v49  ;;  %1372 = vmatpush1.msra.mxu1 %v5796_v50 }
 0x44e   :  { %1302 = vmatprep.subr.mxu0 %v5802_v54  ;;  %1373 = vmatprep.subr.mxu1 %v5808_v62  ;;  %v8191_v62 = vld [vmem:[#allocation38_spill] sm:$0xff] }
 0x44f   :  { %1303 = vmatpush1.msra.mxu0 %v5814_v53  ;;  %1374 = vmatpush1.msra.mxu1 %v5820_v52  ;;  %v8190_v53 = vld [vmem:[#allocation40_spill] sm:$0xff] }
 0x450   :  { %1304 = vmatprep.subr.mxu0 %v5826_v5  ;;  %1375 = vmatprep.subr.mxu1 %v5832_v6 }
 0x451   :  { %1305 = vmatpush1.msra.mxu0 %v5838_v7  ;;  %1376 = vmatpush1.msra.mxu1 %v5844_v8  ;;  %v8189_v8 = vld [vmem:[#allocation39_spill] sm:$0xff] }
 0x452   :  { %1306 = vmatprep.subr.mxu0 %v5850_v9  ;;  %1377 = vmatprep.subr.mxu1 %v5856_v10 }
 0x453   :  { %1307 = vmatpush1.msra.mxu0 %v5862_v12  ;;  %1378 = vmatpush1.msra.mxu1 %v5868_v14  ;;  %v5886_v12 = vld [vmem:[%s7837_s2] sm:$0xff]  ;;  %v8188_v14 = vld [vmem:[#allocation37_spill] sm:$0xff] }
 0x454   :  { %1308 = vmatprep.subr.mxu0 %v5874_v15  ;;  %1379 = vmatprep.subr.mxu1 %v5880_v16  ;;  %8186 = vst [vmem:[#allocation21_spill] sm:$0xff] %v5886_v12  ;;  %v5893_v15 = vld [vmem:[%s7837_s2 + $0x10] sm:$0xff] }
 0x455   :  { %1309 = vmatpush1.msra.mxu0 %v5886_v12  ;;  %1342 = vmatprep.mubr.f32.mxu0 %v8153_v23  ;;  %8187 = vst [vmem:[#allocation22_spill] sm:$0xff] %v5893_v15 }
 0x456   :  { %1380 = vmatpush1.msra.mxu1 %v5893_v15  ;;  %1413 = vmatprep.mubr.f32.mxu1 %v8153_v23 }
 0x457   :  { %1448 = vmatprep.subr.mxu0 %v5424_v25  ;;  %1519 = vmatprep.subr.mxu1 %v5430_v26 }
 0x4f6   :  { %v1174_v16 = vpop.f32.mrf.mxu0  ;;  %v1245_v6 = vpop.f32.mrf.mxu1 }
 0x4f7   :  { %v1250_v10 = vadd.f32 %v1174_v16, %v8188_v14  ;;  %v1252_v23 = vadd.f32 %v1245_v6, %v8191_v62  ;;  %v8198_v6 = vld [vmem:[#allocation11_spill] sm:$0xff] }
 0x4f8   :  { %v1176_v9 = vpop.f32.mrf.mxu0  ;;  %v1247_v52 = vpop.f32.mrf.mxu1 }
 0x4f9   :  { %v3826_v12 = vmul.f32 -1.442695, %v1250_v10  ;;  %v1251_v7 = vadd.f32 %v1176_v9, %v8189_v8  ;;  %v1253_v15 = vadd.f32 %v1247_v52, %v8190_v53  ;;  %v8197_v52 = vld [vmem:[#allocation10_spill] sm:$0xff] }
 0x4fb   :  { %4087 = vpow2.f32 %v3826_v12  ;;  %v3827_v5 = vmul.f32 -1.442695, %v1251_v7  ;;  %v3828_v54 = vmul.f32 -1.442695, %v1253_v15  ;;  %v8199_v15 = vld [vmem:[#allocation12_spill] sm:$0xff] }
 0x4fd   :  { %4089 = vpow2.f32 %v3827_v5 }
 0x4fe   :  { %4091 = vtanh.f32 %v1252_v23 }
 0x4ff   :  { %4093 = vpow2.f32 %v3828_v54  ;;  %v8196_v54 = vld [vmem:[#allocation9_spill] sm:$0xff] }
 0x508   :  { %v4088_v25 = vpop.eup %4087 }
 0x509   :  { %v1257_v50 = vadd.f32 1.0, %v4088_v25 }
 0x50a   :  { %v4090_v26 = vpop.eup %4089 }
 0x50b   :  { %4095 = vrcp.f32 %v1257_v50  ;;  %v1263_v16 = vadd.f32 1.0, %v4090_v26  ;;  %v4092_v10 = vpop.eup %4091  ;;  %v8193_v26 = vld [vmem:[#allocation28_spill] sm:$0xff] }
 0x50c   :  { %v4094_v8 = vpop.eup %4093  ;;  %v8195_v50 = vld [vmem:[#allocation8_spill] sm:$0xff] }
 0x50d   :  { %4097 = vrcp.f32 %v1263_v16  ;;  %v1270_v5 = vadd.f32 1.0, %v4094_v8  ;;  %v8200_v16 = vld [vmem:[#allocation13_spill] sm:$0xff]  ;;  %v8202_v8 = vld [vmem:[#allocation15_spill] sm:$0xff] }
 0x50f   :  { %4099 = vrcp.f32 %v1270_v5  ;;  %v8206_v5 = vld [vmem:[#allocation19_spill] sm:$0xff] }
 0x518   :  { %v4096_v9 = vpop.eup %4095 }
 0x519   :  { %v1274_v12 = vmul.f32 %v4096_v9, %v4092_v10  ;;  %v8201_v10 = vld [vmem:[#allocation14_spill] sm:$0xff]  ;;  %v8203_v9 = vld [vmem:[#allocation16_spill] sm:$0xff] }
 0x51a   :  { %v4098_v7 = vpop.eup %4097 }
 0x51b   :  { %v1273_v14 = vmul.f32 %v4098_v7, %v5646_v13  ;;  %v8194_v13 = vld [vmem:[#allocation26_spill] sm:$0xff] }
 0x51c   :  { %v4100_v25 = vpop.eup %4099  ;;  %v8205_v7 = vld [vmem:[#allocation18_spill] sm:$0xff] }
 0x51d   :  { %v5904_v53 = vadd.f32 %v1274_v12, %v1273_v14  ;;  %v8204_v12 = vld [vmem:[#allocation17_spill] sm:$0xff]  ;;  %v8207_v14 = vld [vmem:[#allocation20_spill] sm:$0xff] }
 0x51f   :  { %4101 = vtanh.f32 %v5904_v53 }
 0x52c   :  { %v4102_v23 = vpop.eup %4101 }
 0x52d   :  { %v5907_v62 = vmul.f32 %v4102_v23, %v4100_v25  ;;  %v8208_v25 = vld [vmem:[#allocation21_spill] sm:$0xff]  ;;  %v8209_v23 = vmov 0.0  }
 0x52f   :  { %8192 = vst [vmem:[#allocation23_spill] sm:$0xff] %v5907_v62  ;;  %1343 = vmatmul.mubr.f32.vlgmr.msra.gmra.mxu0 %v5907_v62  ;;  %1414 = vmatmul.mubr.f32.vlgmr.msra.gmra.mxu1 %v5907_v62  ;;  %v8210_v62 = vld [vmem:[#allocation22_spill] sm:$0xff] }
 0x530   :  { %1449 = vmatpush1.msra.mxu0 %v5448_v1  ;;  %1520 = vmatpush1.msra.mxu1 %v5454_v38 }
 0x531   :  { %1450 = vmatprep.subr.mxu0 %v5460_v63  ;;  %1521 = vmatprep.subr.mxu1 %v5466_v51 }
 0x532   :  { %1451 = vmatpush1.msra.mxu0 %v5472_v58  ;;  %1522 = vmatpush1.msra.mxu1 %v5478_v29 }
 0x533   :  { %1452 = vmatprep.subr.mxu0 %v5484_v3  ;;  %1523 = vmatprep.subr.mxu1 %v5490_v59 }
 0x534   :  { %1453 = vmatpush1.msra.mxu0 %v5496_v57  ;;  %1524 = vmatpush1.msra.mxu1 %v5502_v56 }
 0x535   :  { %1454 = vmatprep.subr.mxu0 %v5508_v55  ;;  %1525 = vmatprep.subr.mxu1 %v5514_v2 }
 0x536   :  { %1455 = vmatpush1.msra.mxu0 %v5520_v20  ;;  %1526 = vmatpush1.msra.mxu1 %v5526_v60 }
 0x537   :  { %1456 = vmatprep.subr.mxu0 %v5532_v0  ;;  %1527 = vmatprep.subr.mxu1 %v5538_v11 }
 0x538   :  { %1457 = vmatpush1.msra.mxu0 %v5544_v47  ;;  %1528 = vmatpush1.msra.mxu1 %v5550_v27 }
 0x539   :  { %1458 = vmatprep.subr.mxu0 %v5556_v28  ;;  %1529 = vmatprep.subr.mxu1 %v5562_v30 }
 0x53a   :  { %1459 = vmatpush1.msra.mxu0 %v8169_v17  ;;  %1530 = vmatpush1.msra.mxu1 %v8170_v18 }
 0x53b   :  { %1460 = vmatprep.subr.mxu0 %v5580_v4  ;;  %1531 = vmatprep.subr.mxu1 %v5586_v61 }
 0x53c   :  { %1461 = vmatpush1.msra.mxu0 %v5592_v32  ;;  %1532 = vmatpush1.msra.mxu1 %v5598_v33 }
 0x53d   :  { %1462 = vmatprep.subr.mxu0 %v5682_v19  ;;  %1533 = vmatprep.subr.mxu1 %v5688_v21 }
 0x53e   :  { %1463 = vmatpush1.msra.mxu0 %v5694_v22  ;;  %1534 = vmatpush1.msra.mxu1 %v5700_v24 }
 0x53f   :  { %1464 = vmatprep.subr.mxu0 %v5706_v31  ;;  %1535 = vmatprep.subr.mxu1 %v5712_v34 }
 0x540   :  { %1465 = vmatpush1.msra.mxu0 %v5718_v35  ;;  %1536 = vmatpush1.msra.mxu1 %v5724_v36 }
 0x541   :  { %1466 = vmatprep.subr.mxu0 %v5730_v37  ;;  %1537 = vmatprep.subr.mxu1 %v5736_v39 }
 0x542   :  { %1467 = vmatpush1.msra.mxu0 %v5742_v40  ;;  %1538 = vmatpush1.msra.mxu1 %v5748_v41 }
 0x543   :  { %1468 = vmatprep.subr.mxu0 %v5754_v42  ;;  %1539 = vmatprep.subr.mxu1 %v5760_v43 }
 0x544   :  { %1469 = vmatpush1.msra.mxu0 %v5766_v44  ;;  %1540 = vmatpush1.msra.mxu1 %v5772_v45 }
 0x545   :  { %1470 = vmatprep.subr.mxu0 %v5778_v46  ;;  %1541 = vmatprep.subr.mxu1 %v5784_v48 }
 0x546   :  { %1471 = vmatpush1.msra.mxu0 %v5790_v49  ;;  %1542 = vmatpush1.msra.mxu1 %v8193_v26 }
 0x547   :  { %1472 = vmatprep.subr.mxu0 %v8194_v13  ;;  %1543 = vmatprep.subr.mxu1 %v8195_v50  ;;  %v8216_v50 = vld [vmem:[#allocation42_spill] sm:$0xff] }
 0x548   :  { %1473 = vmatpush1.msra.mxu0 %v8196_v54  ;;  %1544 = vmatpush1.msra.mxu1 %v8197_v52  ;;  %v8215_v54 = vld [vmem:[#allocation44_spill] sm:$0xff] }
 0x549   :  { %1474 = vmatprep.subr.mxu0 %v8198_v6  ;;  %1545 = vmatprep.subr.mxu1 %v8199_v15 }
 0x54a   :  { %1475 = vmatpush1.msra.mxu0 %v8200_v16  ;;  %1546 = vmatpush1.msra.mxu1 %v8201_v10  ;;  %v8211_v10 = vld [vmem:[#allocation5_spill] sm:$0xff] }
 0x54b   :  { %1476 = vmatprep.subr.mxu0 %v8202_v8  ;;  %1547 = vmatprep.subr.mxu1 %v8203_v9  ;;  %v8212_v8 = vld [vmem:[#allocation6_spill] sm:$0xff] }
 0x54c   :  { %1477 = vmatpush1.msra.mxu0 %v8204_v12  ;;  %1548 = vmatpush1.msra.mxu1 %v8205_v7  ;;  %v8213_v12 = vld [vmem:[#allocation41_spill] sm:$0xff] }
 0x54d   :  { %1478 = vmatprep.subr.mxu0 %v8206_v5  ;;  %1549 = vmatprep.subr.mxu1 %v8207_v14  ;;  %v8214_v5 = vld [vmem:[#allocation43_spill] sm:$0xff] }
 0x54e   :  { %1479 = vmatpush1.msra.mxu0 %v8208_v25  ;;  %1512 = vmatprep.mubr.f32.mxu0 %v8209_v23 }
 0x54f   :  { %1550 = vmatpush1.msra.mxu1 %v8210_v62  ;;  %1583 = vmatprep.mubr.f32.mxu1 %v8209_v23 }
 0x550   :  { %1618 = vmatprep.subr.mxu0 %v8211_v10  ;;  %1689 = vmatprep.subr.mxu1 %v8212_v8 }
 0x5ef   :  { %v1344_v9 = vpop.f32.mrf.mxu0  ;;  %v1415_v14 = vpop.f32.mrf.mxu1 }
 0x5f0   :  { %v1420_v16 = vadd.f32 %v1344_v9, %v8213_v12  ;;  %v1422_v23 = vadd.f32 %v1415_v14, %v8216_v50 }
 0x5f1   :  { %v1346_v7 = vpop.f32.mrf.mxu0  ;;  %v1417_v52 = vpop.f32.mrf.mxu1 }
 0x5f2   :  { %v3829_v15 = vmul.f32 -1.442695, %v1420_v16  ;;  %v1421_v6 = vadd.f32 %v1346_v7, %v8214_v5  ;;  %v1423_v62 = vadd.f32 %v1417_v52, %v8215_v54 }
 0x5f4   :  { %4103 = vpow2.f32 %v3829_v15  ;;  %v3830_v25 = vmul.f32 -1.442695, %v1421_v6  ;;  %v3831_v13 = vmul.f32 -1.442695, %v1423_v62 }
 0x5f6   :  { %4105 = vpow2.f32 %v3830_v25 }
 0x5f7   :  { %4107 = vtanh.f32 %v1422_v23 }
 0x5f8   :  { %4109 = vpow2.f32 %v3831_v13 }
 0x601   :  { %v4104_v10 = vpop.eup %4103 }
 0x602   :  { %v1427_v26 = vadd.f32 1.0, %v4104_v10  ;;  %v1848_v10 = vld [vmem:[%s7839_s4 + $0x1e0] sm:$0xff] }
 0x603   :  { %v4106_v8 = vpop.eup %4105 }
 0x604   :  { %4111 = vrcp.f32 %v1427_v26  ;;  %v1433_v9 = vadd.f32 1.0, %v4106_v8  ;;  %v4108_v16 = vpop.eup %4107  ;;  %v1850_v8 = vld [vmem:[%s7839_s4 + $0x1f0] sm:$0xff] }
 0x605   :  { %v4110_v12 = vpop.eup %4109 }
 0x606   :  { %4113 = vrcp.f32 %v1433_v9  ;;  %v1440_v5 = vadd.f32 1.0, %v4110_v12  ;;  %v1845_v9 = vld [vmem:[%s7839_s4 + $0x1c8] sm:$0xff]  ;;  %v1844_v12 = vld [vmem:[%s7839_s4 + $0x1c0] sm:$0xff] }
 0x608   :  { %4115 = vrcp.f32 %v1440_v5  ;;  %v1840_v5 = vld [vmem:[%s7839_s4 + $0x1a0] sm:$0xff] }
 0x611   :  { %v4112_v15 = vpop.eup %4111 }
 0x612   :  { %v1444_v7 = vmul.f32 %v4112_v15, %v4108_v16  ;;  %v1847_v16 = vld [vmem:[%s7839_s4 + $0x1d8] sm:$0xff]  ;;  %v1846_v15 = vld [vmem:[%s7839_s4 + $0x1d0] sm:$0xff] }
 0x613   :  { %v4114_v6 = vpop.eup %4113 }
 0x614   :  { %v1443_v25 = vmul.f32 %v4114_v6, %v5904_v53  ;;  %v1843_v6 = vld [vmem:[%s7839_s4 + $0x1b8] sm:$0xff] }
 0x615   :  { %v4116_v62 = vpop.eup %4115 }
 0x616   :  { %v5982_v54 = vadd.f32 %v1444_v7, %v1443_v25  ;;  %v1841_v7 = vld [vmem:[%s7839_s4 + $0x1a8] sm:$0xff]  ;;  %v1842_v25 = vld [vmem:[%s7839_s4 + $0x1b0] sm:$0xff] }
 0x618   :  { %4117 = vtanh.f32 %v5982_v54 }
 0x625   :  { %v4118_v50 = vpop.eup %4117 }
 0x626   :  { %v5985_v52 = vmul.f32 %v4118_v50, %v4116_v62  ;;  %v1839_v62 = vld [vmem:[%s7839_s4 + $0x198] sm:$0xff]  ;;  %v1836_v50 = vld [vmem:[%s7839_s4 + $0x180] sm:$0xff] }
 0x628   :  { %1513 = vmatmul.mubr.f32.vlgmr.msra.gmra.mxu0 %v5985_v52  ;;  %1584 = vmatmul.mubr.f32.vlgmr.msra.gmra.mxu1 %v5985_v52 }
 0x629   :  { %1619 = vmatpush1.msra.mxu0 %v5448_v1  ;;  %1690 = vmatpush1.msra.mxu1 %v5454_v38  ;;  %v8219_v1 = vld [vmem:[#allocation8_spill] sm:$0xff]  ;;  %v8220_v38 = vld [vmem:[#allocation9_spill] sm:$0xff] }
 0x62a   :  { %1620 = vmatprep.subr.mxu0 %v5460_v63  ;;  %1691 = vmatprep.subr.mxu1 %v5466_v51  ;;  %v8221_v63 = vld [vmem:[#allocation10_spill] sm:$0xff]  ;;  %v8222_v51 = vld [vmem:[#allocation11_spill] sm:$0xff] }
 0x62b   :  { %1621 = vmatpush1.msra.mxu0 %v5472_v58  ;;  %1692 = vmatpush1.msra.mxu1 %v5478_v29  ;;  %v8223_v58 = vld [vmem:[#allocation12_spill] sm:$0xff]  ;;  %v8224_v29 = vld [vmem:[#allocation13_spill] sm:$0xff] }
 0x62c   :  { %1622 = vmatprep.subr.mxu0 %v5484_v3  ;;  %1693 = vmatprep.subr.mxu1 %v5490_v59  ;;  %v8225_v3 = vld [vmem:[#allocation14_spill] sm:$0xff]  ;;  %v8226_v59 = vld [vmem:[#allocation15_spill] sm:$0xff] }
 0x62d   :  { %1623 = vmatpush1.msra.mxu0 %v5496_v57  ;;  %1694 = vmatpush1.msra.mxu1 %v5502_v56  ;;  %v8227_v57 = vld [vmem:[#allocation16_spill] sm:$0xff]  ;;  %v8228_v56 = vld [vmem:[#allocation17_spill] sm:$0xff] }
 0x62e   :  { %1624 = vmatprep.subr.mxu0 %v5508_v55  ;;  %1695 = vmatprep.subr.mxu1 %v5514_v2  ;;  %v8229_v55 = vld [vmem:[#allocation18_spill] sm:$0xff]  ;;  %v8230_v2 = vld [vmem:[#allocation19_spill] sm:$0xff] }
 0x62f   :  { %1625 = vmatpush1.msra.mxu0 %v5520_v20  ;;  %1696 = vmatpush1.msra.mxu1 %v5526_v60  ;;  %v8231_v20 = vld [vmem:[#allocation20_spill] sm:$0xff]  ;;  %v8232_v60 = vld [vmem:[#allocation21_spill] sm:$0xff] }
 0x630   :  { %1626 = vmatprep.subr.mxu0 %v5532_v0  ;;  %1697 = vmatprep.subr.mxu1 %v5538_v11  ;;  %v8233_v0 = vld [vmem:[#allocation22_spill] sm:$0xff]  ;;  %v8234_v11 = vmov 0.0  }
 0x631   :  { %1627 = vmatpush1.msra.mxu0 %v5544_v47  ;;  %1698 = vmatpush1.msra.mxu1 %v5550_v27  ;;  %v1849_v47 = vld [vmem:[%s7839_s4 + $0x1e8] sm:$0xff]  ;;  %v1851_v27 = vld [vmem:[%s7839_s4 + $0x1f8] sm:$0xff] }
 0x632   :  { %1628 = vmatprep.subr.mxu0 %v5556_v28  ;;  %1699 = vmatprep.subr.mxu1 %v5562_v30  ;;  %v8235_v30 = vld [vmem:[#allocation45_spill] sm:$0xff] }
 0x633   :  { %1629 = vmatpush1.msra.mxu0 %v8169_v17  ;;  %1700 = vmatpush1.msra.mxu1 %v8170_v18  ;;  %v8236_v18 = vld [vmem:[#allocation47_spill] sm:$0xff] }
 0x634   :  { %1630 = vmatprep.subr.mxu0 %v5580_v4  ;;  %1701 = vmatprep.subr.mxu1 %v5586_v61  ;;  %v8217_v61 = vld [vmem:[#allocation28_spill] sm:$0xff]  ;;  %v8218_v4 = vld [vmem:[#allocation26_spill] sm:$0xff] }
 0x635   :  { %1631 = vmatpush1.msra.mxu0 %v5592_v32  ;;  %1702 = vmatpush1.msra.mxu1 %v5598_v33 }
 0x636   :  { %1632 = vmatprep.subr.mxu0 %v5682_v19  ;;  %1703 = vmatprep.subr.mxu1 %v5688_v21 }
 0x637   :  { %1633 = vmatpush1.msra.mxu0 %v5694_v22  ;;  %1704 = vmatpush1.msra.mxu1 %v5700_v24 }
 0x638   :  { %1634 = vmatprep.subr.mxu0 %v5706_v31  ;;  %1705 = vmatprep.subr.mxu1 %v5712_v34  ;;  %v8237_v31 = vld [vmem:[#allocation48_spill] sm:$0xff] }
 0x639   :  { %1635 = vmatpush1.msra.mxu0 %v5718_v35  ;;  %1706 = vmatpush1.msra.mxu1 %v5724_v36  ;;  %v8238_v35 = vld [vmem:[#allocation46_spill] sm:$0xff] }
 0x63a   :  { %1636 = vmatprep.subr.mxu0 %v5730_v37  ;;  %1707 = vmatprep.subr.mxu1 %v5736_v39 }
 0x63b   :  { %1637 = vmatpush1.msra.mxu0 %v5742_v40  ;;  %1708 = vmatpush1.msra.mxu1 %v5748_v41 }
 0x63c   :  { %1638 = vmatprep.subr.mxu0 %v5754_v42  ;;  %1709 = vmatprep.subr.mxu1 %v5760_v43 }
 0x63d   :  { %1639 = vmatpush1.msra.mxu0 %v5766_v44  ;;  %1710 = vmatpush1.msra.mxu1 %v5772_v45 }
 0x63e   :  { %1640 = vmatprep.subr.mxu0 %v5778_v46  ;;  %1711 = vmatprep.subr.mxu1 %v5784_v48 }
 0x63f   :  { %1641 = vmatpush1.msra.mxu0 %v5790_v49  ;;  %1712 = vmatpush1.msra.mxu1 %v8217_v61  ;;  %v1838_v61 = vld [vmem:[%s7839_s4 + $0x190] sm:$0xff] }
 0x640   :  { %1642 = vmatprep.subr.mxu0 %v8218_v4  ;;  %1713 = vmatprep.subr.mxu1 %v8219_v1  ;;  %v1833_v4 = vld [vmem:[%s7839_s4 + $0x168] sm:$0xff]  ;;  %v1835_v1 = vld [vmem:[%s7839_s4 + $0x178] sm:$0xff] }
 0x641   :  { %1643 = vmatpush1.msra.mxu0 %v8220_v38  ;;  %1714 = vmatpush1.msra.mxu1 %v8221_v63  ;;  %v1832_v38 = vld [vmem:[%s7839_s4 + $0x160] sm:$0xff]  ;;  %v1834_v63 = vld [vmem:[%s7839_s4 + $0x170] sm:$0xff] }
 0x642   :  { %1644 = vmatprep.subr.mxu0 %v8222_v51  ;;  %1715 = vmatprep.subr.mxu1 %v8223_v58  ;;  %v1829_v51 = vld [vmem:[%s7839_s4 + $0x148] sm:$0xff]  ;;  %v1831_v58 = vld [vmem:[%s7839_s4 + $0x158] sm:$0xff] }
 0x643   :  { %1645 = vmatpush1.msra.mxu0 %v8224_v29  ;;  %1716 = vmatpush1.msra.mxu1 %v8225_v3  ;;  %v1828_v29 = vld [vmem:[%s7839_s4 + $0x140] sm:$0xff]  ;;  %v1830_v3 = vld [vmem:[%s7839_s4 + $0x150] sm:$0xff] }
 0x644   :  { %1646 = vmatprep.subr.mxu0 %v8226_v59  ;;  %1717 = vmatprep.subr.mxu1 %v8227_v57  ;;  %v1825_v59 = vld [vmem:[%s7839_s4 + $0x128] sm:$0xff]  ;;  %v1827_v57 = vld [vmem:[%s7839_s4 + $0x138] sm:$0xff] }
 0x645   :  { %1647 = vmatpush1.msra.mxu0 %v8228_v56  ;;  %1718 = vmatpush1.msra.mxu1 %v8229_v55  ;;  %v1824_v56 = vld [vmem:[%s7839_s4 + $0x120] sm:$0xff]  ;;  %v1826_v55 = vld [vmem:[%s7839_s4 + $0x130] sm:$0xff] }
 0x646   :  { %1648 = vmatprep.subr.mxu0 %v8230_v2  ;;  %1719 = vmatprep.subr.mxu1 %v8231_v20  ;;  %v1821_v2 = vld [vmem:[%s7839_s4 + $0x108] sm:$0xff]  ;;  %v1823_v20 = vld [vmem:[%s7839_s4 + $0x118] sm:$0xff] }
 0x647   :  { %1649 = vmatpush1.msra.mxu0 %v8232_v60  ;;  %1720 = vmatpush1.msra.mxu1 %v8233_v0  ;;  %v1820_v60 = vld [vmem:[%s7839_s4 + $0x100] sm:$0xff]  ;;  %v1822_v0 = vld [vmem:[%s7839_s4 + $0x110] sm:$0xff] }
 0x648   :  { %1682 = vmatprep.mubr.f32.mxu0 %v8234_v11  ;;  %1753 = vmatprep.mubr.f32.mxu1 %v8234_v11 }
 0x649   :  { %1874 = vmatprep.subr.mxu0 %v1849_v47  ;;  %1987 = vmatprep.subr.mxu1 %v1851_v27  ;;  %v1817_v47 = vld [vmem:[%s7839_s4 + $0xe8] sm:$0xff]  ;;  %v1819_v27 = vld [vmem:[%s7839_s4 + $0xf8] sm:$0xff] }
 0x6e8   :  { %v1514_v28 = vpop.f32.mrf.mxu0  ;;  %v1585_v21 = vpop.f32.mrf.mxu1 }
 0x6e9   :  { %v1590_v32 = vadd.f32 %v1514_v28, %v8235_v30  ;;  %v1592_v36 = vadd.f32 %v1585_v21, %v8238_v35  ;;  %v1816_v28 = vld [vmem:[%s7839_s4 + $0xe0] sm:$0xff]  ;;  %v1818_v30 = vld [vmem:[%s7839_s4 + $0xf0] sm:$0xff]  ;;  %v1811_v21 = vld [vmem:[%s7839_s4 + $0xb8] sm:$0xff] }
 0x6ea   :  { %v1516_v33 = vpop.f32.mrf.mxu0  ;;  %v1587_v24 = vpop.f32.mrf.mxu1  ;;  %v1804_v35 = vld [vmem:[%s7839_s4 + $0x80] sm:$0xff] }
 0x6eb   :  { %v3832_v17 = vmul.f32 -1.442695, %v1590_v32  ;;  %v1591_v19 = vadd.f32 %v1516_v33, %v8236_v18  ;;  %v1593_v34 = vadd.f32 %v1587_v24, %v8237_v31  ;;  %v1813_v32 = vld [vmem:[%s7839_s4 + $0xc8] sm:$0xff]  ;;  %v1815_v33 = vld [vmem:[%s7839_s4 + $0xd8] sm:$0xff]  ;;  %v1814_v18 = vld [vmem:[%s7839_s4 + $0xd0] sm:$0xff] }
 0x6ec   :  { %v1810_v24 = vld [vmem:[%s7839_s4 + $0xb0] sm:$0xff]  ;;  %v1805_v31 = vld [vmem:[%s7839_s4 + $0x88] sm:$0xff] }
 0x6ed   :  { %4119 = vpow2.f32 %v3832_v17  ;;  %v3833_v22 = vmul.f32 -1.442695, %v1591_v19  ;;  %v3834_v37 = vmul.f32 -1.442695, %v1593_v34  ;;  %v1812_v17 = vld [vmem:[%s7839_s4 + $0xc0] sm:$0xff]  ;;  %v1809_v19 = vld [vmem:[%s7839_s4 + $0xa8] sm:$0xff] }
 0x6ee   :  { %v1807_v34 = vld [vmem:[%s7839_s4 + $0x98] sm:$0xff] }
 0x6ef   :  { %4121 = vpow2.f32 %v3833_v22  ;;  %v1808_v22 = vld [vmem:[%s7839_s4 + $0xa0] sm:$0xff] }
 0x6f0   :  { %4123 = vtanh.f32 %v1592_v36  ;;  %v1806_v36 = vld [vmem:[%s7839_s4 + $0x90] sm:$0xff] }
 0x6f1   :  { %4125 = vpow2.f32 %v3834_v37  ;;  %v1801_v37 = vld [vmem:[%s7839_s4 + $0x68] sm:$0xff] }
 0x6fa   :  { %v4120_v39 = vpop.eup %4119 }
 0x6fb   :  { %v1597_v40 = vadd.f32 1.0, %v4120_v39  ;;  %v1803_v39 = vld [vmem:[%s7839_s4 + $0x78] sm:$0xff] }
 0x6fc   :  { %v4122_v41 = vpop.eup %4121 }
 0x6fd   :  { %4127 = vrcp.f32 %v1597_v40  ;;  %v1603_v42 = vadd.f32 1.0, %v4122_v41  ;;  %v4124_v43 = vpop.eup %4123  ;;  %v1800_v40 = vld [vmem:[%s7839_s4 + $0x60] sm:$0xff]  ;;  %v1802_v41 = vld [vmem:[%s7839_s4 + $0x70] sm:$0xff] }
 0x6fe   :  { %v4126_v44 = vpop.eup %4125 }
 0x6ff   :  { %4129 = vrcp.f32 %v1603_v42  ;;  %v1610_v49 = vadd.f32 1.0, %v4126_v44  ;;  %v1797_v42 = vld [vmem:[%s7839_s4 + $0x48] sm:$0xff]  ;;  %v1796_v44 = vld [vmem:[%s7839_s4 + $0x40] sm:$0xff] }
 0x701   :  { %4131 = vrcp.f32 %v1610_v49  ;;  %v1792_v49 = vld [vmem:[%s7839_s4 + $0x20] sm:$0xff] }
 0x70a   :  { %v4128_v45 = vpop.eup %4127 }
 0x70b   :  { %v1614_v46 = vmul.f32 %v4128_v45, %v4124_v43  ;;  %v1799_v43 = vld [vmem:[%s7839_s4 + $0x58] sm:$0xff]  ;;  %v1798_v45 = vld [vmem:[%s7839_s4 + $0x50] sm:$0xff] }
 0x70c   :  { %v4130_v48 = vpop.eup %4129 }
 0x70d   :  { %v1613_v53 = vmul.f32 %v4130_v48, %v5982_v54  ;;  %v1837_v54 = vld [vmem:[%s7839_s4 + $0x188] sm:$0xff]  ;;  %v1795_v48 = vld [vmem:[%s7839_s4 + $0x38] sm:$0xff] }
 0x70e   :  { %v4132_v13 = vpop.eup %4131 }
 0x70f   :  { %v6064_v26 = vadd.f32 %v1614_v46, %v1613_v53  ;;  %v1793_v46 = vld [vmem:[%s7839_s4 + $0x28] sm:$0xff]  ;;  %v1794_v53 = vld [vmem:[%s7839_s4 + $0x30] sm:$0xff] }
 0x711   :  { %4133 = vtanh.f32 %v6064_v26 }
 0x71e   :  { %v4134_v14 = vpop.eup %4133 }
 0x71f   :  { %v6067_v23 = vmul.f32 %v4134_v14, %v4132_v13  ;;  %v1789_v13 = vld [vmem:[%s7839_s4 + $0x8] sm:$0xff]  ;;  %v1791_v14 = vld [vmem:[%s7839_s4 + $0x18] sm:$0xff] }
 0x721   :  { %1683 = vmatmul.mubr.f32.vlgmr.msra.gmra.mxu0 %v6067_v23  ;;  %1754 = vmatmul.mubr.f32.vlgmr.msra.gmra.mxu1 %v6067_v23 }
 0x722   :  { %1875 = vmatpush1.msra.mxu0 %v1848_v10  ;;  %1988 = vmatpush1.msra.mxu1 %v1850_v8  ;;  %v1788_v10 = vld [vmem:[%s7839_s4] sm:$0xff]  ;;  %v1790_v8 = vld [vmem:[%s7839_s4 + $0x10] sm:$0xff] }
 0x723   :  { %1876 = vmatprep.subr.mxu0 %v1845_v9  ;;  %1989 = vmatprep.subr.mxu1 %v1847_v16  ;;  %v8239_v9 = vld [vmem:[#allocation53_spill] sm:$0xff]  ;;  %v8240_v16 = vld [vmem:[#allocation4_spill] sm:$0xff] }
 0x724   :  { %1877 = vmatpush1.msra.mxu0 %v1844_v12  ;;  %1990 = vmatpush1.msra.mxu1 %v1846_v15  ;;  %v8241_v12 = vld [vmem:[#allocation7_spill] sm:$0xff] }
 0x725   :  { %1878 = vmatprep.subr.mxu0 %v1841_v7  ;;  %1991 = vmatprep.subr.mxu1 %v1843_v6  ;;  %v8242_v15 = vld [vmem:[#allocation27_spill] sm:$0xff] }
 0x726   :  { %1879 = vmatpush1.msra.mxu0 %v1840_v5  ;;  %1992 = vmatpush1.msra.mxu1 %v1842_v25  ;;  %v8243_v7 = vld [vmem:[#allocation23_spill] sm:$0xff]  ;;  %v6307_v5 = vld [vmem:[%s7840_s5 + $0x1f0] sm:$0xff] }
 0x727   :  { %1880 = vmatprep.subr.mxu0 %v1837_v54  ;;  %1993 = vmatprep.subr.mxu1 %v1839_v62  ;;  %v6290_v6 = vld [vmem:[%s7840_s5 + $0x1e8] sm:$0xff]  ;;  %v6319_v54 = vld [vmem:[%s7840_s5 + $0x1d8] sm:$0xff]  ;;  %v6326_v62 = vld [vmem:[%s7840_s5 + $0x1c0] sm:$0xff] }
 0x728   :  { %1881 = vmatpush1.msra.mxu0 %v1836_v50  ;;  %1994 = vmatpush1.msra.mxu1 %v1838_v61  ;;  %8244 = vst [vmem:[#allocation24_spill] sm:$0xff] %v6290_v6  ;;  %v6314_v25 = vld [vmem:[%s7840_s5 + $0x1c8] sm:$0xff]  ;;  %v6331_v50 = vld [vmem:[%s7840_s5 + $0x1d0] sm:$0xff] }
 0x729   :  { %1882 = vmatprep.subr.mxu0 %v1833_v4  ;;  %1995 = vmatprep.subr.mxu1 %v1835_v1  ;;  %v6338_v61 = vld [vmem:[%s7840_s5 + $0x1a8] sm:$0xff]  ;;  %v6343_v4 = vld [vmem:[%s7840_s5 + $0x1b8] sm:$0xff]  ;;  %v6350_v1 = vld [vmem:[%s7840_s5 + $0x1a0] sm:$0xff] }
 0x72a   :  { %1883 = vmatpush1.msra.mxu0 %v1832_v38  ;;  %1996 = vmatpush1.msra.mxu1 %v1834_v63  ;;  %v6355_v38 = vld [vmem:[%s7840_s5 + $0x1b0] sm:$0xff]  ;;  %v6362_v63 = vld [vmem:[%s7840_s5 + $0x188] sm:$0xff] }
 0x72b   :  { %1884 = vmatprep.subr.mxu0 %v1829_v51  ;;  %1997 = vmatprep.subr.mxu1 %v1831_v58  ;;  %v6367_v51 = vld [vmem:[%s7840_s5 + $0x198] sm:$0xff]  ;;  %v6374_v58 = vld [vmem:[%s7840_s5 + $0x180] sm:$0xff] }
 0x72c   :  { %1885 = vmatpush1.msra.mxu0 %v1828_v29  ;;  %1998 = vmatpush1.msra.mxu1 %v1830_v3  ;;  %v6379_v29 = vld [vmem:[%s7840_s5 + $0x190] sm:$0xff]  ;;  %v6386_v3 = vld [vmem:[%s7840_s5 + $0x168] sm:$0xff] }
 0x72d   :  { %1886 = vmatprep.subr.mxu0 %v1825_v59  ;;  %1999 = vmatprep.subr.mxu1 %v1827_v57  ;;  %v6391_v59 = vld [vmem:[%s7840_s5 + $0x178] sm:$0xff]  ;;  %v6398_v57 = vld [vmem:[%s7840_s5 + $0x160] sm:$0xff] }
 0x72e   :  { %1887 = vmatpush1.msra.mxu0 %v1824_v56  ;;  %2000 = vmatpush1.msra.mxu1 %v1826_v55  ;;  %v6403_v56 = vld [vmem:[%s7840_s5 + $0x170] sm:$0xff]  ;;  %v6410_v55 = vld [vmem:[%s7840_s5 + $0x148] sm:$0xff] }
 0x72f   :  { %1888 = vmatprep.subr.mxu0 %v1821_v2  ;;  %2001 = vmatprep.subr.mxu1 %v1823_v20  ;;  %v6415_v2 = vld [vmem:[%s7840_s5 + $0x158] sm:$0xff]  ;;  %v6422_v20 = vld [vmem:[%s7840_s5 + $0x140] sm:$0xff] }
 0x730   :  { %1889 = vmatpush1.msra.mxu0 %v1820_v60  ;;  %2002 = vmatpush1.msra.mxu1 %v1822_v0  ;;  %v6427_v60 = vld [vmem:[%s7840_s5 + $0x150] sm:$0xff]  ;;  %v6434_v0 = vld [vmem:[%s7840_s5 + $0x128] sm:$0xff] }
 0x731   :  { %1890 = vmatprep.subr.mxu0 %v1817_v47  ;;  %2003 = vmatprep.subr.mxu1 %v1819_v27  ;;  %v6439_v47 = vld [vmem:[%s7840_s5 + $0x138] sm:$0xff]  ;;  %v6446_v27 = vld [vmem:[%s7840_s5 + $0x120] sm:$0xff] }
 0x732   :  { %1891 = vmatpush1.msra.mxu0 %v1816_v28  ;;  %2004 = vmatpush1.msra.mxu1 %v1818_v30  ;;  %v6451_v28 = vld [vmem:[%s7840_s5 + $0x130] sm:$0xff]  ;;  %v6458_v30 = vld [vmem:[%s7840_s5 + $0x108] sm:$0xff] }
 0x733   :  { %1892 = vmatprep.subr.mxu0 %v1813_v32  ;;  %2005 = vmatprep.subr.mxu1 %v1815_v33  ;;  %v6463_v32 = vld [vmem:[%s7840_s5 + $0x118] sm:$0xff]  ;;  %v6470_v33 = vld [vmem:[%s7840_s5 + $0x100] sm:$0xff] }
 0x734   :  { %1893 = vmatpush1.msra.mxu0 %v1812_v17  ;;  %2006 = vmatpush1.msra.mxu1 %v1814_v18  ;;  %v6475_v17 = vld [vmem:[%s7840_s5 + $0x110] sm:$0xff]  ;;  %v6482_v18 = vld [vmem:[%s7840_s5 + $0xe8] sm:$0xff] }
 0x735   :  { %1894 = vmatprep.subr.mxu0 %v1809_v19  ;;  %2007 = vmatprep.subr.mxu1 %v1811_v21  ;;  %v6487_v19 = vld [vmem:[%s7840_s5 + $0xf8] sm:$0xff]  ;;  %v6494_v21 = vld [vmem:[%s7840_s5 + $0xe0] sm:$0xff] }
 0x736   :  { %1895 = vmatpush1.msra.mxu0 %v1808_v22  ;;  %2008 = vmatpush1.msra.mxu1 %v1810_v24  ;;  %v6499_v22 = vld [vmem:[%s7840_s5 + $0xf0] sm:$0xff]  ;;  %v6506_v24 = vld [vmem:[%s7840_s5 + $0xc8] sm:$0xff] }
 0x737   :  { %1896 = vmatprep.subr.mxu0 %v1805_v31  ;;  %2009 = vmatprep.subr.mxu1 %v1807_v34  ;;  %v6511_v31 = vld [vmem:[%s7840_s5 + $0xd8] sm:$0xff]  ;;  %v6518_v34 = vld [vmem:[%s7840_s5 + $0xc0] sm:$0xff] }
 0x738   :  { %1897 = vmatpush1.msra.mxu0 %v1804_v35  ;;  %2010 = vmatpush1.msra.mxu1 %v1806_v36  ;;  %v6523_v35 = vld [vmem:[%s7840_s5 + $0xd0] sm:$0xff]  ;;  %v6530_v36 = vld [vmem:[%s7840_s5 + $0xa8] sm:$0xff] }
 0x739   :  { %1898 = vmatprep.subr.mxu0 %v1801_v37  ;;  %2011 = vmatprep.subr.mxu1 %v1803_v39  ;;  %v6535_v37 = vld [vmem:[%s7840_s5 + $0xb8] sm:$0xff]  ;;  %v6542_v39 = vld [vmem:[%s7840_s5 + $0xa0] sm:$0xff] }
 0x73a   :  { %1899 = vmatpush1.msra.mxu0 %v1800_v40  ;;  %2012 = vmatpush1.msra.mxu1 %v1802_v41  ;;  %v6547_v40 = vld [vmem:[%s7840_s5 + $0xb0] sm:$0xff]  ;;  %v6554_v41 = vld [vmem:[%s7840_s5 + $0x88] sm:$0xff] }
 0x73b   :  { %1900 = vmatprep.subr.mxu0 %v1797_v42  ;;  %2013 = vmatprep.subr.mxu1 %v1799_v43  ;;  %8246 = vst [vmem:[#allocation31_spill] sm:$0xff] %v6547_v40  ;;  %8247 = vst [vmem:[#allocation32_spill] sm:$0xff] %v6554_v41  ;;  %v6559_v42 = vld [vmem:[%s7840_s5 + $0x98] sm:$0xff]  ;;  %v6566_v43 = vld [vmem:[%s7840_s5 + $0x80] sm:$0xff] }
 0x73c   :  { %1901 = vmatpush1.msra.mxu0 %v1796_v44  ;;  %2014 = vmatpush1.msra.mxu1 %v1798_v45  ;;  %8248 = vst [vmem:[#allocation30_spill] sm:$0xff] %v6559_v42  ;;  %8249 = vst [vmem:[#allocation33_spill] sm:$0xff] %v6566_v43  ;;  %v6571_v44 = vld [vmem:[%s7840_s5 + $0x90] sm:$0xff]  ;;  %v6578_v45 = vld [vmem:[%s7840_s5 + $0x68] sm:$0xff] }
 0x73d   :  { %1902 = vmatprep.subr.mxu0 %v1793_v46  ;;  %2015 = vmatprep.subr.mxu1 %v1795_v48  ;;  %8250 = vst [vmem:[#allocation35_spill] sm:$0xff] %v6571_v44  ;;  %8251 = vst [vmem:[#allocation36_spill] sm:$0xff] %v6578_v45  ;;  %v6583_v46 = vld [vmem:[%s7840_s5 + $0x78] sm:$0xff]  ;;  %v6590_v48 = vld [vmem:[%s7840_s5 + $0x60] sm:$0xff] }
 0x73e   :  { %1903 = vmatpush1.msra.mxu0 %v1792_v49  ;;  %2016 = vmatpush1.msra.mxu1 %v1794_v53  ;;  %8252 = vst [vmem:[#allocation34_spill] sm:$0xff] %v6583_v46  ;;  %8253 = vst [vmem:[#allocation2_spill] sm:$0xff] %v6590_v48  ;;  %v6595_v49 = vld [vmem:[%s7840_s5 + $0x70] sm:$0xff]  ;;  %v6602_v53 = vld [vmem:[%s7840_s5 + $0x48] sm:$0xff] }
 0x73f   :  { %1904 = vmatprep.subr.mxu0 %v1789_v13  ;;  %2017 = vmatprep.subr.mxu1 %v1791_v14  ;;  %8254 = vst [vmem:[#allocation3_spill] sm:$0xff] %v6595_v49  ;;  %8255 = vst [vmem:[#allocation37_spill] sm:$0xff] %v6602_v53  ;;  %v6607_v13 = vld [vmem:[%s7840_s5 + $0x58] sm:$0xff]  ;;  %v6614_v14 = vld [vmem:[%s7840_s5 + $0x40] sm:$0xff] }
 0x740   :  { %1905 = vmatpush1.msra.mxu0 %v1788_v10  ;;  %1938 = vmatprep.mubr.f32.mxu0 %v8234_v11  ;;  %8256 = vst [vmem:[#allocation39_spill] sm:$0xff] %v6607_v13  ;;  %8257 = vst [vmem:[#allocation40_spill] sm:$0xff] %v6614_v14  ;;  %v6619_v10 = vld [vmem:[%s7840_s5 + $0x50] sm:$0xff] }
 0x741   :  { %2018 = vmatpush1.msra.mxu1 %v1790_v8  ;;  %2051 = vmatprep.mubr.f32.mxu1 %v8234_v11  ;;  %8258 = vst [vmem:[#allocation38_spill] sm:$0xff] %v6619_v10  ;;  %v6626_v8 = vld [vmem:[%s7840_s5 + $0x28] sm:$0xff] }
 0x742   :  { %1939 = vmatmul.mubr.f32.vlgmr.msra.gmra.mxu0 %v8239_v9  ;;  %2052 = vmatmul.mubr.f32.vlgmr.msra.gmra.mxu1 %v8239_v9  ;;  %8259 = vst [vmem:[#allocation5_spill] sm:$0xff] %v6626_v8  ;;  %v6631_v9 = vld [vmem:[%s7840_s5 + $0x38] sm:$0xff] }
 0x743   :  { %1944 = vmatprep.mubr.f32.mxu0 %v8234_v11  ;;  %2057 = vmatprep.mubr.f32.mxu1 %v8234_v11  ;;  %8260 = vst [vmem:[#allocation6_spill] sm:$0xff] %v6631_v9 }
 0x744   :  { %2164 = vmatprep.subr.mxu0 %v6290_v6 }
 0x746   :  { %1945 = vmatmul.mubr.f32.gmra.mxu0 %v8240_v16  ;;  %2058 = vmatmul.mubr.f32.gmra.mxu1 %v8240_v16  ;;  %v6638_v16 = vld [vmem:[%s7840_s5 + $0x20] sm:$0xff] }
 0x747   :  { %1950 = vmatprep.mubr.f32.mxu0 %v8234_v11  ;;  %2063 = vmatprep.mubr.f32.mxu1 %v8234_v11  ;;  %8261 = vst [vmem:[#allocation41_spill] sm:$0xff] %v6638_v16 }
 0x74a   :  { %1951 = vmatmul.mubr.f32.gmra.mxu0 %v8241_v12  ;;  %2064 = vmatmul.mubr.f32.gmra.mxu1 %v8241_v12  ;;  %v6643_v12 = vld [vmem:[%s7840_s5 + $0x30] sm:$0xff] }
 0x74b   :  { %1956 = vmatprep.mubr.f32.mxu0 %v8234_v11  ;;  %2069 = vmatprep.mubr.f32.mxu1 %v8234_v11  ;;  %8262 = vst [vmem:[#allocation43_spill] sm:$0xff] %v6643_v12 }
 0x74e   :  { %1957 = vmatmul.mubr.f32.gmra.mxu0 %v8242_v15  ;;  %2070 = vmatmul.mubr.f32.gmra.mxu1 %v8242_v15  ;;  %v6650_v15 = vld [vmem:[%s7840_s5 + $0x8] sm:$0xff] }
 0x74f   :  { %1962 = vmatprep.mubr.f32.mxu0 %v8234_v11  ;;  %2075 = vmatprep.mubr.f32.mxu1 %v8234_v11  ;;  %8263 = vst [vmem:[#allocation44_spill] sm:$0xff] %v6650_v15 }
 0x752   :  { %1963 = vmatmul.mubr.f32.gmra.mxu0 %v8243_v7  ;;  %2076 = vmatmul.mubr.f32.gmra.mxu1 %v8243_v7  ;;  %v6655_v7 = vld [vmem:[%s7840_s5 + $0x18] sm:$0xff] }
 0x753   :  { %1968 = vmatprep.mubr.f32.mxu0 %v8234_v11  ;;  %2081 = vmatprep.mubr.f32.mxu1 %v8234_v11  ;;  %8264 = vst [vmem:[#allocation42_spill] sm:$0xff] %v6655_v7 }
 0x756   :  { %1969 = vmatmul.mubr.f32.gmra.mxu0 %v5985_v52  ;;  %2082 = vmatmul.mubr.f32.gmra.mxu1 %v5985_v52  ;;  %v6295_v52 = vld [vmem:[%s7840_s5 + $0x1f8] sm:$0xff] }
 0x757   :  { %1974 = vmatprep.mubr.f32.mxu0 %v8234_v11  ;;  %2087 = vmatprep.mubr.f32.mxu1 %v8234_v11  ;;  %8245 = vst [vmem:[#allocation29_spill] sm:$0xff] %v6295_v52 }
 0x758   :  { %2235 = vmatprep.subr.mxu1 %v6295_v52 }
 0x759   :  { %2236 = vmatpush1.msra.mxu1 %v6307_v5 }
 0x75a   :  { %1975 = vmatmul.mubr.f32.gmra.mxu0 %v6067_v23  ;;  %2088 = vmatmul.mubr.f32.gmra.mxu1 %v6067_v23  ;;  %v6302_v23 = vld [vmem:[%s7840_s5 + $0x1e0] sm:$0xff] }
 0x75b   :  { %1980 = vmatprep.mubr.f32.mxu0 %v8234_v11  ;;  %2093 = vmatprep.mubr.f32.mxu1 %v8234_v11 }
 0x75c   :  { %2165 = vmatpush1.msra.mxu0 %v6302_v23  ;;  %2237 = vmatprep.subr.mxu1 %v6319_v54 }
 0x75d   :  { %2166 = vmatprep.subr.mxu0 %v6314_v25  ;;  %2238 = vmatpush1.msra.mxu1 %v6331_v50 }
 0x75e   :  { %2167 = vmatpush1.msra.mxu0 %v6326_v62  ;;  %2239 = vmatprep.subr.mxu1 %v6343_v4 }
 0x75f   :  { %2168 = vmatprep.subr.mxu0 %v6338_v61  ;;  %2240 = vmatpush1.msra.mxu1 %v6355_v38 }
 0x760   :  { %2169 = vmatpush1.msra.mxu0 %v6350_v1  ;;  %2241 = vmatprep.subr.mxu1 %v6367_v51 }
 0x761   :  { %2170 = vmatprep.subr.mxu0 %v6362_v63  ;;  %2242 = vmatpush1.msra.mxu1 %v6379_v29 }
 0x762   :  { %2171 = vmatpush1.msra.mxu0 %v6374_v58  ;;  %2243 = vmatprep.subr.mxu1 %v6391_v59 }
 0x763   :  { %2172 = vmatprep.subr.mxu0 %v6386_v3  ;;  %2244 = vmatpush1.msra.mxu1 %v6403_v56 }
 0x764   :  { %2173 = vmatpush1.msra.mxu0 %v6398_v57  ;;  %2245 = vmatprep.subr.mxu1 %v6415_v2 }
 0x765   :  { %2174 = vmatprep.subr.mxu0 %v6410_v55  ;;  %2246 = vmatpush1.msra.mxu1 %v6427_v60 }
 0x766   :  { %2175 = vmatpush1.msra.mxu0 %v6422_v20  ;;  %2247 = vmatprep.subr.mxu1 %v6439_v47 }
 0x767   :  { %2176 = vmatprep.subr.mxu0 %v6434_v0  ;;  %2248 = vmatpush1.msra.mxu1 %v6451_v28 }
 0x768   :  { %2177 = vmatpush1.msra.mxu0 %v6446_v27  ;;  %2249 = vmatprep.subr.mxu1 %v6463_v32 }
 0x769   :  { %2178 = vmatprep.subr.mxu0 %v6458_v30  ;;  %2250 = vmatpush1.msra.mxu1 %v6475_v17 }
 0x76a   :  { %2179 = vmatpush1.msra.mxu0 %v6470_v33  ;;  %2251 = vmatprep.subr.mxu1 %v6487_v19 }
 0x76b   :  { %2180 = vmatprep.subr.mxu0 %v6482_v18  ;;  %2252 = vmatpush1.msra.mxu1 %v6499_v22 }
 0x76c   :  { %2181 = vmatpush1.msra.mxu0 %v6494_v21  ;;  %2253 = vmatprep.subr.mxu1 %v6511_v31 }
 0x76d   :  { %2182 = vmatprep.subr.mxu0 %v6506_v24  ;;  %2254 = vmatpush1.msra.mxu1 %v6523_v35 }
 0x76e   :  { %2183 = vmatpush1.msra.mxu0 %v6518_v34  ;;  %2255 = vmatprep.subr.mxu1 %v6535_v37 }
 0x76f   :  { %2184 = vmatprep.subr.mxu0 %v6530_v36  ;;  %2256 = vmatpush1.msra.mxu1 %v6547_v40 }
 0x770   :  { %2185 = vmatpush1.msra.mxu0 %v6542_v39  ;;  %2257 = vmatprep.subr.mxu1 %v6559_v42 }
 0x771   :  { %2186 = vmatprep.subr.mxu0 %v6554_v41  ;;  %2258 = vmatpush1.msra.mxu1 %v6571_v44 }
 0x772   :  { %2187 = vmatpush1.msra.mxu0 %v6566_v43  ;;  %2259 = vmatprep.subr.mxu1 %v6583_v46  ;;  %v8269_v46 = vld [vmem:[#allocation52_spill] sm:$0xff] }
 0x773   :  { %2188 = vmatprep.subr.mxu0 %v6578_v45  ;;  %2260 = vmatpush1.msra.mxu1 %v6595_v49  ;;  %v8270_v45 = vld [vmem:[#allocation50_spill] sm:$0xff] }
 0x774   :  { %2189 = vmatpush1.msra.mxu0 %v6590_v48  ;;  %2261 = vmatprep.subr.mxu1 %v6607_v13  ;;  %v8268_v13 = vld [vmem:[#allocation51_spill] sm:$0xff] }
 0x775   :  { %2190 = vmatprep.subr.mxu0 %v6602_v53  ;;  %2262 = vmatpush1.msra.mxu1 %v6619_v10 }
 0x776   :  { %2191 = vmatpush1.msra.mxu0 %v6614_v14  ;;  %2263 = vmatprep.subr.mxu1 %v6631_v9  ;;  %v6660_v9 = vld [vmem:[%s7840_s5] sm:$0xff] }
 0x777   :  { %2192 = vmatprep.subr.mxu0 %v6626_v8  ;;  %2264 = vmatpush1.msra.mxu1 %v6643_v12  ;;  %8265 = vst [vmem:[#allocation28_spill] sm:$0xff] %v6660_v9  ;;  %v6667_v12 = vld [vmem:[%s7840_s5 + $0x10] sm:$0xff]  ;;  %v8267_v8 = vld [vmem:[#allocation49_spill] sm:$0xff] }
 0x778   :  { %2193 = vmatpush1.msra.mxu0 %v6638_v16  ;;  %2265 = vmatprep.subr.mxu1 %v6655_v7  ;;  %8266 = vst [vmem:[#allocation26_spill] sm:$0xff] %v6667_v12 }
 0x779   :  { %2194 = vmatprep.subr.mxu0 %v6650_v15  ;;  %2266 = vmatpush1.msra.mxu1 %v6667_v12 }
 0x77a   :  { %2195 = vmatpush1.msra.mxu0 %v6660_v9  ;;  %2405 = vmatprep.subr.mxu1 %v6295_v52 }
 0x77b   :  { %2334 = vmatprep.subr.mxu0 %v6290_v6 }
 0x7e1   :  { %v1684_v16 = vpop.f32.mrf.mxu0  ;;  %v1755_v53 = vpop.f32.mrf.mxu1 }
 0x7e2   :  { %v1760_v10 = vadd.f32 %v1684_v16, %v8267_v8  ;;  %v1762_v12 = vadd.f32 %v1755_v53, %v8270_v45  ;;  %v8275_v53 = vld [vmem:[#allocation2_spill] sm:$0xff] }
 0x7e3   :  { %v1686_v14 = vpop.f32.mrf.mxu0  ;;  %v1757_v48 = vpop.f32.mrf.mxu1 }
 0x7e4   :  { %v3835_v15 = vmul.f32 -1.442695, %v1760_v10  ;;  %v1761_v7 = vadd.f32 %v1686_v14, %v8268_v13  ;;  %v1763_v9 = vadd.f32 %v1757_v48, %v8269_v46 }
 0x7e6   :  { %4135 = vpow2.f32 %v3835_v15  ;;  %v3836_v49 = vmul.f32 -1.442695, %v1761_v7  ;;  %v3837_v44 = vmul.f32 -1.442695, %v1763_v9  ;;  %v8276_v9 = vld [vmem:[#allocation3_spill] sm:$0xff] }
 0x7e8   :  { %4137 = vpow2.f32 %v3836_v49 }
 0x7e9   :  { %4139 = vtanh.f32 %v1762_v12  ;;  %v8277_v12 = vld [vmem:[#allocation37_spill] sm:$0xff] }
 0x7ea   :  { %4141 = vpow2.f32 %v3837_v44  ;;  %v8274_v44 = vld [vmem:[#allocation34_spill] sm:$0xff] }
 0x7f3   :  { %v4136_v6 = vpop.eup %4135 }
 0x7f4   :  { %v1767_v43 = vadd.f32 1.0, %v4136_v6 }
 0x7f5   :  { %v4138_v52 = vpop.eup %4137 }
 0x7f6   :  { %4143 = vrcp.f32 %v1767_v43  ;;  %v1773_v8 = vadd.f32 1.0, %v4138_v52  ;;  %v4140_v10 = vpop.eup %4139  ;;  %v8272_v52 = vld [vmem:[#allocation35_spill] sm:$0xff]  ;;  %v8273_v43 = vld [vmem:[#allocation36_spill] sm:$0xff] }
 0x7f7   :  { %v4142_v13 = vpop.eup %4141 }
 0x7f8   :  { %4145 = vrcp.f32 %v1773_v8  ;;  %v1780_v49 = vadd.f32 1.0, %v4142_v13  ;;  %v8278_v8 = vld [vmem:[#allocation39_spill] sm:$0xff]  ;;  %v8280_v13 = vld [vmem:[#allocation38_spill] sm:$0xff] }
 0x7fa   :  { %4147 = vrcp.f32 %v1780_v49  ;;  %v8284_v49 = vld [vmem:[#allocation43_spill] sm:$0xff] }
 0x803   :  { %v4144_v14 = vpop.eup %4143 }
 0x804   :  { %v1784_v16 = vmul.f32 %v4144_v14, %v4140_v10  ;;  %v8279_v10 = vld [vmem:[#allocation40_spill] sm:$0xff]  ;;  %v8281_v14 = vld [vmem:[#allocation5_spill] sm:$0xff] }
 0x805   :  { %v4146_v15 = vpop.eup %4145 }
 0x806   :  { %v1783_v7 = vmul.f32 %v4146_v15, %v6064_v26  ;;  %v8271_v26 = vld [vmem:[#allocation33_spill] sm:$0xff] }
 0x807   :  { %v4148_v45 = vpop.eup %4147  ;;  %v8283_v15 = vld [vmem:[#allocation41_spill] sm:$0xff] }
 0x808   :  { %v1785_v46 = vadd.f32 %v1784_v16, %v1783_v7  ;;  %v8282_v16 = vld [vmem:[#allocation6_spill] sm:$0xff]  ;;  %v8285_v7 = vld [vmem:[#allocation44_spill] sm:$0xff] }
 0x80a   :  { %4149 = vtanh.f32 %v1785_v46  ;;  %v8286_v46 = vld [vmem:[#allocation42_spill] sm:$0xff] }
 0x817   :  { %v4150_v48 = vpop.eup %4149 }
 0x818   :  { %v1787_v6 = vmul.f32 %v4150_v48, %v4148_v45  ;;  %v8287_v45 = vld [vmem:[#allocation28_spill] sm:$0xff]  ;;  %v8288_v48 = vld [vmem:[#allocation26_spill] sm:$0xff] }
 0x81a   :  { %1981 = vmatmul.mubr.f32.gmra.mxu0 %v1787_v6  ;;  %2094 = vmatmul.mubr.f32.gmra.mxu1 %v1787_v6  ;;  %v8289_v6 = vld [vmem:[#allocation24_spill] sm:$0xff] }
 0x81b   :  { %2228 = vmatprep.mubr.f32.mxu0 %v8234_v11  ;;  %2299 = vmatprep.mubr.f32.mxu1 %v8234_v11 }
 0x81e   :  { %2229 = vmatmul.mubr.f32.vlgmr.msra.gmra.mxu0 %v8234_v11  ;;  %2300 = vmatmul.mubr.f32.vlgmr.msra.gmra.mxu1 %v8234_v11 }
 0x81f   :  { %2335 = vmatpush1.msra.mxu0 %v6302_v23  ;;  %2406 = vmatpush1.msra.mxu1 %v6307_v5 }
 0x820   :  { %2336 = vmatprep.subr.mxu0 %v6314_v25  ;;  %2407 = vmatprep.subr.mxu1 %v6319_v54 }
 0x821   :  { %2337 = vmatpush1.msra.mxu0 %v6326_v62  ;;  %2408 = vmatpush1.msra.mxu1 %v6331_v50 }
 0x822   :  { %2338 = vmatprep.subr.mxu0 %v6338_v61  ;;  %2409 = vmatprep.subr.mxu1 %v6343_v4 }
 0x823   :  { %2339 = vmatpush1.msra.mxu0 %v6350_v1  ;;  %2410 = vmatpush1.msra.mxu1 %v6355_v38 }
 0x824   :  { %2340 = vmatprep.subr.mxu0 %v6362_v63  ;;  %2411 = vmatprep.subr.mxu1 %v6367_v51 }
 0x825   :  { %2341 = vmatpush1.msra.mxu0 %v6374_v58  ;;  %2412 = vmatpush1.msra.mxu1 %v6379_v29 }
 0x826   :  { %2342 = vmatprep.subr.mxu0 %v6386_v3  ;;  %2413 = vmatprep.subr.mxu1 %v6391_v59 }
 0x827   :  { %2343 = vmatpush1.msra.mxu0 %v6398_v57  ;;  %2414 = vmatpush1.msra.mxu1 %v6403_v56 }
 0x828   :  { %2344 = vmatprep.subr.mxu0 %v6410_v55  ;;  %2415 = vmatprep.subr.mxu1 %v6415_v2 }
 0x829   :  { %2345 = vmatpush1.msra.mxu0 %v6422_v20  ;;  %2416 = vmatpush1.msra.mxu1 %v6427_v60 }
 0x82a   :  { %2346 = vmatprep.subr.mxu0 %v6434_v0  ;;  %2417 = vmatprep.subr.mxu1 %v6439_v47 }
 0x82b   :  { %2347 = vmatpush1.msra.mxu0 %v6446_v27  ;;  %2418 = vmatpush1.msra.mxu1 %v6451_v28 }
 0x82c   :  { %2348 = vmatprep.subr.mxu0 %v6458_v30  ;;  %2419 = vmatprep.subr.mxu1 %v6463_v32 }
 0x82d   :  { %2349 = vmatpush1.msra.mxu0 %v6470_v33  ;;  %2420 = vmatpush1.msra.mxu1 %v6475_v17 }
 0x82e   :  { %2350 = vmatprep.subr.mxu0 %v6482_v18  ;;  %2421 = vmatprep.subr.mxu1 %v6487_v19 }
 0x82f   :  { %2351 = vmatpush1.msra.mxu0 %v6494_v21  ;;  %2422 = vmatpush1.msra.mxu1 %v6499_v22 }
 0x830   :  { %2352 = vmatprep.subr.mxu0 %v6506_v24  ;;  %2423 = vmatprep.subr.mxu1 %v6511_v31 }
 0x831   :  { %2353 = vmatpush1.msra.mxu0 %v6518_v34  ;;  %2424 = vmatpush1.msra.mxu1 %v6523_v35 }
 0x832   :  { %2354 = vmatprep.subr.mxu0 %v6530_v36  ;;  %2425 = vmatprep.subr.mxu1 %v6535_v37 }
 0x833   :  { %2355 = vmatpush1.msra.mxu0 %v6542_v39  ;;  %2426 = vmatpush1.msra.mxu1 %v6547_v40 }
 0x834   :  { %2356 = vmatprep.subr.mxu0 %v6554_v41  ;;  %2427 = vmatprep.subr.mxu1 %v6559_v42 }
 0x835   :  { %2357 = vmatpush1.msra.mxu0 %v8271_v26  ;;  %2428 = vmatpush1.msra.mxu1 %v8272_v52 }
 0x836   :  { %2358 = vmatprep.subr.mxu0 %v8273_v43  ;;  %2429 = vmatprep.subr.mxu1 %v8274_v44 }
 0x837   :  { %2359 = vmatpush1.msra.mxu0 %v8275_v53  ;;  %2430 = vmatpush1.msra.mxu1 %v8276_v9 }
 0x838   :  { %2360 = vmatprep.subr.mxu0 %v8277_v12  ;;  %2431 = vmatprep.subr.mxu1 %v8278_v8 }
 0x839   :  { %2361 = vmatpush1.msra.mxu0 %v8279_v10  ;;  %2432 = vmatpush1.msra.mxu1 %v8280_v13 }
 0x83a   :  { %2362 = vmatprep.subr.mxu0 %v8281_v14  ;;  %2433 = vmatprep.subr.mxu1 %v8282_v16  ;;  %v8290_v14 = vld [vmem:[#allocation29_spill] sm:$0xff]  ;;  %v1940_v16 = vpop.f32.mrf.mxu0 }
 0x83b   :  { %2363 = vmatpush1.msra.mxu0 %v8283_v15  ;;  %2434 = vmatpush1.msra.mxu1 %v8284_v49  ;;  %v2053_v15 = vpop.f32.mrf.mxu1 }
 0x83c   :  { %2364 = vmatprep.subr.mxu0 %v8285_v7  ;;  %2435 = vmatprep.subr.mxu1 %v8286_v46  ;;  %v1942_v13 = vpop.f32.mrf.mxu0 }
 0x83d   :  { %2365 = vmatpush1.msra.mxu0 %v8287_v45  ;;  %2398 = vmatprep.mubr.f32.mxu0 %v8234_v11  ;;  %v2055_v49 = vpop.f32.mrf.mxu1 }
 0x83e   :  { %2436 = vmatpush1.msra.mxu1 %v8288_v48  ;;  %2469 = vmatprep.mubr.f32.mxu1 %v8234_v11  ;;  %v6748_v10 = vpop.f32.mrf.mxu0 }
 0x83f   :  { %2504 = vmatprep.subr.mxu0 %v8289_v6  ;;  %2575 = vmatprep.subr.mxu1 %v8290_v14  ;;  %8291 = vst [vmem:[#allocation8_spill] sm:$0xff] %v6748_v10  ;;  %v6750_v7 = vpop.f32.mrf.mxu1 }
 0x840   :  { %8292 = vst [vmem:[#allocation9_spill] sm:$0xff] %v6750_v7  ;;  %v6752_v46 = vpop.f32.mrf.mxu0 }
 0x841   :  { %8293 = vst [vmem:[#allocation10_spill] sm:$0xff] %v6752_v46  ;;  %v6754_v45 = vpop.f32.mrf.mxu1 }
 0x842   :  { %8294 = vst [vmem:[#allocation11_spill] sm:$0xff] %v6754_v45  ;;  %v6756_v8 = vpop.f32.mrf.mxu0 }
 0x843   :  { %8295 = vst [vmem:[#allocation12_spill] sm:$0xff] %v6756_v8  ;;  %v6758_v48 = vpop.f32.mrf.mxu1 }
 0x844   :  { %8296 = vst [vmem:[#allocation13_spill] sm:$0xff] %v6758_v48  ;;  %v6760_v11 = vpop.f32.mrf.mxu0 }
 0x845   :  { %8297 = vst [vmem:[#allocation14_spill] sm:$0xff] %v6760_v11  ;;  %v6762_v6 = vpop.f32.mrf.mxu1 }
 0x846   :  { %8298 = vst [vmem:[#allocation15_spill] sm:$0xff] %v6762_v6  ;;  %v6764_v14 = vpop.f32.mrf.mxu0 }
 0x847   :  { %8299 = vst [vmem:[#allocation16_spill] sm:$0xff] %v6764_v14  ;;  %v6766_v12 = vpop.f32.mrf.mxu1 }
 0x848   :  { %8300 = vst [vmem:[#allocation17_spill] sm:$0xff] %v6766_v12  ;;  %v6768_v9 = vpop.f32.mrf.mxu0 }
 0x849   :  { %8301 = vst [vmem:[#allocation18_spill] sm:$0xff] %v6768_v9  ;;  %v6770_v10 = vpop.f32.mrf.mxu1 }
 0x84a   :  { %8302 = vst [vmem:[#allocation19_spill] sm:$0xff] %v6770_v10  ;;  %v6772_v7 = vpop.f32.mrf.mxu0 }
 0x84b   :  { %8303 = vst [vmem:[#allocation20_spill] sm:$0xff] %v6772_v7  ;;  %v6774_v46 = vpop.f32.mrf.mxu1 }
 0x84c   :  { %8304 = vst [vmem:[#allocation21_spill] sm:$0xff] %v6774_v46  ;;  %v6776_v45 = vpop.f32.mrf.mxu0  ;;  %v1852_v46 = vld [vmem:[%s7841_s6] sm:$0xf] }
 0x84d   :  { %8305 = vst [vmem:[#allocation22_spill] sm:$0xff] %v6776_v45  ;;  %v6778_v8 = vpop.f32.mrf.mxu1  ;;  %v8314_v45 = vld [vmem:[#allocation25_spill] sm:$0xff] }
 0x84e   :  { %8306 = vst [vmem:[#allocation45_spill] sm:$0xff] %v6778_v8  ;;  %v6780_v48 = vpop.f32.mrf.mxu0  ;;  %v8315_v8 = vsub.s32 0, %v8314_v45 }
 0x84f   :  { %8307 = vst [vmem:[#allocation47_spill] sm:$0xff] %v6780_v48  ;;  %v6782_v11 = vpop.f32.mrf.mxu1 }
 0x850   :  { %8308 = vst [vmem:[#allocation48_spill] sm:$0xff] %v6782_v11  ;;  %v6784_v6 = vpop.f32.mrf.mxu0  ;;  %v6799_v10 = vrot.slane %v1852_v46, %v8315_v8 }
 0x851   :  { %8309 = vst [vmem:[#allocation46_spill] sm:$0xff] %v6784_v6  ;;  %v6786_v14 = vpop.f32.mrf.mxu1 }
 0x852   :  { %8310 = vst [vmem:[#allocation53_spill] sm:$0xff] %v6786_v14  ;;  %v6788_v12 = vpop.f32.mrf.mxu0  ;;  %8316 = vst [vmem:[#allocation23_spill] sm:$0xff] %v6799_v10  ;;  %v8319_v14 = vsub.s32 1, %v8314_v45  ;;  %v1941_v53 = vadd.f32 %v1940_v16, %v6799_v10 }
 0x853   :  { %8311 = vst [vmem:[#allocation4_spill] sm:$0xff] %v6788_v12  ;;  %v6790_v9 = vpop.f32.mrf.mxu1 }
 0x854   :  { %8312 = vst [vmem:[#allocation7_spill] sm:$0xff] %v6790_v9  ;;  %v6795_v7 = vpop.f32.mrf.mxu0  ;;  %v6807_v6 = vrot.slane %v1852_v46, %v8319_v14  ;;  %v8323_v14 = vsub.s32 3, %v8314_v45 }
 0x855   :  { %8313 = vst [vmem:[#allocation27_spill] sm:$0xff] %v6795_v7  ;;  %v6801_v48 = vpop.f32.mrf.mxu1 }
 0x856   :  { %8317 = vst [vmem:[#allocation49_spill] sm:$0xff] %v6801_v48  ;;  %v1943_v7 = vadd.f32 %v1942_v13, %v6807_v6  ;;  %v6819_v41 = vrot.slane %v1852_v46, %v8323_v14 }
 0x858   :  { %8324 = vst [vmem:[#allocation54_spill] sm:$0xff] %v6819_v41  ;;  %v2056_v16 = vadd.f32 %v2055_v49, %v6819_v41 }
 0x8da   :  { %v6803_v11 = vpop.f32.mrf.mxu0  ;;  %v6809_v12 = vpop.f32.mrf.mxu1 }
 0x8db   :  { %8318 = vst [vmem:[#allocation51_spill] sm:$0xff] %v6803_v11  ;;  %8320 = vst [vmem:[#allocation52_spill] sm:$0xff] %v6809_v12 }
 0x8dc   :  { %v6811_v9 = vpop.f32.mrf.mxu0  ;;  %v6815_v43 = vpop.f32.mrf.mxu1 }
 0x8dd   :  { %8321 = vst [vmem:[#allocation50_spill] sm:$0xff] %v6811_v9  ;;  %8322 = vst [vmem:[#allocation25_spill] sm:$0xff] %v6815_v43  ;;  %v8325_v9 = vsub.s32 2, %v8314_v45 }
 0x8de   :  { %v2230_v44 = vpop.f32.mrf.mxu0  ;;  %v2301_v11 = vpop.f32.mrf.mxu1 }
 0x8df   :  { %v2306_v8 = vadd.f32 %v2230_v44, %v1941_v53  ;;  %v6824_v13 = vrot.slane %v1852_v46, %v8325_v9 }
 0x8e0   :  { %v2232_v52 = vpop.f32.mrf.mxu0  ;;  %v2303_v12 = vpop.f32.mrf.mxu1 }
 0x8e1   :  { %v3838_v48 = vmul.f32 -1.442695, %v2306_v8  ;;  %v2307_v26 = vadd.f32 %v2232_v52, %v1943_v7  ;;  %v2309_v43 = vadd.f32 %v2303_v12, %v2056_v16  ;;  %v2054_v44 = vadd.f32 %v2053_v15, %v6824_v13  ;;  %v8327_v16 = vld [vmem:[#allocation30_spill] sm:$0xff] }
 0x8e3   :  { %4151 = vpow2.f32 %v3838_v48  ;;  %v3839_v42 = vmul.f32 -1.442695, %v2307_v26  ;;  %v3840_v53 = vmul.f32 -1.442695, %v2309_v43  ;;  %v2308_v7 = vadd.f32 %v2301_v11, %v2054_v44  ;;  %v8328_v44 = vld [vmem:[#allocation33_spill] sm:$0xff] }
 0x8e5   :  { %4153 = vpow2.f32 %v3839_v42 }
 0x8e6   :  { %4155 = vpow2.f32 %v3840_v53  ;;  %v8329_v53 = vld [vmem:[#allocation35_spill] sm:$0xff] }
 0x8f0   :  { %v4152_v52 = vpop.eup %4151 }
 0x8f1   :  { %v2313_v48 = vadd.f32 1.0, %v4152_v52  ;;  %v8330_v52 = vld [vmem:[#allocation36_spill] sm:$0xff] }
 0x8f2   :  { %v4154_v26 = vpop.eup %4153 }
 0x8f3   :  { %4157 = vrcp.f32 %v2313_v48  ;;  %v2319_v8 = vadd.f32 1.0, %v4154_v26  ;;  %v4156_v42 = vpop.eup %4155  ;;  %v8332_v48 = vld [vmem:[#allocation2_spill] sm:$0xff]  ;;  %v8333_v26 = vld [vmem:[#allocation3_spill] sm:$0xff] }
 0x8f4   :  { %4159 = vtanh.f32 %v2308_v7  ;;  %v2326_v45 = vadd.f32 1.0, %v4156_v42  ;;  %v8331_v7 = vld [vmem:[#allocation34_spill] sm:$0xff]  ;;  %v8335_v42 = vld [vmem:[#allocation39_spill] sm:$0xff] }
 0x8f5   :  { %4161 = vrcp.f32 %v2319_v8  ;;  %v8334_v8 = vld [vmem:[#allocation37_spill] sm:$0xff] }
 0x8f6   :  { %4163 = vrcp.f32 %v2326_v45  ;;  %v8338_v45 = vld [vmem:[#allocation5_spill] sm:$0xff] }
 0x900   :  { %v4158_v14 = vpop.eup %4157 }
 0x901   :  { %v4160_v49 = vpop.eup %4159 }
 0x902   :  { %v4162_v41 = vpop.eup %4161  ;;  %v2330_v46 = vmul.f32 %v4160_v49, %v4158_v14  ;;  %v8336_v14 = vld [vmem:[#allocation40_spill] sm:$0xff]  ;;  %v8337_v49 = vld [vmem:[#allocation38_spill] sm:$0xff] }
 0x903   :  { %v2329_v9 = vmul.f32 0.0, %v4162_v41  ;;  %v4164_v11 = vpop.eup %4163  ;;  %v8326_v41 = vld [vmem:[#allocation32_spill] sm:$0xff] }
 0x905   :  { %v6827_v12 = vadd.f32 %v2330_v46, %v2329_v9  ;;  %v8339_v9 = vld [vmem:[#allocation6_spill] sm:$0xff]  ;;  %v8340_v46 = vld [vmem:[#allocation41_spill] sm:$0xff] }
 0x907   :  { %4165 = vtanh.f32 %v6827_v12 }
 0x914   :  { %v4166_v43 = vpop.eup %4165 }
 0x915   :  { %v2333_v15 = vmul.f32 %v4166_v43, %v4164_v11  ;;  %v8341_v11 = vld [vmem:[#allocation43_spill] sm:$0xff]  ;;  %v8342_v43 = vld [vmem:[#allocation44_spill] sm:$0xff] }
 0x917   :  { %2399 = vmatmul.mubr.f32.vlgmr.msra.gmra.mxu0 %v2333_v15  ;;  %2470 = vmatmul.mubr.f32.vlgmr.msra.gmra.mxu1 %v2333_v15  ;;  %v8343_v15 = vld [vmem:[#allocation42_spill] sm:$0xff] }
 0x918   :  { %2505 = vmatpush1.msra.mxu0 %v6302_v23  ;;  %2576 = vmatpush1.msra.mxu1 %v6307_v5 }
 0x919   :  { %2506 = vmatprep.subr.mxu0 %v6314_v25  ;;  %2577 = vmatprep.subr.mxu1 %v6319_v54 }
 0x91a   :  { %2507 = vmatpush1.msra.mxu0 %v6326_v62  ;;  %2578 = vmatpush1.msra.mxu1 %v6331_v50 }
 0x91b   :  { %2508 = vmatprep.subr.mxu0 %v6338_v61  ;;  %2579 = vmatprep.subr.mxu1 %v6343_v4 }
 0x91c   :  { %2509 = vmatpush1.msra.mxu0 %v6350_v1  ;;  %2580 = vmatpush1.msra.mxu1 %v6355_v38 }
 0x91d   :  { %2510 = vmatprep.subr.mxu0 %v6362_v63  ;;  %2581 = vmatprep.subr.mxu1 %v6367_v51 }
 0x91e   :  { %2511 = vmatpush1.msra.mxu0 %v6374_v58  ;;  %2582 = vmatpush1.msra.mxu1 %v6379_v29 }
 0x91f   :  { %2512 = vmatprep.subr.mxu0 %v6386_v3  ;;  %2583 = vmatprep.subr.mxu1 %v6391_v59 }
 0x920   :  { %2513 = vmatpush1.msra.mxu0 %v6398_v57  ;;  %2584 = vmatpush1.msra.mxu1 %v6403_v56 }
 0x921   :  { %2514 = vmatprep.subr.mxu0 %v6410_v55  ;;  %2585 = vmatprep.subr.mxu1 %v6415_v2 }
 0x922   :  { %2515 = vmatpush1.msra.mxu0 %v6422_v20  ;;  %2586 = vmatpush1.msra.mxu1 %v6427_v60 }
 0x923   :  { %2516 = vmatprep.subr.mxu0 %v6434_v0  ;;  %2587 = vmatprep.subr.mxu1 %v6439_v47 }
 0x924   :  { %2517 = vmatpush1.msra.mxu0 %v6446_v27  ;;  %2588 = vmatpush1.msra.mxu1 %v6451_v28 }
 0x925   :  { %2518 = vmatprep.subr.mxu0 %v6458_v30  ;;  %2589 = vmatprep.subr.mxu1 %v6463_v32 }
 0x926   :  { %2519 = vmatpush1.msra.mxu0 %v6470_v33  ;;  %2590 = vmatpush1.msra.mxu1 %v6475_v17 }
 0x927   :  { %2520 = vmatprep.subr.mxu0 %v6482_v18  ;;  %2591 = vmatprep.subr.mxu1 %v6487_v19 }
 0x928   :  { %2521 = vmatpush1.msra.mxu0 %v6494_v21  ;;  %2592 = vmatpush1.msra.mxu1 %v6499_v22 }
 0x929   :  { %2522 = vmatprep.subr.mxu0 %v6506_v24  ;;  %2593 = vmatprep.subr.mxu1 %v6511_v31 }
 0x92a   :  { %2523 = vmatpush1.msra.mxu0 %v6518_v34  ;;  %2594 = vmatpush1.msra.mxu1 %v6523_v35 }
 0x92b   :  { %2524 = vmatprep.subr.mxu0 %v6530_v36  ;;  %2595 = vmatprep.subr.mxu1 %v6535_v37 }
 0x92c   :  { %2525 = vmatpush1.msra.mxu0 %v6542_v39  ;;  %2596 = vmatpush1.msra.mxu1 %v6547_v40 }
 0x92d   :  { %2526 = vmatprep.subr.mxu0 %v8326_v41  ;;  %2597 = vmatprep.subr.mxu1 %v8327_v16  ;;  %v8353_v16 = vld [vmem:[#allocation9_spill] sm:$0xff] }
 0x92e   :  { %2527 = vmatpush1.msra.mxu0 %v8328_v44  ;;  %2598 = vmatpush1.msra.mxu1 %v8329_v53  ;;  %v8351_v53 = vld [vmem:[#allocation54_spill] sm:$0xff] }
 0x92f   :  { %2528 = vmatprep.subr.mxu0 %v8330_v52  ;;  %2599 = vmatprep.subr.mxu1 %v8331_v7 }
 0x930   :  { %2529 = vmatpush1.msra.mxu0 %v8332_v48  ;;  %2600 = vmatpush1.msra.mxu1 %v8333_v26  ;;  %v8344_v26 = vld [vmem:[#allocation28_spill] sm:$0xff] }
 0x931   :  { %2530 = vmatprep.subr.mxu0 %v8334_v8  ;;  %2601 = vmatprep.subr.mxu1 %v8335_v42  ;;  %v8345_v8 = vmov 0.0   ;;  %v8346_v42 = vld [vmem:[#allocation26_spill] sm:$0xff] }
 0x932   :  { %2531 = vmatpush1.msra.mxu0 %v8336_v14  ;;  %2602 = vmatpush1.msra.mxu1 %v8337_v49  ;;  %v8347_v49 = vld [vmem:[#allocation24_spill] sm:$0xff] }
 0x933   :  { %2532 = vmatprep.subr.mxu0 %v8338_v45  ;;  %2603 = vmatprep.subr.mxu1 %v8339_v9  ;;  %v8348_v45 = vld [vmem:[#allocation29_spill] sm:$0xff] }
 0x934   :  { %2533 = vmatpush1.msra.mxu0 %v8340_v46  ;;  %2604 = vmatpush1.msra.mxu1 %v8341_v11  ;;  %v8349_v46 = vld [vmem:[#allocation8_spill] sm:$0xff] }
 0x935   :  { %2534 = vmatprep.subr.mxu0 %v8342_v43  ;;  %2605 = vmatprep.subr.mxu1 %v8343_v15  ;;  %v1947_v9 = vadd.f32 %v8349_v46, %v6799_v10  ;;  %v8350_v43 = vld [vmem:[#allocation10_spill] sm:$0xff]  ;;  %v2060_v46 = vadd.f32 %v8353_v16, %v6824_v13 }
 0x936   :  { %2535 = vmatpush1.msra.mxu0 %v8344_v26  ;;  %2568 = vmatprep.mubr.f32.mxu0 %v8345_v8  ;;  %v1949_v14 = vadd.f32 %v8350_v43, %v6807_v6 }
 0x937   :  { %2606 = vmatpush1.msra.mxu1 %v8346_v42  ;;  %2639 = vmatprep.mubr.f32.mxu1 %v8345_v8 }
 0x938   :  { %2674 = vmatprep.subr.mxu0 %v8347_v49  ;;  %2745 = vmatprep.subr.mxu1 %v8348_v45  ;;  %v8352_v49 = vld [vmem:[#allocation11_spill] sm:$0xff] }
 0x939   :  { %v2062_v44 = vadd.f32 %v8352_v49, %v8351_v53 }
 0x9d7   :  { %v2400_v11 = vpop.f32.mrf.mxu0  ;;  %v2471_v52 = vpop.f32.mrf.mxu1 }
 0x9d8   :  { %v2476_v15 = vadd.f32 %v2400_v11, %v1947_v9  ;;  %v2478_v10 = vadd.f32 %v2471_v52, %v2060_v46  ;;  %v8368_v52 = vld [vmem:[#allocation6_spill] sm:$0xff]  ;;  %v8371_v46 = vld [vmem:[#allocation44_spill] sm:$0xff] }
 0x9d9   :  { %v2402_v48 = vpop.f32.mrf.mxu0  ;;  %v2473_v8 = vpop.f32.mrf.mxu1 }
 0x9da   :  { %v3841_v26 = vmul.f32 -1.442695, %v2476_v15  ;;  %v2477_v7 = vadd.f32 %v2402_v48, %v1949_v14  ;;  %v2479_v45 = vadd.f32 %v2473_v8, %v2062_v44  ;;  %v8370_v15 = vld [vmem:[#allocation43_spill] sm:$0xff] }
 0x9dc   :  { %4167 = vpow2.f32 %v3841_v26  ;;  %v3842_v42 = vmul.f32 -1.442695, %v2477_v7  ;;  %v3843_v41 = vmul.f32 -1.442695, %v2479_v45  ;;  %v8369_v45 = vld [vmem:[#allocation41_spill] sm:$0xff] }
 0x9de   :  { %4169 = vpow2.f32 %v3842_v42 }
 0x9df   :  { %4171 = vtanh.f32 %v2478_v10 }
 0x9e0   :  { %4173 = vpow2.f32 %v3843_v41  ;;  %v8367_v41 = vld [vmem:[#allocation5_spill] sm:$0xff] }
 0x9e9   :  { %v4168_v40 = vpop.eup %4167 }
 0x9ea   :  { %v2483_v43 = vadd.f32 1.0, %v4168_v40 }
 0x9eb   :  { %v4170_v9 = vpop.eup %4169 }
 0x9ec   :  { %4175 = vrcp.f32 %v2483_v43  ;;  %v2489_v48 = vadd.f32 1.0, %v4170_v9  ;;  %v4172_v7 = vpop.eup %4171  ;;  %v8372_v43 = vld [vmem:[#allocation42_spill] sm:$0xff]  ;;  %v8373_v9 = vld [vmem:[#allocation28_spill] sm:$0xff] }
 0x9ed   :  { %v4174_v26 = vpop.eup %4173 }
 0x9ee   :  { %4177 = vrcp.f32 %v2489_v48  ;;  %v2496_v49 = vadd.f32 1.0, %v4174_v26  ;;  %v8374_v48 = vmov 0.0   ;;  %v8376_v26 = vld [vmem:[#allocation24_spill] sm:$0xff] }
 0x9f0   :  { %4179 = vrcp.f32 %v2496_v49 }
 0x9f9   :  { %v4176_v42 = vpop.eup %4175 }
 0x9fa   :  { %v2500_v14 = vmul.f32 %v4176_v42, %v4172_v7  ;;  %v8375_v7 = vld [vmem:[#allocation26_spill] sm:$0xff]  ;;  %v8377_v42 = vld [vmem:[#allocation29_spill] sm:$0xff] }
 0x9fb   :  { %v4178_v11 = vpop.eup %4177 }
 0x9fc   :  { %v2499_v44 = vmul.f32 %v4178_v11, %v6827_v12  ;;  %v8366_v12 = vld [vmem:[#allocation38_spill] sm:$0xff]  ;;  %v8379_v11 = vld [vmem:[#allocation12_spill] sm:$0xff] }
 0x9fd   :  { %v4180_v40 = vpop.eup %4179 }
 0x9fe   :  { %v6905_v8 = vadd.f32 %v2500_v14, %v2499_v44  ;;  %v8378_v14 = vld [vmem:[#allocation23_spill] sm:$0xff] }
 0x9ff   :  { %v1953_v49 = vadd.f32 %v8379_v11, %v8378_v14 }
 0xa00   :  { %4181 = vtanh.f32 %v6905_v8 }
 0xa0d   :  { %v4182_v10 = vpop.eup %4181 }
 0xa0e   :  { %v2503_v16 = vmul.f32 %v4182_v10, %v4180_v40  ;;  %v8380_v40 = vld [vmem:[#allocation14_spill] sm:$0xff] }
 0xa0f   :  { %v1955_v10 = vadd.f32 %v8380_v40, %v6807_v6 }
 0xa10   :  { %2569 = vmatmul.mubr.f32.vlgmr.msra.gmra.mxu0 %v2503_v16  ;;  %2640 = vmatmul.mubr.f32.vlgmr.msra.gmra.mxu1 %v2503_v16 }
 0xa11   :  { %2675 = vmatpush1.msra.mxu0 %v6302_v23  ;;  %2746 = vmatpush1.msra.mxu1 %v6307_v5  ;;  %v8354_v23 = vld [vmem:[#allocation31_spill] sm:$0xff]  ;;  %v8355_v5 = vld [vmem:[#allocation32_spill] sm:$0xff] }
 0xa12   :  { %2676 = vmatprep.subr.mxu0 %v6314_v25  ;;  %2747 = vmatprep.subr.mxu1 %v6319_v54  ;;  %v8356_v25 = vld [vmem:[#allocation30_spill] sm:$0xff]  ;;  %v8357_v54 = vld [vmem:[#allocation33_spill] sm:$0xff] }
 0xa13   :  { %2677 = vmatpush1.msra.mxu0 %v6326_v62  ;;  %2748 = vmatpush1.msra.mxu1 %v6331_v50  ;;  %v8358_v62 = vld [vmem:[#allocation35_spill] sm:$0xff]  ;;  %v8359_v50 = vld [vmem:[#allocation36_spill] sm:$0xff] }
 0xa14   :  { %2678 = vmatprep.subr.mxu0 %v6338_v61  ;;  %2749 = vmatprep.subr.mxu1 %v6343_v4  ;;  %v8360_v61 = vld [vmem:[#allocation34_spill] sm:$0xff] }
 0xa15   :  { %2679 = vmatpush1.msra.mxu0 %v6350_v1  ;;  %2750 = vmatpush1.msra.mxu1 %v6355_v38  ;;  %v8361_v4 = vld [vmem:[#allocation2_spill] sm:$0xff]  ;;  %v8362_v1 = vld [vmem:[#allocation3_spill] sm:$0xff]  ;;  %v8363_v38 = vld [vmem:[#allocation37_spill] sm:$0xff] }
 0xa16   :  { %2680 = vmatprep.subr.mxu0 %v6362_v63  ;;  %2751 = vmatprep.subr.mxu1 %v6367_v51  ;;  %v8364_v63 = vld [vmem:[#allocation39_spill] sm:$0xff]  ;;  %v8365_v51 = vld [vmem:[#allocation40_spill] sm:$0xff] }
 0xa17   :  { %2681 = vmatpush1.msra.mxu0 %v6374_v58  ;;  %2752 = vmatpush1.msra.mxu1 %v6379_v29 }
 0xa18   :  { %2682 = vmatprep.subr.mxu0 %v6386_v3  ;;  %2753 = vmatprep.subr.mxu1 %v6391_v59 }
 0xa19   :  { %2683 = vmatpush1.msra.mxu0 %v6398_v57  ;;  %2754 = vmatpush1.msra.mxu1 %v6403_v56 }
 0xa1a   :  { %2684 = vmatprep.subr.mxu0 %v6410_v55  ;;  %2755 = vmatprep.subr.mxu1 %v6415_v2 }
 0xa1b   :  { %2685 = vmatpush1.msra.mxu0 %v6422_v20  ;;  %2756 = vmatpush1.msra.mxu1 %v6427_v60 }
 0xa1c   :  { %2686 = vmatprep.subr.mxu0 %v6434_v0  ;;  %2757 = vmatprep.subr.mxu1 %v6439_v47 }
 0xa1d   :  { %2687 = vmatpush1.msra.mxu0 %v6446_v27  ;;  %2758 = vmatpush1.msra.mxu1 %v6451_v28 }
 0xa1e   :  { %2688 = vmatprep.subr.mxu0 %v6458_v30  ;;  %2759 = vmatprep.subr.mxu1 %v6463_v32 }
 0xa1f   :  { %2689 = vmatpush1.msra.mxu0 %v6470_v33  ;;  %2760 = vmatpush1.msra.mxu1 %v6475_v17 }
 0xa20   :  { %2690 = vmatprep.subr.mxu0 %v6482_v18  ;;  %2761 = vmatprep.subr.mxu1 %v6487_v19 }
 0xa21   :  { %2691 = vmatpush1.msra.mxu0 %v6494_v21  ;;  %2762 = vmatpush1.msra.mxu1 %v6499_v22 }
 0xa22   :  { %2692 = vmatprep.subr.mxu0 %v6506_v24  ;;  %2763 = vmatprep.subr.mxu1 %v6511_v31 }
 0xa23   :  { %2693 = vmatpush1.msra.mxu0 %v6518_v34  ;;  %2764 = vmatpush1.msra.mxu1 %v6523_v35 }
 0xa24   :  { %2694 = vmatprep.subr.mxu0 %v6530_v36  ;;  %2765 = vmatprep.subr.mxu1 %v6535_v37 }
 0xa25   :  { %2695 = vmatpush1.msra.mxu0 %v6542_v39  ;;  %2766 = vmatpush1.msra.mxu1 %v8354_v23 }
 0xa26   :  { %2696 = vmatprep.subr.mxu0 %v8355_v5  ;;  %2767 = vmatprep.subr.mxu1 %v8356_v25 }
 0xa27   :  { %2697 = vmatpush1.msra.mxu0 %v8357_v54  ;;  %2768 = vmatpush1.msra.mxu1 %v8358_v62 }
 0xa28   :  { %2698 = vmatprep.subr.mxu0 %v8359_v50  ;;  %2769 = vmatprep.subr.mxu1 %v8360_v61 }
 0xa29   :  { %2699 = vmatpush1.msra.mxu0 %v8361_v4  ;;  %2770 = vmatpush1.msra.mxu1 %v8362_v1 }
 0xa2a   :  { %2700 = vmatprep.subr.mxu0 %v8363_v38  ;;  %2771 = vmatprep.subr.mxu1 %v8364_v63 }
 0xa2b   :  { %2701 = vmatpush1.msra.mxu0 %v8365_v51  ;;  %2772 = vmatpush1.msra.mxu1 %v8366_v12 }
 0xa2c   :  { %2702 = vmatprep.subr.mxu0 %v8367_v41  ;;  %2773 = vmatprep.subr.mxu1 %v8368_v52  ;;  %v8382_v52 = vld [vmem:[#allocation13_spill] sm:$0xff] }
 0xa2d   :  { %2703 = vmatpush1.msra.mxu0 %v8369_v45  ;;  %2774 = vmatpush1.msra.mxu1 %v8370_v15  ;;  %v2066_v11 = vadd.f32 %v8382_v52, %v6824_v13 }
 0xa2e   :  { %2704 = vmatprep.subr.mxu0 %v8371_v46  ;;  %2775 = vmatprep.subr.mxu1 %v8372_v43 }
 0xa2f   :  { %2705 = vmatpush1.msra.mxu0 %v8373_v9  ;;  %2738 = vmatprep.mubr.f32.mxu0 %v8374_v48 }
 0xa30   :  { %2776 = vmatpush1.msra.mxu1 %v8375_v7  ;;  %2809 = vmatprep.mubr.f32.mxu1 %v8374_v48 }
 0xa31   :  { %2844 = vmatprep.subr.mxu0 %v8376_v26  ;;  %2915 = vmatprep.subr.mxu1 %v8377_v42  ;;  %v8381_v26 = vld [vmem:[#allocation15_spill] sm:$0xff] }
 0xa32   :  { %v2068_v45 = vadd.f32 %v8381_v26, %v8351_v53  ;;  %v7007_v26 = vld [vmem:[%s7840_s5 + $0x1d8] sm:$0xff] }
 0xad0   :  { %v2570_v44 = vpop.f32.mrf.mxu0  ;;  %v2641_v15 = vpop.f32.mrf.mxu1 }
 0xad1   :  { %v2646_v16 = vadd.f32 %v2570_v44, %v1953_v49  ;;  %v2648_v14 = vadd.f32 %v2641_v15, %v2066_v11  ;;  %v7019_v11 = vld [vmem:[%s7840_s5 + $0x1d0] sm:$0xff] }
 0xad2   :  { %v2572_v43 = vpop.f32.mrf.mxu0  ;;  %v2643_v48 = vpop.f32.mrf.mxu1 }
 0xad3   :  { %v3844_v9 = vmul.f32 -1.442695, %v2646_v16  ;;  %v2647_v46 = vadd.f32 %v2572_v43, %v1955_v10  ;;  %v2649_v42 = vadd.f32 %v2643_v48, %v2068_v45 }
 0xad5   :  { %4183 = vpow2.f32 %v3844_v9  ;;  %v3845_v7 = vmul.f32 -1.442695, %v2647_v46  ;;  %v3846_v41 = vmul.f32 -1.442695, %v2649_v42  ;;  %v7013_v42 = vld [vmem:[%s7840_s5 + $0x1c0] sm:$0xff] }
 0xad7   :  { %4185 = vpow2.f32 %v3845_v7 }
 0xad8   :  { %4187 = vtanh.f32 %v2648_v14  ;;  %v7001_v14 = vld [vmem:[%s7840_s5 + $0x1c8] sm:$0xff] }
 0xad9   :  { %4189 = vpow2.f32 %v3846_v41  ;;  %v6989_v41 = vld [vmem:[%s7840_s5 + $0x1e0] sm:$0xff] }
 0xae2   :  { %v4184_v12 = vpop.eup %4183 }
 0xae3   :  { %v2653_v40 = vadd.f32 1.0, %v4184_v12 }
 0xae4   :  { %v4186_v49 = vpop.eup %4185 }
 0xae5   :  { %4191 = vrcp.f32 %v2653_v40  ;;  %v2659_v43 = vadd.f32 1.0, %v4186_v49  ;;  %v4188_v46 = vpop.eup %4187  ;;  %v7025_v40 = vld [vmem:[%s7840_s5 + $0x1a8] sm:$0xff]  ;;  %v7031_v49 = vld [vmem:[%s7840_s5 + $0x1b8] sm:$0xff] }
 0xae6   :  { %v4190_v9 = vpop.eup %4189 }
 0xae7   :  { %4193 = vrcp.f32 %v2659_v43  ;;  %v2666_v16 = vadd.f32 1.0, %v4190_v9  ;;  %v7037_v43 = vld [vmem:[%s7840_s5 + $0x1a0] sm:$0xff]  ;;  %v7049_v9 = vld [vmem:[%s7840_s5 + $0x188] sm:$0xff] }
 0xae9   :  { %4195 = vrcp.f32 %v2666_v16 }
 0xaf2   :  { %v4192_v7 = vpop.eup %4191 }
 0xaf3   :  { %v2670_v44 = vmul.f32 %v4192_v7, %v4188_v46  ;;  %v7043_v46 = vld [vmem:[%s7840_s5 + $0x1b0] sm:$0xff]  ;;  %v7055_v7 = vld [vmem:[%s7840_s5 + $0x198] sm:$0xff] }
 0xaf4   :  { %v4194_v10 = vpop.eup %4193 }
 0xaf5   :  { %v2669_v45 = vmul.f32 %v4194_v10, %v6905_v8  ;;  %v6995_v8 = vld [vmem:[%s7840_s5 + $0x1f0] sm:$0xff] }
 0xaf6   :  { %v4196_v12 = vpop.eup %4195 }
 0xaf7   :  { %v6983_v48 = vadd.f32 %v2670_v44, %v2669_v45 }
 0xaf9   :  { %4197 = vtanh.f32 %v6983_v48 }
 0xb06   :  { %v4198_v52 = vpop.eup %4197 }
 0xb07   :  { %v2673_v15 = vmul.f32 %v4198_v52, %v4196_v12 }
 0xb09   :  { %2739 = vmatmul.mubr.f32.vlgmr.msra.gmra.mxu0 %v2673_v15  ;;  %2810 = vmatmul.mubr.f32.vlgmr.msra.gmra.mxu1 %v2673_v15  ;;  %v7155_v15 = vld [vmem:[%s7840_s5 + $0x190] sm:$0xff] }
 0xb0a   :  { %2845 = vmatpush1.msra.mxu0 %v6989_v41  ;;  %2916 = vmatpush1.msra.mxu1 %v6995_v8 }
 0xb0b   :  { %2846 = vmatprep.subr.mxu0 %v7001_v14  ;;  %2917 = vmatprep.subr.mxu1 %v7007_v26 }
 0xb0c   :  { %2847 = vmatpush1.msra.mxu0 %v7013_v42  ;;  %2918 = vmatpush1.msra.mxu1 %v7019_v11 }
 0xb0d   :  { %2848 = vmatprep.subr.mxu0 %v7025_v40  ;;  %2919 = vmatprep.subr.mxu1 %v7031_v49 }
 0xb0e   :  { %2849 = vmatpush1.msra.mxu0 %v7037_v43  ;;  %2920 = vmatpush1.msra.mxu1 %v7043_v46 }
 0xb0f   :  { %2850 = vmatprep.subr.mxu0 %v7049_v9  ;;  %2921 = vmatprep.subr.mxu1 %v7055_v7 }
 0xb10   :  { %2851 = vmatpush1.msra.mxu0 %v6374_v58  ;;  %2922 = vmatpush1.msra.mxu1 %v6379_v29  ;;  %v8383_v58 = vld [vmem:[#allocation38_spill] sm:$0xff]  ;;  %v8384_v29 = vld [vmem:[#allocation5_spill] sm:$0xff] }
 0xb11   :  { %2852 = vmatprep.subr.mxu0 %v6386_v3  ;;  %2923 = vmatprep.subr.mxu1 %v6391_v59  ;;  %v8385_v3 = vld [vmem:[#allocation6_spill] sm:$0xff]  ;;  %v8386_v59 = vld [vmem:[#allocation41_spill] sm:$0xff] }
 0xb12   :  { %2853 = vmatpush1.msra.mxu0 %v6398_v57  ;;  %2924 = vmatpush1.msra.mxu1 %v6403_v56  ;;  %v8387_v57 = vld [vmem:[#allocation43_spill] sm:$0xff]  ;;  %v8388_v56 = vld [vmem:[#allocation44_spill] sm:$0xff] }
 0xb13   :  { %2854 = vmatprep.subr.mxu0 %v6410_v55  ;;  %2925 = vmatprep.subr.mxu1 %v6415_v2  ;;  %v8389_v55 = vld [vmem:[#allocation42_spill] sm:$0xff]  ;;  %v8390_v2 = vld [vmem:[#allocation28_spill] sm:$0xff] }
 0xb14   :  { %2855 = vmatpush1.msra.mxu0 %v6422_v20  ;;  %2926 = vmatpush1.msra.mxu1 %v6427_v60  ;;  %v8391_v20 = vmov 0.0   ;;  %v8392_v60 = vld [vmem:[#allocation26_spill] sm:$0xff] }
 0xb15   :  { %2856 = vmatprep.subr.mxu0 %v6434_v0  ;;  %2927 = vmatprep.subr.mxu1 %v6439_v47  ;;  %v7113_v0 = vld [vmem:[%s7840_s5 + $0x1e8] sm:$0xff]  ;;  %v7119_v47 = vld [vmem:[%s7840_s5 + $0x1f8] sm:$0xff] }
 0xb16   :  { %2857 = vmatpush1.msra.mxu0 %v6446_v27  ;;  %2928 = vmatpush1.msra.mxu1 %v6451_v28  ;;  %8393 = vst [vmem:[#allocation8_spill] sm:$0xff] %v7113_v0  ;;  %8394 = vst [vmem:[#allocation10_spill] sm:$0xff] %v7119_v47  ;;  %v8395_v27 = vld [vmem:[#allocation23_spill] sm:$0xff]  ;;  %v8396_v28 = vld [vmem:[#allocation16_spill] sm:$0xff] }
 0xb17   :  { %2858 = vmatprep.subr.mxu0 %v6458_v30  ;;  %2929 = vmatprep.subr.mxu1 %v6463_v32  ;;  %v1959_v30 = vadd.f32 %v8396_v28, %v8395_v27  ;;  %v7215_v28 = vld [vmem:[%s7840_s5 + $0x138] sm:$0xff] }
 0xb18   :  { %2859 = vmatpush1.msra.mxu0 %v6470_v33  ;;  %2930 = vmatpush1.msra.mxu1 %v6475_v17  ;;  %v8397_v33 = vld [vmem:[#allocation18_spill] sm:$0xff] }
 0xb19   :  { %2860 = vmatprep.subr.mxu0 %v6482_v18  ;;  %2931 = vmatprep.subr.mxu1 %v6487_v19  ;;  %v1961_v17 = vadd.f32 %v8397_v33, %v6807_v6  ;;  %v7233_v33 = vld [vmem:[%s7840_s5 + $0x108] sm:$0xff] }
 0xb1a   :  { %2861 = vmatpush1.msra.mxu0 %v6494_v21  ;;  %2932 = vmatpush1.msra.mxu1 %v6499_v22 }
 0xb1b   :  { %2862 = vmatprep.subr.mxu0 %v6506_v24  ;;  %2933 = vmatprep.subr.mxu1 %v6511_v31 }
 0xb1c   :  { %2863 = vmatpush1.msra.mxu0 %v6518_v34  ;;  %2934 = vmatpush1.msra.mxu1 %v6523_v35  ;;  %v8398_v35 = vld [vmem:[#allocation19_spill] sm:$0xff] }
 0xb1d   :  { %2864 = vmatprep.subr.mxu0 %v6530_v36  ;;  %2935 = vmatprep.subr.mxu1 %v6535_v37  ;;  %v2074_v36 = vadd.f32 %v8398_v35, %v8351_v53  ;;  %v7287_v35 = vld [vmem:[%s7840_s5 + $0xd8] sm:$0xff] }
 0xb1e   :  { %2865 = vmatpush1.msra.mxu0 %v6542_v39  ;;  %2936 = vmatpush1.msra.mxu1 %v8354_v23  ;;  %v8399_v39 = vld [vmem:[#allocation17_spill] sm:$0xff] }
 0xb1f   :  { %2866 = vmatprep.subr.mxu0 %v8355_v5  ;;  %2937 = vmatprep.subr.mxu1 %v8356_v25  ;;  %v2072_v23 = vadd.f32 %v8399_v39, %v6824_v13  ;;  %v7305_v39 = vld [vmem:[%s7840_s5 + $0xa8] sm:$0xff] }
 0xb20   :  { %2867 = vmatpush1.msra.mxu0 %v8357_v54  ;;  %2938 = vmatpush1.msra.mxu1 %v8358_v62 }
 0xb21   :  { %2868 = vmatprep.subr.mxu0 %v8359_v50  ;;  %2939 = vmatprep.subr.mxu1 %v8360_v61 }
 0xb22   :  { %2869 = vmatpush1.msra.mxu0 %v8361_v4  ;;  %2940 = vmatpush1.msra.mxu1 %v8362_v1 }
 0xb23   :  { %2870 = vmatprep.subr.mxu0 %v8363_v38  ;;  %2941 = vmatprep.subr.mxu1 %v8364_v63 }
 0xb24   :  { %2871 = vmatpush1.msra.mxu0 %v8365_v51  ;;  %2942 = vmatpush1.msra.mxu1 %v8383_v58  ;;  %v7161_v58 = vld [vmem:[%s7840_s5 + $0x168] sm:$0xff] }
 0xb25   :  { %2872 = vmatprep.subr.mxu0 %v8384_v29  ;;  %2943 = vmatprep.subr.mxu1 %v8385_v3  ;;  %v7167_v29 = vld [vmem:[%s7840_s5 + $0x178] sm:$0xff]  ;;  %v7173_v3 = vld [vmem:[%s7840_s5 + $0x160] sm:$0xff] }
 0xb26   :  { %2873 = vmatpush1.msra.mxu0 %v8386_v59  ;;  %2944 = vmatpush1.msra.mxu1 %v8387_v57  ;;  %v7179_v59 = vld [vmem:[%s7840_s5 + $0x170] sm:$0xff]  ;;  %v7185_v57 = vld [vmem:[%s7840_s5 + $0x148] sm:$0xff] }
 0xb27   :  { %2874 = vmatprep.subr.mxu0 %v8388_v56  ;;  %2945 = vmatprep.subr.mxu1 %v8389_v55  ;;  %v7191_v56 = vld [vmem:[%s7840_s5 + $0x158] sm:$0xff]  ;;  %v7197_v55 = vld [vmem:[%s7840_s5 + $0x140] sm:$0xff] }
 0xb28   :  { %2875 = vmatpush1.msra.mxu0 %v8390_v2  ;;  %2908 = vmatprep.mubr.f32.mxu0 %v8391_v20  ;;  %v7203_v2 = vld [vmem:[%s7840_s5 + $0x150] sm:$0xff] }
 0xb29   :  { %2946 = vmatpush1.msra.mxu1 %v8392_v60  ;;  %2979 = vmatprep.mubr.f32.mxu1 %v8391_v20  ;;  %v7209_v60 = vld [vmem:[%s7840_s5 + $0x128] sm:$0xff] }
 0xb2a   :  { %3014 = vmatprep.subr.mxu0 %v7113_v0  ;;  %3085 = vmatprep.subr.mxu1 %v7119_v47 }
 0xbc9   :  { %v2740_v32 = vpop.f32.mrf.mxu0  ;;  %v2811_v24 = vpop.f32.mrf.mxu1 }
 0xbca   :  { %v2816_v18 = vadd.f32 %v2740_v32, %v1959_v30  ;;  %v2818_v5 = vadd.f32 %v2811_v24, %v2072_v23  ;;  %v7221_v30 = vld [vmem:[%s7840_s5 + $0x120] sm:$0xff]  ;;  %v7227_v32 = vld [vmem:[%s7840_s5 + $0x130] sm:$0xff]  ;;  %v7311_v23 = vld [vmem:[%s7840_s5 + $0xb8] sm:$0xff] }
 0xbcb   :  { %v2742_v19 = vpop.f32.mrf.mxu0  ;;  %v2813_v34 = vpop.f32.mrf.mxu1  ;;  %v7269_v24 = vld [vmem:[%s7840_s5 + $0xe0] sm:$0xff] }
 0xbcc   :  { %v3847_v21 = vmul.f32 -1.442695, %v2816_v18  ;;  %v2817_v22 = vadd.f32 %v2742_v19, %v1961_v17  ;;  %v2819_v37 = vadd.f32 %v2813_v34, %v2074_v36  ;;  %v7239_v17 = vld [vmem:[%s7840_s5 + $0x118] sm:$0xff]  ;;  %v7245_v18 = vld [vmem:[%s7840_s5 + $0x100] sm:$0xff]  ;;  %v7251_v19 = vld [vmem:[%s7840_s5 + $0x110] sm:$0xff] }
 0xbcd   :  { %v7281_v34 = vld [vmem:[%s7840_s5 + $0xc8] sm:$0xff]  ;;  %v7293_v36 = vld [vmem:[%s7840_s5 + $0xc0] sm:$0xff] }
 0xbce   :  { %4199 = vpow2.f32 %v3847_v21  ;;  %v3848_v31 = vmul.f32 -1.442695, %v2817_v22  ;;  %v3849_v25 = vmul.f32 -1.442695, %v2819_v37  ;;  %v7257_v21 = vld [vmem:[%s7840_s5 + $0xe8] sm:$0xff]  ;;  %v7263_v22 = vld [vmem:[%s7840_s5 + $0xf8] sm:$0xff] }
 0xbcf   :  { %v7299_v37 = vld [vmem:[%s7840_s5 + $0xd0] sm:$0xff] }
 0xbd0   :  { %4201 = vpow2.f32 %v3848_v31  ;;  %v7275_v31 = vld [vmem:[%s7840_s5 + $0xf0] sm:$0xff] }
 0xbd1   :  { %4203 = vtanh.f32 %v2818_v5  ;;  %v7317_v5 = vld [vmem:[%s7840_s5 + $0xa0] sm:$0xff] }
 0xbd2   :  { %4205 = vpow2.f32 %v3849_v25  ;;  %v7323_v25 = vld [vmem:[%s7840_s5 + $0xb0] sm:$0xff] }
 0xbd3   :  { %8400 = vst [vmem:[#allocation54_spill] sm:$0xff] %v7323_v25 }
 0xbdb   :  { %v4200_v54 = vpop.eup %4199 }
 0xbdc   :  { %v2823_v62 = vadd.f32 1.0, %v4200_v54  ;;  %v7329_v54 = vld [vmem:[%s7840_s5 + $0x88] sm:$0xff] }
 0xbdd   :  { %v4202_v50 = vpop.eup %4201  ;;  %8401 = vst [vmem:[#allocation11_spill] sm:$0xff] %v7329_v54 }
 0xbde   :  { %4207 = vrcp.f32 %v2823_v62  ;;  %v2829_v61 = vadd.f32 1.0, %v4202_v50  ;;  %v4204_v4 = vpop.eup %4203  ;;  %v7335_v62 = vld [vmem:[%s7840_s5 + $0x98] sm:$0xff]  ;;  %v7341_v50 = vld [vmem:[%s7840_s5 + $0x80] sm:$0xff] }
 0xbdf   :  { %v4206_v1 = vpop.eup %4205  ;;  %8402 = vst [vmem:[#allocation9_spill] sm:$0xff] %v7335_v62  ;;  %8403 = vst [vmem:[#allocation31_spill] sm:$0xff] %v7341_v50 }
 0xbe0   :  { %4209 = vrcp.f32 %v2829_v61  ;;  %v2836_v44 = vadd.f32 1.0, %v4206_v1  ;;  %v7347_v61 = vld [vmem:[%s7840_s5 + $0x90] sm:$0xff]  ;;  %v7359_v1 = vld [vmem:[%s7840_s5 + $0x78] sm:$0xff] }
 0xbe1   :  { %8404 = vst [vmem:[#allocation32_spill] sm:$0xff] %v7347_v61  ;;  %8406 = vst [vmem:[#allocation33_spill] sm:$0xff] %v7359_v1 }
 0xbe2   :  { %4211 = vrcp.f32 %v2836_v44  ;;  %v7383_v44 = vld [vmem:[%s7840_s5 + $0x58] sm:$0xff] }
 0xbe3   :  { %8410 = vst [vmem:[#allocation2_spill] sm:$0xff] %v7383_v44 }
 0xbeb   :  { %v4208_v38 = vpop.eup %4207 }
 0xbec   :  { %v2840_v63 = vmul.f32 %v4208_v38, %v4204_v4  ;;  %v7353_v4 = vld [vmem:[%s7840_s5 + $0x68] sm:$0xff]  ;;  %v7365_v38 = vld [vmem:[%s7840_s5 + $0x60] sm:$0xff] }
 0xbed   :  { %v4210_v51 = vpop.eup %4209  ;;  %8405 = vst [vmem:[#allocation30_spill] sm:$0xff] %v7353_v4  ;;  %8407 = vst [vmem:[#allocation35_spill] sm:$0xff] %v7365_v38 }
 0xbee   :  { %v2839_v10 = vmul.f32 %v4210_v51, %v6983_v48  ;;  %v7149_v48 = vld [vmem:[%s7840_s5 + $0x180] sm:$0xff]  ;;  %v7377_v51 = vld [vmem:[%s7840_s5 + $0x48] sm:$0xff] }
 0xbef   :  { %v4212_v45 = vpop.eup %4211  ;;  %8409 = vst [vmem:[#allocation34_spill] sm:$0xff] %v7377_v51 }
 0xbf0   :  { %v7131_v16 = vadd.f32 %v2840_v63, %v2839_v10  ;;  %v7371_v63 = vld [vmem:[%s7840_s5 + $0x70] sm:$0xff]  ;;  %v7389_v10 = vld [vmem:[%s7840_s5 + $0x40] sm:$0xff] }
 0xbf1   :  { %8408 = vst [vmem:[#allocation36_spill] sm:$0xff] %v7371_v63  ;;  %8411 = vst [vmem:[#allocation3_spill] sm:$0xff] %v7389_v10 }
 0xbf2   :  { %4213 = vtanh.f32 %v7131_v16 }
 0xbff   :  { %v4214_v12 = vpop.eup %4213 }
 0xc00   :  { %v2843_v52 = vmul.f32 %v4214_v12, %v4212_v45  ;;  %v7395_v45 = vld [vmem:[%s7840_s5 + $0x50] sm:$0xff]  ;;  %v7401_v12 = vld [vmem:[%s7840_s5 + $0x28] sm:$0xff] }
 0xc01   :  { %8412 = vst [vmem:[#allocation37_spill] sm:$0xff] %v7395_v45  ;;  %8413 = vst [vmem:[#allocation39_spill] sm:$0xff] %v7401_v12 }
 0xc02   :  { %2909 = vmatmul.mubr.f32.vlgmr.msra.gmra.mxu0 %v2843_v52  ;;  %2980 = vmatmul.mubr.f32.vlgmr.msra.gmra.mxu1 %v2843_v52  ;;  %v7407_v52 = vld [vmem:[%s7840_s5 + $0x38] sm:$0xff] }
 0xc03   :  { %3015 = vmatpush1.msra.mxu0 %v6989_v41  ;;  %3086 = vmatpush1.msra.mxu1 %v6995_v8  ;;  %8414 = vst [vmem:[#allocation40_spill] sm:$0xff] %v7407_v52 }
 0xc04   :  { %3016 = vmatprep.subr.mxu0 %v7001_v14  ;;  %3087 = vmatprep.subr.mxu1 %v7007_v26 }
 0xc05   :  { %3017 = vmatpush1.msra.mxu0 %v7013_v42  ;;  %3088 = vmatpush1.msra.mxu1 %v7019_v11 }
 0xc06   :  { %3018 = vmatprep.subr.mxu0 %v7025_v40  ;;  %3089 = vmatprep.subr.mxu1 %v7031_v49 }
 0xc07   :  { %3019 = vmatpush1.msra.mxu0 %v7037_v43  ;;  %3090 = vmatpush1.msra.mxu1 %v7043_v46 }
 0xc08   :  { %3020 = vmatprep.subr.mxu0 %v7049_v9  ;;  %3091 = vmatprep.subr.mxu1 %v7055_v7 }
 0xc09   :  { %3021 = vmatpush1.msra.mxu0 %v7149_v48  ;;  %3092 = vmatpush1.msra.mxu1 %v7155_v15 }
 0xc0a   :  { %3022 = vmatprep.subr.mxu0 %v7161_v58  ;;  %3093 = vmatprep.subr.mxu1 %v7167_v29 }
 0xc0b   :  { %3023 = vmatpush1.msra.mxu0 %v7173_v3  ;;  %3094 = vmatpush1.msra.mxu1 %v7179_v59 }
 0xc0c   :  { %3024 = vmatprep.subr.mxu0 %v7185_v57  ;;  %3095 = vmatprep.subr.mxu1 %v7191_v56 }
 0xc0d   :  { %3025 = vmatpush1.msra.mxu0 %v7197_v55  ;;  %3096 = vmatpush1.msra.mxu1 %v7203_v2 }
 0xc0e   :  { %3026 = vmatprep.subr.mxu0 %v7209_v60  ;;  %3097 = vmatprep.subr.mxu1 %v7215_v28 }
 0xc0f   :  { %3027 = vmatpush1.msra.mxu0 %v7221_v30  ;;  %3098 = vmatpush1.msra.mxu1 %v7227_v32 }
 0xc10   :  { %3028 = vmatprep.subr.mxu0 %v7233_v33  ;;  %3099 = vmatprep.subr.mxu1 %v7239_v17 }
 0xc11   :  { %3029 = vmatpush1.msra.mxu0 %v7245_v18  ;;  %3100 = vmatpush1.msra.mxu1 %v7251_v19 }
 0xc12   :  { %3030 = vmatprep.subr.mxu0 %v7257_v21  ;;  %3101 = vmatprep.subr.mxu1 %v7263_v22 }
 0xc13   :  { %3031 = vmatpush1.msra.mxu0 %v7269_v24  ;;  %3102 = vmatpush1.msra.mxu1 %v7275_v31 }
 0xc14   :  { %3032 = vmatprep.subr.mxu0 %v7281_v34  ;;  %3103 = vmatprep.subr.mxu1 %v7287_v35 }
 0xc15   :  { %3033 = vmatpush1.msra.mxu0 %v7293_v36  ;;  %3104 = vmatpush1.msra.mxu1 %v7299_v37 }
 0xc16   :  { %3034 = vmatprep.subr.mxu0 %v7305_v39  ;;  %3105 = vmatprep.subr.mxu1 %v7311_v23 }
 0xc17   :  { %3035 = vmatpush1.msra.mxu0 %v7317_v5  ;;  %3106 = vmatpush1.msra.mxu1 %v7323_v25 }
 0xc18   :  { %3036 = vmatprep.subr.mxu0 %v7329_v54  ;;  %3107 = vmatprep.subr.mxu1 %v7335_v62  ;;  %v8424_v62 = vld [vmem:[#allocation21_spill] sm:$0xff] }
 0xc19   :  { %3037 = vmatpush1.msra.mxu0 %v7341_v50  ;;  %3108 = vmatpush1.msra.mxu1 %v7347_v61 }
 0xc1a   :  { %3038 = vmatprep.subr.mxu0 %v7353_v4  ;;  %3109 = vmatprep.subr.mxu1 %v7359_v1 }
 0xc1b   :  { %3039 = vmatpush1.msra.mxu0 %v7365_v38  ;;  %3110 = vmatpush1.msra.mxu1 %v7371_v63 }
 0xc1c   :  { %3040 = vmatprep.subr.mxu0 %v7377_v51  ;;  %3111 = vmatprep.subr.mxu1 %v7383_v44 }
 0xc1d   :  { %3041 = vmatpush1.msra.mxu0 %v7389_v10  ;;  %3112 = vmatpush1.msra.mxu1 %v7395_v45  ;;  %v7413_v10 = vld [vmem:[%s7840_s5 + $0x20] sm:$0xff]  ;;  %v7419_v45 = vld [vmem:[%s7840_s5 + $0x30] sm:$0xff] }
 0xc1e   :  { %3042 = vmatprep.subr.mxu0 %v7401_v12  ;;  %3113 = vmatprep.subr.mxu1 %v7407_v52  ;;  %8415 = vst [vmem:[#allocation24_spill] sm:$0xff] %v7413_v10  ;;  %8416 = vst [vmem:[#allocation29_spill] sm:$0xff] %v7419_v45  ;;  %v7425_v12 = vld [vmem:[%s7840_s5 + $0x8] sm:$0xff]  ;;  %v7431_v52 = vld [vmem:[%s7840_s5 + $0x18] sm:$0xff] }
 0xc1f   :  { %3043 = vmatpush1.msra.mxu0 %v7413_v10  ;;  %3114 = vmatpush1.msra.mxu1 %v7419_v45  ;;  %8417 = vst [vmem:[#allocation12_spill] sm:$0xff] %v7425_v12  ;;  %8418 = vst [vmem:[#allocation14_spill] sm:$0xff] %v7431_v52  ;;  %v7437_v10 = vld [vmem:[%s7840_s5] sm:$0xff] }
 0xc20   :  { %3044 = vmatprep.subr.mxu0 %v7425_v12  ;;  %3115 = vmatprep.subr.mxu1 %v7431_v52  ;;  %8419 = vst [vmem:[#allocation15_spill] sm:$0xff] %v7437_v10  ;;  %v7444_v12 = vld [vmem:[%s7840_s5 + $0x10] sm:$0xff] }
 0xc21   :  { %3045 = vmatpush1.msra.mxu0 %v7437_v10  ;;  %3078 = vmatprep.mubr.f32.mxu0 %v8391_v20  ;;  %8420 = vst [vmem:[#allocation13_spill] sm:$0xff] %v7444_v12  ;;  %v8421_v52 = vld [vmem:[#allocation20_spill] sm:$0xff]  ;;  %v8422_v10 = vld [vmem:[#allocation22_spill] sm:$0xff] }
 0xc22   :  { %3116 = vmatpush1.msra.mxu1 %v7444_v12  ;;  %3149 = vmatprep.mubr.f32.mxu1 %v8391_v20  ;;  %v1965_v45 = vadd.f32 %v8421_v52, %v8395_v27  ;;  %v1967_v51 = vadd.f32 %v8422_v10, %v6807_v6  ;;  %v2078_v52 = vadd.f32 %v8424_v62, %v6824_v13  ;;  %v8427_v62 = vld [vmem:[#allocation9_spill] sm:$0xff] }
 0xc23   :  { %3184 = vmatprep.subr.mxu0 %v7113_v0  ;;  %3255 = vmatprep.subr.mxu1 %v7119_v47  ;;  %v8423_v0 = vld [vmem:[#allocation45_spill] sm:$0xff] }
 0xc24   :  { %v2080_v50 = vadd.f32 %v8423_v0, %v8351_v53 }
 0xcc2   :  { %v2910_v44 = vpop.f32.mrf.mxu0  ;;  %v2981_v61 = vpop.f32.mrf.mxu1 }
 0xcc3   :  { %v2986_v63 = vadd.f32 %v2910_v44, %v1965_v45  ;;  %v2988_v27 = vadd.f32 %v2981_v61, %v2078_v52  ;;  %v8428_v61 = vld [vmem:[#allocation31_spill] sm:$0xff]  ;;  %v8430_v52 = vld [vmem:[#allocation30_spill] sm:$0xff] }
 0xcc4   :  { %v2912_v38 = vpop.f32.mrf.mxu0  ;;  %v2983_v20 = vpop.f32.mrf.mxu1 }
 0xcc5   :  { %v3850_v1 = vmul.f32 -1.442695, %v2986_v63  ;;  %v2987_v4 = vadd.f32 %v2912_v38, %v1967_v51  ;;  %v2989_v47 = vadd.f32 %v2983_v20, %v2080_v50 }
 0xcc7   :  { %4215 = vpow2.f32 %v3850_v1  ;;  %v3851_v12 = vmul.f32 -1.442695, %v2987_v4  ;;  %v3852_v54 = vmul.f32 -1.442695, %v2989_v47 }
 0xcc9   :  { %4217 = vpow2.f32 %v3851_v12  ;;  %v8429_v12 = vld [vmem:[#allocation32_spill] sm:$0xff] }
 0xcca   :  { %4219 = vtanh.f32 %v2988_v27 }
 0xccb   :  { %4221 = vpow2.f32 %v3852_v54  ;;  %v8426_v54 = vld [vmem:[#allocation11_spill] sm:$0xff] }
 0xcd4   :  { %v4216_v25 = vpop.eup %4215 }
 0xcd5   :  { %v2993_v10 = vadd.f32 1.0, %v4216_v25 }
 0xcd6   :  { %v4218_v44 = vpop.eup %4217 }
 0xcd7   :  { %4223 = vrcp.f32 %v2993_v10  ;;  %v2999_v1 = vadd.f32 1.0, %v4218_v44  ;;  %v4220_v4 = vpop.eup %4219  ;;  %v8431_v10 = vld [vmem:[#allocation33_spill] sm:$0xff]  ;;  %v8432_v44 = vld [vmem:[#allocation35_spill] sm:$0xff] }
 0xcd8   :  { %v4222_v38 = vpop.eup %4221 }
 0xcd9   :  { %4225 = vrcp.f32 %v2999_v1  ;;  %v3006_v0 = vadd.f32 1.0, %v4222_v38  ;;  %v8433_v1 = vld [vmem:[#allocation36_spill] sm:$0xff]  ;;  %v8435_v38 = vld [vmem:[#allocation2_spill] sm:$0xff] }
 0xcdb   :  { %4227 = vrcp.f32 %v3006_v0  ;;  %v8439_v0 = vld [vmem:[#allocation40_spill] sm:$0xff] }
 0xce4   :  { %v4224_v63 = vpop.eup %4223 }
 0xce5   :  { %v3010_v51 = vmul.f32 %v4224_v63, %v4220_v4  ;;  %v8434_v4 = vld [vmem:[#allocation34_spill] sm:$0xff]  ;;  %v8436_v63 = vld [vmem:[#allocation3_spill] sm:$0xff] }
 0xce6   :  { %v4226_v45 = vpop.eup %4225 }
 0xce7   :  { %v3009_v20 = vmul.f32 %v4226_v45, %v7131_v16  ;;  %v8425_v16 = vld [vmem:[#allocation54_spill] sm:$0xff]  ;;  %v8438_v45 = vld [vmem:[#allocation39_spill] sm:$0xff] }
 0xce8   :  { %v4228_v47 = vpop.eup %4227 }
 0xce9   :  { %v7459_v50 = vadd.f32 %v3010_v51, %v3009_v20  ;;  %v8437_v51 = vld [vmem:[#allocation37_spill] sm:$0xff]  ;;  %v8440_v20 = vld [vmem:[#allocation24_spill] sm:$0xff] }
 0xceb   :  { %4229 = vtanh.f32 %v7459_v50 }
 0xcf8   :  { %v4230_v27 = vpop.eup %4229 }
 0xcf9   :  { %v3013_v25 = vmul.f32 %v4230_v27, %v4228_v47  ;;  %v8441_v47 = vld [vmem:[#allocation29_spill] sm:$0xff]  ;;  %v8442_v27 = vld [vmem:[#allocation12_spill] sm:$0xff] }
 0xcfb   :  { %3079 = vmatmul.mubr.f32.vlgmr.msra.gmra.mxu0 %v3013_v25  ;;  %3150 = vmatmul.mubr.f32.vlgmr.msra.gmra.mxu1 %v3013_v25  ;;  %v8443_v25 = vld [vmem:[#allocation14_spill] sm:$0xff] }
 0xcfc   :  { %3185 = vmatpush1.msra.mxu0 %v6989_v41  ;;  %3256 = vmatpush1.msra.mxu1 %v6995_v8 }
 0xcfd   :  { %3186 = vmatprep.subr.mxu0 %v7001_v14  ;;  %3257 = vmatprep.subr.mxu1 %v7007_v26 }
 0xcfe   :  { %3187 = vmatpush1.msra.mxu0 %v7013_v42  ;;  %3258 = vmatpush1.msra.mxu1 %v7019_v11 }
 0xcff   :  { %3188 = vmatprep.subr.mxu0 %v7025_v40  ;;  %3259 = vmatprep.subr.mxu1 %v7031_v49 }
 0xd00   :  { %3189 = vmatpush1.msra.mxu0 %v7037_v43  ;;  %3260 = vmatpush1.msra.mxu1 %v7043_v46 }
 0xd01   :  { %3190 = vmatprep.subr.mxu0 %v7049_v9  ;;  %3261 = vmatprep.subr.mxu1 %v7055_v7 }
 0xd02   :  { %3191 = vmatpush1.msra.mxu0 %v7149_v48  ;;  %3262 = vmatpush1.msra.mxu1 %v7155_v15 }
 0xd03   :  { %3192 = vmatprep.subr.mxu0 %v7161_v58  ;;  %3263 = vmatprep.subr.mxu1 %v7167_v29 }
 0xd04   :  { %3193 = vmatpush1.msra.mxu0 %v7173_v3  ;;  %3264 = vmatpush1.msra.mxu1 %v7179_v59 }
 0xd05   :  { %3194 = vmatprep.subr.mxu0 %v7185_v57  ;;  %3265 = vmatprep.subr.mxu1 %v7191_v56 }
 0xd06   :  { %3195 = vmatpush1.msra.mxu0 %v7197_v55  ;;  %3266 = vmatpush1.msra.mxu1 %v7203_v2 }
 0xd07   :  { %3196 = vmatprep.subr.mxu0 %v7209_v60  ;;  %3267 = vmatprep.subr.mxu1 %v7215_v28 }
 0xd08   :  { %3197 = vmatpush1.msra.mxu0 %v7221_v30  ;;  %3268 = vmatpush1.msra.mxu1 %v7227_v32 }
 0xd09   :  { %3198 = vmatprep.subr.mxu0 %v7233_v33  ;;  %3269 = vmatprep.subr.mxu1 %v7239_v17 }
 0xd0a   :  { %3199 = vmatpush1.msra.mxu0 %v7245_v18  ;;  %3270 = vmatpush1.msra.mxu1 %v7251_v19 }
 0xd0b   :  { %3200 = vmatprep.subr.mxu0 %v7257_v21  ;;  %3271 = vmatprep.subr.mxu1 %v7263_v22 }
 0xd0c   :  { %3201 = vmatpush1.msra.mxu0 %v7269_v24  ;;  %3272 = vmatpush1.msra.mxu1 %v7275_v31 }
 0xd0d   :  { %3202 = vmatprep.subr.mxu0 %v7281_v34  ;;  %3273 = vmatprep.subr.mxu1 %v7287_v35 }
 0xd0e   :  { %3203 = vmatpush1.msra.mxu0 %v7293_v36  ;;  %3274 = vmatpush1.msra.mxu1 %v7299_v37 }
 0xd0f   :  { %3204 = vmatprep.subr.mxu0 %v7305_v39  ;;  %3275 = vmatprep.subr.mxu1 %v7311_v23 }
 0xd10   :  { %3205 = vmatpush1.msra.mxu0 %v7317_v5  ;;  %3276 = vmatpush1.msra.mxu1 %v8425_v16 }
 0xd11   :  { %3206 = vmatprep.subr.mxu0 %v8426_v54  ;;  %3277 = vmatprep.subr.mxu1 %v8427_v62  ;;  %v8453_v62 = vld [vmem:[#allocation48_spill] sm:$0xff] }
 0xd12   :  { %3207 = vmatpush1.msra.mxu0 %v8428_v61  ;;  %3278 = vmatpush1.msra.mxu1 %v8429_v12 }
 0xd13   :  { %3208 = vmatprep.subr.mxu0 %v8430_v52  ;;  %3279 = vmatprep.subr.mxu1 %v8431_v10 }
 0xd14   :  { %3209 = vmatpush1.msra.mxu0 %v8432_v44  ;;  %3280 = vmatpush1.msra.mxu1 %v8433_v1  ;;  %v8444_v1 = vld [vmem:[#allocation15_spill] sm:$0xff] }
 0xd15   :  { %3210 = vmatprep.subr.mxu0 %v8434_v4  ;;  %3281 = vmatprep.subr.mxu1 %v8435_v38  ;;  %v8445_v4 = vmov 0.0   ;;  %v8446_v38 = vld [vmem:[#allocation13_spill] sm:$0xff] }
 0xd16   :  { %3211 = vmatpush1.msra.mxu0 %v8436_v63  ;;  %3282 = vmatpush1.msra.mxu1 %v8437_v51  ;;  %v8447_v51 = vld [vmem:[#allocation8_spill] sm:$0xff] }
 0xd17   :  { %3212 = vmatprep.subr.mxu0 %v8438_v45  ;;  %3283 = vmatprep.subr.mxu1 %v8439_v0  ;;  %v8448_v45 = vld [vmem:[#allocation10_spill] sm:$0xff]  ;;  %v8449_v0 = vld [vmem:[#allocation23_spill] sm:$0xff] }
 0xd18   :  { %3213 = vmatpush1.msra.mxu0 %v8440_v20  ;;  %3284 = vmatpush1.msra.mxu1 %v8441_v47  ;;  %v8450_v20 = vld [vmem:[#allocation47_spill] sm:$0xff] }
 0xd19   :  { %3214 = vmatprep.subr.mxu0 %v8442_v27  ;;  %3285 = vmatprep.subr.mxu1 %v8443_v25  ;;  %v1971_v63 = vadd.f32 %v8450_v20, %v8449_v0  ;;  %v8451_v27 = vld [vmem:[#allocation46_spill] sm:$0xff]  ;;  %v2084_v20 = vadd.f32 %v8453_v62, %v6824_v13 }
 0xd1a   :  { %3215 = vmatpush1.msra.mxu0 %v8444_v1  ;;  %3248 = vmatprep.mubr.f32.mxu0 %v8445_v4  ;;  %v1973_v44 = vadd.f32 %v8451_v27, %v6807_v6 }
 0xd1b   :  { %3286 = vmatpush1.msra.mxu1 %v8446_v38  ;;  %3319 = vmatprep.mubr.f32.mxu1 %v8445_v4 }
 0xd1c   :  { %3354 = vmatprep.subr.mxu0 %v8447_v51  ;;  %3425 = vmatprep.subr.mxu1 %v8448_v45  ;;  %v8452_v51 = vld [vmem:[#allocation53_spill] sm:$0xff] }
 0xd1d   :  { %v2086_v61 = vadd.f32 %v8452_v51, %v8351_v53 }
 0xdbb   :  { %v3080_v47 = vpop.f32.mrf.mxu0  ;;  %v3151_v12 = vpop.f32.mrf.mxu1 }
 0xdbc   :  { %v3156_v25 = vadd.f32 %v3080_v47, %v1971_v63  ;;  %v3158_v0 = vadd.f32 %v3151_v12, %v2084_v20 }
 0xdbd   :  { %v3082_v10 = vpop.f32.mrf.mxu0  ;;  %v3153_v4 = vpop.f32.mrf.mxu1 }
 0xdbe   :  { %v3853_v1 = vmul.f32 -1.442695, %v3156_v25  ;;  %v3157_v52 = vadd.f32 %v3082_v10, %v1973_v44  ;;  %v3159_v45 = vadd.f32 %v3153_v4, %v2086_v61 }
 0xdc0   :  { %4231 = vpow2.f32 %v3853_v1  ;;  %v3854_v38 = vmul.f32 -1.442695, %v3157_v52  ;;  %v3855_v54 = vmul.f32 -1.442695, %v3159_v45 }
 0xdc2   :  { %4233 = vpow2.f32 %v3854_v38 }
 0xdc3   :  { %4235 = vtanh.f32 %v3158_v0 }
 0xdc4   :  { %4237 = vpow2.f32 %v3855_v54 }
 0xdcd   :  { %v4232_v16 = vpop.eup %4231 }
 0xdce   :  { %v3163_v27 = vadd.f32 1.0, %v4232_v16 }
 0xdcf   :  { %v4234_v63 = vpop.eup %4233 }
 0xdd0   :  { %4239 = vrcp.f32 %v3163_v27  ;;  %v3169_v10 = vadd.f32 1.0, %v4234_v63  ;;  %v4236_v52 = vpop.eup %4235 }
 0xdd1   :  { %v4238_v44 = vpop.eup %4237 }
 0xdd2   :  { %4241 = vrcp.f32 %v3169_v10  ;;  %v3176_v25 = vadd.f32 1.0, %v4238_v44 }
 0xdd4   :  { %4243 = vrcp.f32 %v3176_v25 }
 0xddd   :  { %v4240_v1 = vpop.eup %4239 }
 0xdde   :  { %v3180_v38 = vmul.f32 %v4240_v1, %v4236_v52 }
 0xddf   :  { %v4242_v47 = vpop.eup %4241 }
 0xde0   :  { %v3179_v61 = vmul.f32 %v4242_v47, %v7459_v50 }
 0xde1   :  { %v4244_v16 = vpop.eup %4243 }
 0xde2   :  { %v7537_v4 = vadd.f32 %v3180_v38, %v3179_v61 }
 0xde4   :  { %4245 = vtanh.f32 %v7537_v4 }
 0xdf1   :  { %v4246_v62 = vpop.eup %4245 }
 0xdf2   :  { %v3183_v12 = vmul.f32 %v4246_v62, %v4244_v16  ;;  %v3539_v16 = vld [vmem:[%s7842_s7 + $0x78] sm:$0xff]  ;;  %v3537_v62 = vld [vmem:[%s7842_s7 + $0x68] sm:$0xff] }
 0xdf4   :  { %3249 = vmatmul.mubr.f32.vlgmr.msra.gmra.mxu0 %v3183_v12  ;;  %3320 = vmatmul.mubr.f32.vlgmr.msra.gmra.mxu1 %v3183_v12  ;;  %v3536_v12 = vld [vmem:[%s7842_s7 + $0x60] sm:$0xff] }
 0xdf5   :  { %3355 = vmatpush1.msra.mxu0 %v6989_v41  ;;  %3426 = vmatpush1.msra.mxu1 %v6995_v8  ;;  %v8454_v41 = vld [vmem:[#allocation54_spill] sm:$0xff]  ;;  %v8455_v8 = vld [vmem:[#allocation11_spill] sm:$0xff] }
 0xdf6   :  { %3356 = vmatprep.subr.mxu0 %v7001_v14  ;;  %3427 = vmatprep.subr.mxu1 %v7007_v26  ;;  %v8456_v14 = vld [vmem:[#allocation9_spill] sm:$0xff]  ;;  %v8457_v26 = vld [vmem:[#allocation31_spill] sm:$0xff] }
 0xdf7   :  { %3357 = vmatpush1.msra.mxu0 %v7013_v42  ;;  %3428 = vmatpush1.msra.mxu1 %v7019_v11  ;;  %v8458_v42 = vld [vmem:[#allocation32_spill] sm:$0xff]  ;;  %v8459_v11 = vld [vmem:[#allocation30_spill] sm:$0xff] }
 0xdf8   :  { %3358 = vmatprep.subr.mxu0 %v7025_v40  ;;  %3429 = vmatprep.subr.mxu1 %v7031_v49  ;;  %v8460_v40 = vld [vmem:[#allocation33_spill] sm:$0xff]  ;;  %v8461_v49 = vld [vmem:[#allocation35_spill] sm:$0xff] }
 0xdf9   :  { %3359 = vmatpush1.msra.mxu0 %v7037_v43  ;;  %3430 = vmatpush1.msra.mxu1 %v7043_v46  ;;  %v8462_v43 = vld [vmem:[#allocation36_spill] sm:$0xff]  ;;  %v8463_v46 = vld [vmem:[#allocation34_spill] sm:$0xff] }
 0xdfa   :  { %3360 = vmatprep.subr.mxu0 %v7049_v9  ;;  %3431 = vmatprep.subr.mxu1 %v7055_v7  ;;  %v8464_v9 = vld [vmem:[#allocation2_spill] sm:$0xff]  ;;  %v8465_v7 = vld [vmem:[#allocation3_spill] sm:$0xff] }
 0xdfb   :  { %3361 = vmatpush1.msra.mxu0 %v7149_v48  ;;  %3432 = vmatpush1.msra.mxu1 %v7155_v15  ;;  %v8466_v48 = vld [vmem:[#allocation37_spill] sm:$0xff]  ;;  %v8467_v15 = vld [vmem:[#allocation39_spill] sm:$0xff] }
 0xdfc   :  { %3362 = vmatprep.subr.mxu0 %v7161_v58  ;;  %3433 = vmatprep.subr.mxu1 %v7167_v29  ;;  %v8468_v58 = vld [vmem:[#allocation40_spill] sm:$0xff] }
 0xdfd   :  { %3363 = vmatpush1.msra.mxu0 %v7173_v3  ;;  %3434 = vmatpush1.msra.mxu1 %v7179_v59  ;;  %v8469_v29 = vld [vmem:[#allocation24_spill] sm:$0xff]  ;;  %v8470_v3 = vld [vmem:[#allocation29_spill] sm:$0xff] }
 0xdfe   :  { %3364 = vmatprep.subr.mxu0 %v7185_v57  ;;  %3435 = vmatprep.subr.mxu1 %v7191_v56  ;;  %v8471_v59 = vld [vmem:[#allocation12_spill] sm:$0xff]  ;;  %v8472_v57 = vld [vmem:[#allocation14_spill] sm:$0xff]  ;;  %v8473_v56 = vld [vmem:[#allocation15_spill] sm:$0xff] }
 0xdff   :  { %3365 = vmatpush1.msra.mxu0 %v7197_v55  ;;  %3436 = vmatpush1.msra.mxu1 %v7203_v2  ;;  %v8474_v55 = vmov 0.0   ;;  %v8475_v2 = vld [vmem:[#allocation13_spill] sm:$0xff] }
 0xe00   :  { %3366 = vmatprep.subr.mxu0 %v7209_v60  ;;  %3437 = vmatprep.subr.mxu1 %v7215_v28  ;;  %v8476_v60 = vld [vmem:[#allocation23_spill] sm:$0xff]  ;;  %v8477_v28 = vld [vmem:[#allocation4_spill] sm:$0xff] }
 0xe01   :  { %3367 = vmatpush1.msra.mxu0 %v7221_v30  ;;  %3438 = vmatpush1.msra.mxu1 %v7227_v32  ;;  %v1977_v30 = vadd.f32 %v8477_v28, %v8476_v60  ;;  %v3626_v28 = vld [vmem:[%s7843_s9 + $0x30] sm:$0xff] }
 0xe02   :  { %3368 = vmatprep.subr.mxu0 %v7233_v33  ;;  %3439 = vmatprep.subr.mxu1 %v7239_v17  ;;  %v8478_v33 = vld [vmem:[#allocation27_spill] sm:$0xff] }
 0xe03   :  { %3369 = vmatpush1.msra.mxu0 %v7245_v18  ;;  %3440 = vmatpush1.msra.mxu1 %v7251_v19  ;;  %v1979_v17 = vadd.f32 %v8478_v33, %v6807_v6  ;;  %v3623_v33 = vld [vmem:[%s7843_s9 + $0x18] sm:$0xff] }
 0xe04   :  { %3370 = vmatprep.subr.mxu0 %v7257_v21  ;;  %3441 = vmatprep.subr.mxu1 %v7263_v22 }
 0xe05   :  { %3371 = vmatpush1.msra.mxu0 %v7269_v24  ;;  %3442 = vmatpush1.msra.mxu1 %v7275_v31 }
 0xe06   :  { %3372 = vmatprep.subr.mxu0 %v7281_v34  ;;  %3443 = vmatprep.subr.mxu1 %v7287_v35  ;;  %v8479_v35 = vld [vmem:[#allocation49_spill] sm:$0xff] }
 0xe07   :  { %3373 = vmatpush1.msra.mxu0 %v7293_v36  ;;  %3444 = vmatpush1.msra.mxu1 %v7299_v37  ;;  %v2092_v36 = vadd.f32 %v8479_v35, %v8351_v53 }
 0xe08   :  { %3374 = vmatprep.subr.mxu0 %v7305_v39  ;;  %3445 = vmatprep.subr.mxu1 %v7311_v23  ;;  %v8480_v39 = vld [vmem:[#allocation7_spill] sm:$0xff] }
 0xe09   :  { %3375 = vmatpush1.msra.mxu0 %v7317_v5  ;;  %3446 = vmatpush1.msra.mxu1 %v8454_v41  ;;  %v2090_v23 = vadd.f32 %v8480_v39, %v6824_v13  ;;  %v3535_v41 = vld [vmem:[%s7842_s7 + $0x58] sm:$0xff] }
 0xe0a   :  { %3376 = vmatprep.subr.mxu0 %v8455_v8  ;;  %3447 = vmatprep.subr.mxu1 %v8456_v14  ;;  %v3534_v8 = vld [vmem:[%s7842_s7 + $0x50] sm:$0xff]  ;;  %v3533_v14 = vld [vmem:[%s7842_s7 + $0x48] sm:$0xff] }
 0xe0b   :  { %3377 = vmatpush1.msra.mxu0 %v8457_v26  ;;  %3448 = vmatpush1.msra.mxu1 %v8458_v42  ;;  %v3532_v26 = vld [vmem:[%s7842_s7 + $0x40] sm:$0xff]  ;;  %v3531_v42 = vld [vmem:[%s7842_s7 + $0x38] sm:$0xff] }
 0xe0c   :  { %3378 = vmatprep.subr.mxu0 %v8459_v11  ;;  %3449 = vmatprep.subr.mxu1 %v8460_v40  ;;  %v3530_v11 = vld [vmem:[%s7842_s7 + $0x30] sm:$0xff]  ;;  %v3529_v40 = vld [vmem:[%s7842_s7 + $0x28] sm:$0xff] }
 0xe0d   :  { %3379 = vmatpush1.msra.mxu0 %v8461_v49  ;;  %3450 = vmatpush1.msra.mxu1 %v8462_v43  ;;  %v3528_v49 = vld [vmem:[%s7842_s7 + $0x20] sm:$0xff]  ;;  %v3527_v43 = vld [vmem:[%s7842_s7 + $0x18] sm:$0xff] }
 0xe0e   :  { %3380 = vmatprep.subr.mxu0 %v8463_v46  ;;  %3451 = vmatprep.subr.mxu1 %v8464_v9  ;;  %v3526_v46 = vld [vmem:[%s7842_s7 + $0x10] sm:$0xff]  ;;  %v3525_v9 = vld [vmem:[%s7842_s7 + $0x8] sm:$0xff] }
 0xe0f   :  { %3381 = vmatpush1.msra.mxu0 %v8465_v7  ;;  %3452 = vmatpush1.msra.mxu1 %v8466_v48  ;;  %v3524_v7 = vld [vmem:[%s7842_s7] sm:$0xff]  ;;  %v3635_v48 = vld [vmem:[%s7843_s9 + $0x78] sm:$0xff] }
 0xe10   :  { %3382 = vmatprep.subr.mxu0 %v8467_v15  ;;  %3453 = vmatprep.subr.mxu1 %v8468_v58  ;;  %v3634_v15 = vld [vmem:[%s7843_s9 + $0x70] sm:$0xff]  ;;  %v3633_v58 = vld [vmem:[%s7843_s9 + $0x68] sm:$0xff] }
 0xe11   :  { %3383 = vmatpush1.msra.mxu0 %v8469_v29  ;;  %3454 = vmatpush1.msra.mxu1 %v8470_v3  ;;  %v3632_v29 = vld [vmem:[%s7843_s9 + $0x60] sm:$0xff]  ;;  %v3631_v3 = vld [vmem:[%s7843_s9 + $0x58] sm:$0xff] }
 0xe12   :  { %3384 = vmatprep.subr.mxu0 %v8471_v59  ;;  %3455 = vmatprep.subr.mxu1 %v8472_v57  ;;  %v3630_v59 = vld [vmem:[%s7843_s9 + $0x50] sm:$0xff]  ;;  %v3629_v57 = vld [vmem:[%s7843_s9 + $0x48] sm:$0xff] }
 0xe13   :  { %3385 = vmatpush1.msra.mxu0 %v8473_v56  ;;  %3418 = vmatprep.mubr.f32.mxu0 %v8474_v55  ;;  %v3628_v56 = vld [vmem:[%s7843_s9 + $0x40] sm:$0xff] }
 0xe14   :  { %3456 = vmatpush1.msra.mxu1 %v8475_v2  ;;  %3489 = vmatprep.mubr.f32.mxu1 %v8474_v55  ;;  %v3627_v2 = vld [vmem:[%s7843_s9 + $0x38] sm:$0xff] }
 0xe15   :  { %3916 = vmatprep.subr.mxu0 %v8474_v55  ;;  %3951 = vmatprep.subr.mxu1 %v8474_v55 }
 0xeb4   :  { %v3250_v32 = vpop.f32.mrf.mxu0  ;;  %v3321_v24 = vpop.f32.mrf.mxu1 }
 0xeb5   :  { %v3326_v18 = vadd.f32 %v3250_v32, %v1977_v30  ;;  %v3328_v5 = vadd.f32 %v3321_v24, %v2090_v23  ;;  %v3625_v30 = vld [vmem:[%s7843_s9 + $0x28] sm:$0xff]  ;;  %v3624_v32 = vld [vmem:[%s7843_s9 + $0x20] sm:$0xff]  ;;  %v8483_v23 = vld [vmem:[#allocation25_spill] sm:$0xff] }
 0xeb6   :  { %v3252_v19 = vpop.f32.mrf.mxu0  ;;  %v3323_v34 = vpop.f32.mrf.mxu1 }
 0xeb7   :  { %v3856_v21 = vmul.f32 -1.442695, %v3326_v18  ;;  %v3327_v22 = vadd.f32 %v3252_v19, %v1979_v17  ;;  %v3329_v37 = vadd.f32 %v3323_v34, %v2092_v36  ;;  %v8481_v17 = vld [vmem:[#allocation51_spill] sm:$0xff] }
 0xeb8   :  { %v1983_v18 = vadd.f32 %v8481_v17, %v8476_v60 }
 0xeb9   :  { %4247 = vpow2.f32 %v3856_v21  ;;  %v3857_v31 = vmul.f32 -1.442695, %v3327_v22  ;;  %v3858_v50 = vmul.f32 -1.442695, %v3329_v37  ;;  %v8482_v21 = vld [vmem:[#allocation50_spill] sm:$0xff] }
 0xeba   :  { %v1985_v22 = vadd.f32 %v8482_v21, %v6807_v6 }
 0xebb   :  { %4249 = vpow2.f32 %v3857_v31 }
 0xebc   :  { %4251 = vtanh.f32 %v3328_v5  ;;  %v2098_v5 = vadd.f32 %v8483_v23, %v8351_v53 }
 0xebd   :  { %4253 = vpow2.f32 %v3858_v50 }
 0xec6   :  { %v4248_v54 = vpop.eup %4247 }
 0xec7   :  { %v3333_v0 = vadd.f32 1.0, %v4248_v54  ;;  %v8484_v54 = vld [vmem:[#allocation52_spill] sm:$0xff] }
 0xec8   :  { %v4250_v51 = vpop.eup %4249  ;;  %v2096_v60 = vadd.f32 %v8484_v54, %v6824_v13 }
 0xec9   :  { %4255 = vrcp.f32 %v3333_v0  ;;  %v3339_v45 = vadd.f32 1.0, %v4250_v51  ;;  %v4252_v20 = vpop.eup %4251 }
 0xeca   :  { %v4254_v27 = vpop.eup %4253 }
 0xecb   :  { %4257 = vrcp.f32 %v3339_v45  ;;  %v3346_v44 = vadd.f32 1.0, %v4254_v27 }
 0xecd   :  { %4259 = vrcp.f32 %v3346_v44 }
 0xed6   :  { %v4256_v63 = vpop.eup %4255 }
 0xed7   :  { %v3350_v10 = vmul.f32 %v4256_v63, %v4252_v20 }
 0xed8   :  { %v4258_v52 = vpop.eup %4257 }
 0xed9   :  { %v3349_v1 = vmul.f32 %v4258_v52, %v7537_v4  ;;  %v3538_v4 = vld [vmem:[%s7842_s7 + $0x70] sm:$0xff] }
 0xeda   :  { %v4260_v47 = vpop.eup %4259 }
 0xedb   :  { %v7615_v38 = vadd.f32 %v3350_v10, %v3349_v1 }
 0xedd   :  { %4261 = vtanh.f32 %v7615_v38 }
 0xeea   :  { %v4262_v25 = vpop.eup %4261 }
 0xeeb   :  { %v3353_v61 = vmul.f32 %v4262_v25, %v4260_v47 }
 0xeed   :  { %3419 = vmatmul.mubr.f32.vlgmr.msra.gmra.mxu0 %v3353_v61  ;;  %3490 = vmatmul.mubr.f32.vlgmr.msra.gmra.mxu1 %v3353_v61 }
 0xeee   :  { %3917 = vmatpush3.msra.mxu0 %v3539_v16  ;;  %3948 = vmatprep.mubr.msk.f32.mxu0 %vm4408_vm0, %v8474_v55 }
 0xeef   :  { %3918 = vmatprep.subr.mxu0 %v8474_v55  ;;  %3983 = vmatprep.mubr.msk.f32.mxu1 %vm4408_vm0, %v8474_v55 }
 0xef0   :  { %3919 = vmatpush3.msra.mxu0 %v3538_v4  ;;  %3952 = vmatpush3.msra.mxu1 %v3635_v48  ;;  %v3622_v4 = vld [vmem:[%s7843_s9 + $0x10] sm:$0xff]  ;;  %v3862_v48 = vld [vmem:[%s7845_s8] ss:$0 sm:$0xff] }
 0xef1   :  { %3920 = vmatprep.subr.mxu0 %v8474_v55  ;;  %3953 = vmatprep.subr.mxu1 %v8474_v55 }
 0xef2   :  { %3921 = vmatpush3.msra.mxu0 %v3537_v62  ;;  %3954 = vmatpush3.msra.mxu1 %v3634_v15  ;;  %v3621_v62 = vld [vmem:[%s7843_s9 + $0x8] sm:$0xff] }
 0xef3   :  { %3922 = vmatprep.subr.mxu0 %v8474_v55  ;;  %3955 = vmatprep.subr.mxu1 %v8474_v55 }
 0xef4   :  { %3923 = vmatpush3.msra.mxu0 %v3536_v12  ;;  %3956 = vmatpush3.msra.mxu1 %v3633_v58  ;;  %v3731_v12 = vld [vmem:[%s7844_s11 + $0x78] sm:$0xff] }
 0xef5   :  { %3924 = vmatprep.subr.mxu0 %v8474_v55  ;;  %3957 = vmatprep.subr.mxu1 %v8474_v55 }
 0xef6   :  { %3925 = vmatpush3.msra.mxu0 %v3535_v41  ;;  %3958 = vmatpush3.msra.mxu1 %v3632_v29  ;;  %v3730_v41 = vld [vmem:[%s7844_s11 + $0x70] sm:$0xff] }
 0xef7   :  { %3926 = vmatprep.subr.mxu0 %v8474_v55  ;;  %3959 = vmatprep.subr.mxu1 %v8474_v55 }
 0xef8   :  { %3927 = vmatpush3.msra.mxu0 %v3534_v8  ;;  %3960 = vmatpush3.msra.mxu1 %v3631_v3  ;;  %v3729_v8 = vld [vmem:[%s7844_s11 + $0x68] sm:$0xff] }
 0xef9   :  { %3928 = vmatprep.subr.mxu0 %v8474_v55  ;;  %3961 = vmatprep.subr.mxu1 %v8474_v55 }
 0xefa   :  { %3929 = vmatpush3.msra.mxu0 %v3533_v14  ;;  %3962 = vmatpush3.msra.mxu1 %v3630_v59  ;;  %v3728_v14 = vld [vmem:[%s7844_s11 + $0x60] sm:$0xff] }
 0xefb   :  { %3930 = vmatprep.subr.mxu0 %v8474_v55  ;;  %3963 = vmatprep.subr.mxu1 %v8474_v55 }
 0xefc   :  { %3931 = vmatpush3.msra.mxu0 %v3532_v26  ;;  %3964 = vmatpush3.msra.mxu1 %v3629_v57  ;;  %v3727_v26 = vld [vmem:[%s7844_s11 + $0x58] sm:$0xff]  ;;  %v3718_v57 = vld [vmem:[%s7844_s11 + $0x10] sm:$0xff] }
 0xefd   :  { %3932 = vmatprep.subr.mxu0 %v8474_v55  ;;  %3965 = vmatprep.subr.mxu1 %v8474_v55 }
 0xefe   :  { %3933 = vmatpush3.msra.mxu0 %v3531_v42  ;;  %3966 = vmatpush3.msra.mxu1 %v3628_v56  ;;  %v3726_v42 = vld [vmem:[%s7844_s11 + $0x50] sm:$0xff]  ;;  %v3717_v56 = vld [vmem:[%s7844_s11 + $0x8] sm:$0xff] }
 0xeff   :  { %3934 = vmatprep.subr.mxu0 %v8474_v55  ;;  %3967 = vmatprep.subr.mxu1 %v8474_v55 }
 0xf00   :  { %3935 = vmatpush3.msra.mxu0 %v3530_v11  ;;  %3968 = vmatpush3.msra.mxu1 %v3627_v2  ;;  %v3725_v11 = vld [vmem:[%s7844_s11 + $0x48] sm:$0xff]  ;;  %v3716_v2 = vld [vmem:[%s7844_s11] sm:$0xff] }
 0xf01   :  { %3936 = vmatprep.subr.mxu0 %v8474_v55  ;;  %3969 = vmatprep.subr.mxu1 %v8474_v55 }
 0xf02   :  { %3937 = vmatpush3.msra.mxu0 %v3529_v40  ;;  %3970 = vmatpush3.msra.mxu1 %v3626_v28  ;;  %v3724_v40 = vld [vmem:[%s7844_s11 + $0x40] sm:$0xff] }
 0xf03   :  { %3938 = vmatprep.subr.mxu0 %v8474_v55  ;;  %3971 = vmatprep.subr.mxu1 %v8474_v55  ;;  %v3863_v28 = vld [vmem:[%s7846_s10] ss:$0 sm:$0xff] }
 0xf04   :  { %3939 = vmatpush3.msra.mxu0 %v3528_v49  ;;  %3972 = vmatpush3.msra.mxu1 %v3625_v30  ;;  %v3723_v49 = vld [vmem:[%s7844_s11 + $0x38] sm:$0xff] }
 0xf05   :  { %3940 = vmatprep.subr.mxu0 %v8474_v55  ;;  %3973 = vmatprep.subr.mxu1 %v8474_v55 }
 0xf06   :  { %3941 = vmatpush3.msra.mxu0 %v3527_v43  ;;  %3974 = vmatpush3.msra.mxu1 %v3624_v32  ;;  %v3722_v43 = vld [vmem:[%s7844_s11 + $0x30] sm:$0xff] }
 0xf07   :  { %3942 = vmatprep.subr.mxu0 %v8474_v55  ;;  %3975 = vmatprep.subr.mxu1 %v8474_v55 }
 0xf08   :  { %3943 = vmatpush3.msra.mxu0 %v3526_v46  ;;  %3976 = vmatpush3.msra.mxu1 %v3623_v33  ;;  %v3721_v46 = vld [vmem:[%s7844_s11 + $0x28] sm:$0xff] }
 0xf09   :  { %3944 = vmatprep.subr.mxu0 %v8474_v55  ;;  %3977 = vmatprep.subr.mxu1 %v8474_v55 }
 0xf0a   :  { %3945 = vmatpush3.msra.mxu0 %v3525_v9  ;;  %3978 = vmatpush3.msra.mxu1 %v3622_v4  ;;  %v3720_v9 = vld [vmem:[%s7844_s11 + $0x20] sm:$0xff] }
 0xf0b   :  { %3946 = vmatprep.subr.mxu0 %v8474_v55  ;;  %3979 = vmatprep.subr.mxu1 %v8474_v55 }
 0xf0c   :  { %3947 = vmatpush3.msra.mxu0 %v3524_v7  ;;  %3980 = vmatpush3.msra.mxu1 %v3621_v62  ;;  %v3719_v7 = vld [vmem:[%s7844_s11 + $0x18] sm:$0xff] }
 0xf0d   :  { %3986 = vmatprep.subr.mxu0 %v8474_v55  ;;  %3981 = vmatprep.subr.mxu1 %v8474_v55 }
 0xfad   :  { %v3420_v19 = vpop.f32.mrf.mxu0  ;;  %v3491_v36 = vpop.f32.mrf.mxu1 }
 0xfae   :  { %v3496_v24 = vadd.f32 %v3420_v19, %v1983_v18  ;;  %v3498_v0 = vadd.f32 %v3491_v36, %v2096_v60  ;;  %v3864_v19 = vld [vmem:[%s7847_s12] ss:$0 sm:$0xff] }
 0xfaf   :  { %v3422_v31 = vpop.f32.mrf.mxu0  ;;  %v3493_v39 = vpop.f32.mrf.mxu1 }
 0xfb0   :  { %v3859_v34 = vmul.f32 -1.442695, %v3496_v24  ;;  %v3497_v35 = vadd.f32 %v3422_v31, %v1985_v22  ;;  %v3499_v50 = vadd.f32 %v3493_v39, %v2098_v5 }
 0xfb2   :  { %4263 = vpow2.f32 %v3859_v34  ;;  %v3860_v37 = vmul.f32 -1.442695, %v3497_v35  ;;  %v3861_v51 = vmul.f32 -1.442695, %v3499_v50 }
 0xfb4   :  { %4265 = vpow2.f32 %v3860_v37 }
 0xfb5   :  { %4267 = vtanh.f32 %v3498_v0 }
 0xfb6   :  { %4269 = vpow2.f32 %v3861_v51 }
 0xfbf   :  { %v4264_v45 = vpop.eup %4263 }
 0xfc0   :  { %v3503_v6 = vadd.f32 1.0, %v4264_v45 }
 0xfc1   :  { %v4266_v20 = vpop.eup %4265 }
 0xfc2   :  { %4271 = vrcp.f32 %v3503_v6  ;;  %v3509_v27 = vadd.f32 1.0, %v4266_v20  ;;  %v4268_v63 = vpop.eup %4267 }
 0xfc3   :  { %v4270_v10 = vpop.eup %4269 }
 0xfc4   :  { %4273 = vrcp.f32 %v3509_v27  ;;  %v3516_v53 = vadd.f32 1.0, %v4270_v10 }
 0xfc6   :  { %4275 = vrcp.f32 %v3516_v53 }
 0xfcf   :  { %v4272_v52 = vpop.eup %4271 }
 0xfd0   :  { %v3520_v44 = vmul.f32 %v4272_v52, %v4268_v63 }
 0xfd1   :  { %v4274_v1 = vpop.eup %4273 }
 0xfd2   :  { %v3519_v47 = vmul.f32 %v4274_v1, %v7615_v38  ;;  %v3620_v38 = vld [vmem:[%s7843_s9] sm:$0xff] }
 0xfd3   :  { %v4276_v13 = vpop.eup %4275  ;;  %3982 = vmatpush3.msra.mxu1 %v3620_v38 }
 0xfd4   :  { %v3521_v25 = vadd.f32 %v3520_v44, %v3519_v47 }
 0xfd6   :  { %4277 = vtanh.f32 %v3521_v25 }
 0xfe3   :  { %v4278_v61 = vpop.eup %4277 }
 0xfe4   :  { %v3523_v16 = vmul.f32 %v4278_v61, %v4276_v13 }
 0xfe6   :  { %3949 = vmatmul.mubr.f32.vlgmr.msra.gmra.mxu0 %v3523_v16 }
 0xfe7   :  { %4018 = vmatprep.mubr.msk.f32.mxu0 %vm4408_vm0, %v8474_v55  ;;  %3987 = vmatpush3.msra.mxu0 %v3731_v12 }
 0xfe8   :  { %3988 = vmatprep.subr.mxu0 %v8474_v55 }
 0xfe9   :  { %3989 = vmatpush3.msra.mxu0 %v3730_v41 }
 0xfea   :  { %3990 = vmatprep.subr.mxu0 %v8474_v55 }
 0xfeb   :  { %3991 = vmatpush3.msra.mxu0 %v3729_v8 }
 0xfec   :  { %3992 = vmatprep.subr.mxu0 %v8474_v55 }
 0xfed   :  { %3993 = vmatpush3.msra.mxu0 %v3728_v14 }
 0xfee   :  { %3994 = vmatprep.subr.mxu0 %v8474_v55 }
 0xfef   :  { %3995 = vmatpush3.msra.mxu0 %v3727_v26 }
 0xff0   :  { %3996 = vmatprep.subr.mxu0 %v8474_v55 }
 0xff1   :  { %3997 = vmatpush3.msra.mxu0 %v3726_v42 }
 0xff2   :  { %3998 = vmatprep.subr.mxu0 %v8474_v55 }
 0xff3   :  { %3999 = vmatpush3.msra.mxu0 %v3725_v11 }
 0xff4   :  { %4000 = vmatprep.subr.mxu0 %v8474_v55 }
 0xff5   :  { %4001 = vmatpush3.msra.mxu0 %v3724_v40 }
 0xff6   :  { %4002 = vmatprep.subr.mxu0 %v8474_v55 }
 0xff7   :  { %4003 = vmatpush3.msra.mxu0 %v3723_v49 }
 0xff8   :  { %4004 = vmatprep.subr.mxu0 %v8474_v55 }
 0xff9   :  { %4005 = vmatpush3.msra.mxu0 %v3722_v43 }
 0xffa   :  { %4006 = vmatprep.subr.mxu0 %v8474_v55 }
 0xffb   :  { %4007 = vmatpush3.msra.mxu0 %v3721_v46 }
 0xffc   :  { %4008 = vmatprep.subr.mxu0 %v8474_v55 }
 0xffd   :  { %4009 = vmatpush3.msra.mxu0 %v3720_v9 }
 0xffe   :  { %4010 = vmatprep.subr.mxu0 %v8474_v55 }
 0xfff   :  { %4011 = vmatpush3.msra.mxu0 %v3719_v7 }
0x1000   :  { %4012 = vmatprep.subr.mxu0 %v8474_v55 }
0x1001   :  { %4013 = vmatpush3.msra.mxu0 %v3718_v57 }
0x1002   :  { %4014 = vmatprep.subr.mxu0 %v8474_v55 }
0x1003   :  { %4015 = vmatpush3.msra.mxu0 %v3717_v56 }
0x1004   :  { %4016 = vmatprep.subr.mxu0 %v8474_v55 }
0x1005   :  { %4017 = vmatpush3.msra.mxu0 %v3716_v2 }
0x10a6   :  { %v3613_v15 = vpop.f32.mrf.mxu0 }
0x10a7   :  { %v3614_v58 = vadd.f32 %v3862_v48, %v3613_v15 }
0x10a8   :  { %v3950_v29 = vpop.f32.mrf.mxu0 }
0x10a9   :  { %vm3617_vm1 = vcmp.ge.f32.partialorder %v3614_v58, 0.0  ;;  %v3618_v3 = vmul.f32 0.01, %v3614_v58 }
0x10ab   :  { %v3619_v59 = vsel %vm3617_vm1, %v3614_v58, %v3618_v3 }
0x10ac   :  { %3984 = vmatmul.mubr.f32.vlgmr.msra.gmra.mxu1 %v3619_v59 }
0x116c   :  { %v3709_v30 = vpop.f32.mrf.mxu1 }
0x116d   :  { %v3710_v32 = vadd.f32 %v3863_v28, %v3709_v30 }
0x116e   :  { %v3985_v33 = vpop.f32.mrf.mxu1 }
0x116f   :  { %vm3713_vm2 = vcmp.ge.f32.partialorder %v3710_v32, 0.0  ;;  %v3714_v17 = vmul.f32 0.01, %v3710_v32 }
0x1171   :  { %v3715_v18 = vsel %vm3713_vm2, %v3710_v32, %v3714_v17 }
0x1172   :  { %4019 = vmatmul.mubr.f32.vlgmr.msra.gmra.mxu0 %v3715_v18 }
0x1232   :  { %v3805_v21 = vpop.f32.mrf.mxu0 }
0x1233   :  { %v3806_v22 = vadd.f32 %v3864_v19, %v3805_v21 }
0x1234   :  { %v4020_v24 = vpop.f32.mrf.mxu0 }
0x1235   :  { %3809 = vst [vmem:[%s7848_s13] sm:$0xff] %v3806_v22 }

</bundles_post_ra>
